<compile_context>
chip_gen: v7x
topology: tpu7x:2x2x1
jax: 0.10.0
libtpu: 0.0.40
codegen_flags: <defaults>
</compile_context>

<pallas_src>
import functools
import math

import jax
import jax.numpy as jnp
from jax.experimental import pallas as pl
from jax.experimental.pallas import tpu as pltpu

EMB_DIM = 12
EMB_PAD = 128        # latent padded to a full 128-lane width inside the kernel
IN_DIM = 28 * 28     # 784
H1 = 128
H2 = 64


def _ae_kernel(x_ref,
               w1_ref, b1_ref, w2_ref, b2_ref, w3_ref, b3_ref,
               w4_ref, b4_ref, w5_ref, b5_ref, w6_ref, b6_ref,
               out_ref, feat_ref, *, compute_dtype):
    """Encoder + decoder for one batch tile; weights resident in VMEM.

    Matmul inputs are in `compute_dtype` (f32 = exact; bf16 recommended on
    v6e/v7x).  Accumulation is always f32 on the MXU; bias add / ReLU / tanh
    are done in f32 on the VPU/EUP.
    """
    cd = compute_dtype
    x = x_ref[...].astype(cd)

    # ---- encoder ----
    h = jnp.dot(x, w1_ref[...].astype(cd),
                preferred_element_type=jnp.float32) + b1_ref[...]
    h = jnp.maximum(h, 0.0)
    h = jnp.dot(h.astype(cd), w2_ref[...].astype(cd),
                preferred_element_type=jnp.float32) + b2_ref[...]
    h = jnp.maximum(h, 0.0)
    # w3/b3 are zero-padded to EMB_PAD columns -> feat[:, EMB_DIM:] is exactly 0.
    feat = jnp.dot(h.astype(cd), w3_ref[...].astype(cd),
                   preferred_element_type=jnp.float32) + b3_ref[...]
    feat_ref[...] = feat.astype(feat_ref.dtype)   # lane-dense (tile, 128) store

    # ---- decoder ----
    # w4 rows [EMB_DIM:] are zero, so the padded latent columns contribute nothing.
    d = jnp.dot(feat.astype(cd), w4_ref[...].astype(cd),
                preferred_element_type=jnp.float32) + b4_ref[...]
    d = jnp.maximum(d, 0.0)
    d = jnp.dot(d.astype(cd), w5_ref[...].astype(cd),
                preferred_element_type=jnp.float32) + b5_ref[...]
    d = jnp.maximum(d, 0.0)
    d = jnp.dot(d.astype(cd), w6_ref[...].astype(cd),
                preferred_element_type=jnp.float32) + b6_ref[...]
    out_ref[...] = jnp.tanh(d).astype(out_ref.dtype)


def _const_spec(shape):
    # Full-array block, same block index every grid step (weights/biases stay
    # resident in VMEM; Pallas does not re-issue their DMAs across steps).
    return pl.BlockSpec(shape, lambda i: (0, 0))


@functools.partial(jax.jit, static_argnames=("batch_tile", "compute_dtype"))
def autoencoder_forward(x, params, *, batch_tile=256, compute_dtype=jnp.float32):
    """x: (N, 784) float32. Returns (recon (N, 784) f32, feature (N, 12) f32)."""
    N, D = x.shape
    assert D == IN_DIM
    (w1, b1, w2, b2, w3, b3, w4, b4, w5, b5, w6, b6) = params

    # Lane-pad the 12-wide latent path to 128 columns with zeros (exact math).
    w3p = jnp.zeros((H2, EMB_PAD), w3.dtype).at[:, :EMB_DIM].set(w3)
    b3p = jnp.zeros((1, EMB_PAD), b3.dtype).at[:, :EMB_DIM].set(b3)
    w4p = jnp.zeros((EMB_PAD, H2), w4.dtype).at[:EMB_DIM, :].set(w4)

    # When using reduced-precision matmuls, pre-cast the (grid-constant) weights
    # once so their resident VMEM tiles are half-size and the kernel does not
    # spend per-step VPU casts on them.  Biases stay f32 (added post-matmul).
    if compute_dtype != jnp.float32:
        w1, w2, w3p, w4p, w5, w6 = (
            w.astype(compute_dtype) for w in (w1, w2, w3p, w4p, w5, w6))

    # Pad the batch up to a multiple of the tile; padded rows are sliced off.
    Np = ((N + batch_tile - 1) // batch_tile) * batch_tile
    xp = x if Np == N else jnp.pad(x, ((0, Np - N), (0, 0)))

    grid = (Np // batch_tile,)

    in_specs = [
        pl.BlockSpec((batch_tile, IN_DIM), lambda i: (i, 0)),   # x tile
        _const_spec(w1.shape), _const_spec(b1.shape),
        _const_spec(w2.shape), _const_spec(b2.shape),
        _const_spec(w3p.shape), _const_spec(b3p.shape),
        _const_spec(w4p.shape), _const_spec(b4.shape),
        _const_spec(w5.shape), _const_spec(b5.shape),
        _const_spec(w6.shape), _const_spec(b6.shape),
    ]
    out_specs = [
        pl.BlockSpec((batch_tile, IN_DIM), lambda i: (i, 0)),    # reconstruction
        pl.BlockSpec((batch_tile, EMB_PAD), lambda i: (i, 0)),   # padded latent
    ]
    out_shape = [
        jax.ShapeDtypeStruct((Np, IN_DIM), jnp.float32),
        jax.ShapeDtypeStruct((Np, EMB_PAD), jnp.float32),
    ]

    recon, feat = pl.pallas_call(
        functools.partial(_ae_kernel, compute_dtype=compute_dtype),
        grid=grid,
        in_specs=in_specs,
        out_specs=out_specs,
        out_shape=out_shape,
        compiler_params=pltpu.CompilerParams(
            dimension_semantics=("parallel",)),
    )(xp, w1, b1, w2, b2, w3p, b3p, w4p, b4, w5, b5, w6, b6)

    return recon[:N], feat[:N, :EMB_DIM]


def init_params(key):
    """Deterministic init matching PyTorch nn.Linear default (U(+-1/sqrt(fan_in))).
    Weights stored as (in_features, out_features); biases as (1, out_features)."""
    dims = [(IN_DIM, H1), (H1, H2), (H2, EMB_DIM),
            (EMB_DIM, H2), (H2, H1), (H1, IN_DIM)]
    params = []
    for (fan_in, fan_out) in dims:
        key, kw, kb = jax.random.split(key, 3)
        bound = 1.0 / math.sqrt(fan_in)
        w = jax.random.uniform(kw, (fan_in, fan_out), jnp.float32, -bound, bound)
        b = jax.random.uniform(kb, (1, fan_out), jnp.float32, -bound, bound)
        params.extend([w, b])
    return tuple(params)


def _reference_forward(x, params):
    """Plain-JAX reference for sanity checking."""
    (w1, b1, w2, b2, w3, b3, w4, b4, w5, b5, w6, b6) = params
    h = jnp.maximum(x @ w1 + b1, 0.0)
    h = jnp.maximum(h @ w2 + b2, 0.0)
    feat = h @ w3 + b3
    d = jnp.maximum(feat @ w4 + b4, 0.0)
    d = jnp.maximum(d @ w5 + b5, 0.0)
    recon = jnp.tanh(d @ w6 + b6)
    return recon, feat


if __name__ == "__main__":
    key = jax.random.PRNGKey(0)
    kp, kx = jax.random.split(key)
    params = init_params(kp)

    # 384 rows = 1.5 tiles at batch_tile=256 -> exercises both the multi-step
    # grid and the batch-padding path.
    batch = 384
    x = jax.random.normal(kx, (batch, IN_DIM), jnp.float32)

    ref_recon, ref_feat = _reference_forward(x, params)

    # Exact f32 path (matches the PyTorch module numerics).
    recon, feat = autoencoder_forward(x, params, batch_tile=256,
                                      compute_dtype=jnp.float32)
    recon = jax.block_until_ready(recon)
    feat = jax.block_until_ready(feat)
    assert recon.shape == (batch, IN_DIM)
    assert feat.shape == (batch, EMB_DIM)
    assert jnp.allclose(recon, ref_recon, atol=1e-5, rtol=1e-5)
    assert jnp.allclose(feat, ref_feat, atol=1e-4, rtol=1e-4)

    # bf16-matmul path (recommended on v6e/v7x); looser numerical tolerance.
    recon_bf, feat_bf = autoencoder_forward(x, params, batch_tile=256,
                                            compute_dtype=jnp.bfloat16)
    recon_bf = jax.block_until_ready(recon_bf)
    feat_bf = jax.block_until_ready(feat_bf)
    assert jnp.allclose(recon_bf, ref_recon, atol=1e-1, rtol=1e-1)
    assert jnp.allclose(feat_bf, ref_feat, atol=1e-1, rtol=1e-1)

    print("KERNEL_OK")
</pallas_src>

<mosaic_0001>
module attributes {stable_mosaic.version = 11 : i64} {
  func.func @_ae_kernel(%arg0: i32, %arg1: memref<256x784xf32, #tpu.memory_space<vmem>>, %arg2: memref<784x128xf32, #tpu.memory_space<vmem>>, %arg3: memref<1x128xf32, #tpu.memory_space<vmem>>, %arg4: memref<128x64xf32, #tpu.memory_space<vmem>>, %arg5: memref<1x64xf32, #tpu.memory_space<vmem>>, %arg6: memref<64x128xf32, #tpu.memory_space<vmem>>, %arg7: memref<1x128xf32, #tpu.memory_space<vmem>>, %arg8: memref<128x64xf32, #tpu.memory_space<vmem>>, %arg9: memref<1x64xf32, #tpu.memory_space<vmem>>, %arg10: memref<64x128xf32, #tpu.memory_space<vmem>>, %arg11: memref<1x128xf32, #tpu.memory_space<vmem>>, %arg12: memref<128x784xf32, #tpu.memory_space<vmem>>, %arg13: memref<1x784xf32, #tpu.memory_space<vmem>>, %arg14: memref<256x784xf32, #tpu.memory_space<vmem>>, %arg15: memref<256x128xf32, #tpu.memory_space<vmem>>) attributes {dimension_semantics = [#tpu.dimension_semantics<parallel>], iteration_bounds = array<i64: 2>, scalar_prefetch = 0 : i64, scratch_operands = 0 : i64, tpu.core_type = #tpu.core_type<tc>, window_params = [{transform_indices = @transform_0, window_bounds = array<i64: 256, 784>}, {pipeline_mode = #tpu.pipeline_mode<synchronous>, transform_indices = @transform_1, window_bounds = array<i64: 784, 128>}, {pipeline_mode = #tpu.pipeline_mode<synchronous>, transform_indices = @transform_2, window_bounds = array<i64: 1, 128>}, {pipeline_mode = #tpu.pipeline_mode<synchronous>, transform_indices = @transform_3, window_bounds = array<i64: 128, 64>}, {pipeline_mode = #tpu.pipeline_mode<synchronous>, transform_indices = @transform_4, window_bounds = array<i64: 1, 64>}, {pipeline_mode = #tpu.pipeline_mode<synchronous>, transform_indices = @transform_5, window_bounds = array<i64: 64, 128>}, {pipeline_mode = #tpu.pipeline_mode<synchronous>, transform_indices = @transform_6, window_bounds = array<i64: 1, 128>}, {pipeline_mode = #tpu.pipeline_mode<synchronous>, transform_indices = @transform_7, window_bounds = array<i64: 128, 64>}, {pipeline_mode = #tpu.pipeline_mode<synchronous>, transform_indices = @transform_8, window_bounds = array<i64: 1, 64>}, {pipeline_mode = #tpu.pipeline_mode<synchronous>, transform_indices = @transform_9, window_bounds = array<i64: 64, 128>}, {pipeline_mode = #tpu.pipeline_mode<synchronous>, transform_indices = @transform_10, window_bounds = array<i64: 1, 128>}, {pipeline_mode = #tpu.pipeline_mode<synchronous>, transform_indices = @transform_11, window_bounds = array<i64: 128, 784>}, {pipeline_mode = #tpu.pipeline_mode<synchronous>, transform_indices = @transform_12, window_bounds = array<i64: 1, 784>}, {transform_indices = @transform_13, window_bounds = array<i64: 256, 784>}, {transform_indices = @transform_14, window_bounds = array<i64: 256, 128>}]} {
    %c0 = arith.constant 0 : index
    %c0_0 = arith.constant 0 : index
    %0 = vector.load %arg1[%c0, %c0_0] : memref<256x784xf32, #tpu.memory_space<vmem>>, vector<256x784xf32>
    %c0_1 = arith.constant 0 : index
    %c0_2 = arith.constant 0 : index
    %1 = vector.load %arg2[%c0_1, %c0_2] : memref<784x128xf32, #tpu.memory_space<vmem>>, vector<784x128xf32>
    %cst = arith.constant dense<0.000000e+00> : vector<256x128xf32>
    %2 = tpu.matmul %0, %1, %cst {dimension_numbers = #tpu.dot_dimension_numbers<[1], [0], [0], [1], [0, 0, 1, 1], [], []>} : vector<256x784xf32>, vector<784x128xf32>, vector<256x128xf32> -> vector<256x128xf32>
    %c0_3 = arith.constant 0 : index
    %c0_4 = arith.constant 0 : index
    %3 = vector.load %arg3[%c0_3, %c0_4] : memref<1x128xf32, #tpu.memory_space<vmem>>, vector<1x128xf32>
    %4 = vector.broadcast %3 : vector<1x128xf32> to vector<256x128xf32>
    %5 = arith.addf %2, %4 : vector<256x128xf32>
    %cst_5 = arith.constant 0.000000e+00 : f32
    %6 = vector.broadcast %cst_5 : f32 to vector<256x128xf32>
    %7 = arith.maximumf %5, %6 : vector<256x128xf32>
    %c0_6 = arith.constant 0 : index
    %c0_7 = arith.constant 0 : index
    %8 = vector.load %arg4[%c0_6, %c0_7] : memref<128x64xf32, #tpu.memory_space<vmem>>, vector<128x64xf32>
    %cst_8 = arith.constant dense<0.000000e+00> : vector<256x64xf32>
    %9 = tpu.matmul %7, %8, %cst_8 {dimension_numbers = #tpu.dot_dimension_numbers<[1], [0], [0], [1], [0, 0, 1, 1], [], []>} : vector<256x128xf32>, vector<128x64xf32>, vector<256x64xf32> -> vector<256x64xf32>
    %c0_9 = arith.constant 0 : index
    %c0_10 = arith.constant 0 : index
    %10 = vector.load %arg5[%c0_9, %c0_10] : memref<1x64xf32, #tpu.memory_space<vmem>>, vector<1x64xf32>
    %11 = vector.broadcast %10 : vector<1x64xf32> to vector<256x64xf32>
    %12 = arith.addf %9, %11 : vector<256x64xf32>
    %cst_11 = arith.constant 0.000000e+00 : f32
    %13 = vector.broadcast %cst_11 : f32 to vector<256x64xf32>
    %14 = arith.maximumf %12, %13 : vector<256x64xf32>
    %c0_12 = arith.constant 0 : index
    %c0_13 = arith.constant 0 : index
    %15 = vector.load %arg6[%c0_12, %c0_13] : memref<64x128xf32, #tpu.memory_space<vmem>>, vector<64x128xf32>
    %cst_14 = arith.constant dense<0.000000e+00> : vector<256x128xf32>
    %16 = tpu.matmul %14, %15, %cst_14 {dimension_numbers = #tpu.dot_dimension_numbers<[1], [0], [0], [1], [0, 0, 1, 1], [], []>} : vector<256x64xf32>, vector<64x128xf32>, vector<256x128xf32> -> vector<256x128xf32>
    %c0_15 = arith.constant 0 : index
    %c0_16 = arith.constant 0 : index
    %17 = vector.load %arg7[%c0_15, %c0_16] : memref<1x128xf32, #tpu.memory_space<vmem>>, vector<1x128xf32>
    %18 = vector.broadcast %17 : vector<1x128xf32> to vector<256x128xf32>
    %19 = arith.addf %16, %18 : vector<256x128xf32>
    %c0_17 = arith.constant 0 : index
    %c0_18 = arith.constant 0 : index
    %20 = vector.load %arg15[%c0_17, %c0_18] : memref<256x128xf32, #tpu.memory_space<vmem>>, vector<256x128xf32>
    tpu.vector_store %arg15[%c0_17, %c0_18], %19 {strides = array<i32>} : memref<256x128xf32, #tpu.memory_space<vmem>>, vector<256x128xf32>,
    %c0_19 = arith.constant 0 : index
    %c0_20 = arith.constant 0 : index
    %21 = vector.load %arg8[%c0_19, %c0_20] : memref<128x64xf32, #tpu.memory_space<vmem>>, vector<128x64xf32>
    %cst_21 = arith.constant dense<0.000000e+00> : vector<256x64xf32>
    %22 = tpu.matmul %19, %21, %cst_21 {dimension_numbers = #tpu.dot_dimension_numbers<[1], [0], [0], [1], [0, 0, 1, 1], [], []>} : vector<256x128xf32>, vector<128x64xf32>, vector<256x64xf32> -> vector<256x64xf32>
    %c0_22 = arith.constant 0 : index
    %c0_23 = arith.constant 0 : index
    %23 = vector.load %arg9[%c0_22, %c0_23] : memref<1x64xf32, #tpu.memory_space<vmem>>, vector<1x64xf32>
    %24 = vector.broadcast %23 : vector<1x64xf32> to vector<256x64xf32>
    %25 = arith.addf %22, %24 : vector<256x64xf32>
    %cst_24 = arith.constant 0.000000e+00 : f32
    %26 = vector.broadcast %cst_24 : f32 to vector<256x64xf32>
    %27 = arith.maximumf %25, %26 : vector<256x64xf32>
    %c0_25 = arith.constant 0 : index
    %c0_26 = arith.constant 0 : index
    %28 = vector.load %arg10[%c0_25, %c0_26] : memref<64x128xf32, #tpu.memory_space<vmem>>, vector<64x128xf32>
    %cst_27 = arith.constant dense<0.000000e+00> : vector<256x128xf32>
    %29 = tpu.matmul %27, %28, %cst_27 {dimension_numbers = #tpu.dot_dimension_numbers<[1], [0], [0], [1], [0, 0, 1, 1], [], []>} : vector<256x64xf32>, vector<64x128xf32>, vector<256x128xf32> -> vector<256x128xf32>
    %c0_28 = arith.constant 0 : index
    %c0_29 = arith.constant 0 : index
    %30 = vector.load %arg11[%c0_28, %c0_29] : memref<1x128xf32, #tpu.memory_space<vmem>>, vector<1x128xf32>
    %31 = vector.broadcast %30 : vector<1x128xf32> to vector<256x128xf32>
    %32 = arith.addf %29, %31 : vector<256x128xf32>
    %cst_30 = arith.constant 0.000000e+00 : f32
    %33 = vector.broadcast %cst_30 : f32 to vector<256x128xf32>
    %34 = arith.maximumf %32, %33 : vector<256x128xf32>
    %c0_31 = arith.constant 0 : index
    %c0_32 = arith.constant 0 : index
    %35 = vector.load %arg12[%c0_31, %c0_32] : memref<128x784xf32, #tpu.memory_space<vmem>>, vector<128x784xf32>
    %cst_33 = arith.constant dense<0.000000e+00> : vector<256x784xf32>
    %36 = tpu.matmul %34, %35, %cst_33 {dimension_numbers = #tpu.dot_dimension_numbers<[1], [0], [0], [1], [0, 0, 1, 1], [], []>} : vector<256x128xf32>, vector<128x784xf32>, vector<256x784xf32> -> vector<256x784xf32>
    %c0_34 = arith.constant 0 : index
    %c0_35 = arith.constant 0 : index
    %37 = vector.load %arg13[%c0_34, %c0_35] : memref<1x784xf32, #tpu.memory_space<vmem>>, vector<1x784xf32>
    %38 = vector.broadcast %37 : vector<1x784xf32> to vector<256x784xf32>
    %39 = arith.addf %36, %38 : vector<256x784xf32>
    %40 = math.tanh %39 : vector<256x784xf32>
    %c0_36 = arith.constant 0 : index
    %c0_37 = arith.constant 0 : index
    %41 = vector.load %arg14[%c0_36, %c0_37] : memref<256x784xf32, #tpu.memory_space<vmem>>, vector<256x784xf32>
    tpu.vector_store %arg14[%c0_36, %c0_37], %40 {strides = array<i32>} : memref<256x784xf32, #tpu.memory_space<vmem>>, vector<256x784xf32>,
    return
  }
  func.func @transform_0(%arg0: i32) -> (i32, i32) {
    %c0_i32 = arith.constant 0 : i32
    %c0_i32_0 = arith.constant 0 : i32
    return %arg0, %c0_i32 : i32, i32
  }
  func.func @transform_1(%arg0: i32) -> (i32, i32) {
    %c0_i32 = arith.constant 0 : i32
    %c0_i32_0 = arith.constant 0 : i32
    %c0_i32_1 = arith.constant 0 : i32
    return %c0_i32, %c0_i32_0 : i32, i32
  }
  func.func @transform_2(%arg0: i32) -> (i32, i32) {
    %c0_i32 = arith.constant 0 : i32
    %c0_i32_0 = arith.constant 0 : i32
    %c0_i32_1 = arith.constant 0 : i32
    return %c0_i32, %c0_i32_0 : i32, i32
  }
  func.func @transform_3(%arg0: i32) -> (i32, i32) {
    %c0_i32 = arith.constant 0 : i32
    %c0_i32_0 = arith.constant 0 : i32
    %c0_i32_1 = arith.constant 0 : i32
    return %c0_i32, %c0_i32_0 : i32, i32
  }
  func.func @transform_4(%arg0: i32) -> (i32, i32) {
    %c0_i32 = arith.constant 0 : i32
    %c0_i32_0 = arith.constant 0 : i32
    %c0_i32_1 = arith.constant 0 : i32
    return %c0_i32, %c0_i32_0 : i32, i32
  }
  func.func @transform_5(%arg0: i32) -> (i32, i32) {
    %c0_i32 = arith.constant 0 : i32
    %c0_i32_0 = arith.constant 0 : i32
    %c0_i32_1 = arith.constant 0 : i32
    return %c0_i32, %c0_i32_0 : i32, i32
  }
  func.func @transform_6(%arg0: i32) -> (i32, i32) {
    %c0_i32 = arith.constant 0 : i32
    %c0_i32_0 = arith.constant 0 : i32
    %c0_i32_1 = arith.constant 0 : i32
    return %c0_i32, %c0_i32_0 : i32, i32
  }
  func.func @transform_7(%arg0: i32) -> (i32, i32) {
    %c0_i32 = arith.constant 0 : i32
    %c0_i32_0 = arith.constant 0 : i32
    %c0_i32_1 = arith.constant 0 : i32
    return %c0_i32, %c0_i32_0 : i32, i32
  }
  func.func @transform_8(%arg0: i32) -> (i32, i32) {
    %c0_i32 = arith.constant 0 : i32
    %c0_i32_0 = arith.constant 0 : i32
    %c0_i32_1 = arith.constant 0 : i32
    return %c0_i32, %c0_i32_0 : i32, i32
  }
  func.func @transform_9(%arg0: i32) -> (i32, i32) {
    %c0_i32 = arith.constant 0 : i32
    %c0_i32_0 = arith.constant 0 : i32
    %c0_i32_1 = arith.constant 0 : i32
    return %c0_i32, %c0_i32_0 : i32, i32
  }
  func.func @transform_10(%arg0: i32) -> (i32, i32) {
    %c0_i32 = arith.constant 0 : i32
    %c0_i32_0 = arith.constant 0 : i32
    %c0_i32_1 = arith.constant 0 : i32
    return %c0_i32, %c0_i32_0 : i32, i32
  }
  func.func @transform_11(%arg0: i32) -> (i32, i32) {
    %c0_i32 = arith.constant 0 : i32
    %c0_i32_0 = arith.constant 0 : i32
    %c0_i32_1 = arith.constant 0 : i32
    return %c0_i32, %c0_i32_0 : i32, i32
  }
  func.func @transform_12(%arg0: i32) -> (i32, i32) {
    %c0_i32 = arith.constant 0 : i32
    %c0_i32_0 = arith.constant 0 : i32
    %c0_i32_1 = arith.constant 0 : i32
    return %c0_i32, %c0_i32_0 : i32, i32
  }
  func.func @transform_13(%arg0: i32) -> (i32, i32) {
    %c0_i32 = arith.constant 0 : i32
    %c0_i32_0 = arith.constant 0 : i32
    return %arg0, %c0_i32 : i32, i32
  }
  func.func @transform_14(%arg0: i32) -> (i32, i32) {
    %c0_i32 = arith.constant 0 : i32
    %c0_i32_0 = arith.constant 0 : i32
    return %arg0, %c0_i32 : i32, i32
  }
}

</mosaic_0001>

<bundles_post_ra>
// kernel: autoencoder_forward.1
= control target key start
LH: loop header
LB: loop body
LE: loop exit
PB: predicated region body
PF: predicated region fallthrough
CT: control target
= control target key end

     0   :  { %s6715_s29 = smov 0   ;;  %s9049_s0 = inlined_call_operand.vmem [shape: f32[512,784], index: 0, kind: input, shape index: {}]   ;;  %s9050_s1 = inlined_call_operand.vmem [shape: f32[784,128], index: 1, kind: input, shape index: {}]   ;;  %s9051_s2 = inlined_call_operand.vmem [shape: f32[1,128], index: 2, kind: input, shape index: {}]   ;;  %s9052_s3 = inlined_call_operand.vmem [shape: f32[128,64], index: 3, kind: input, shape index: {}]   ;;  %s9053_s4 = inlined_call_operand.vmem [shape: f32[1,64], index: 4, kind: input, shape index: {}]   ;;  %s9054_s5 = inlined_call_operand.vmem [shape: f32[64,128], index: 5, kind: input, shape index: {}]   ;;  %s9055_s6 = inlined_call_operand.vmem [shape: f32[1,128], index: 6, kind: input, shape index: {}]   ;;  %s9056_s7 = inlined_call_operand.vmem [shape: f32[128,64], index: 7, kind: input, shape index: {}]   ;;  %s9057_s8 = inlined_call_operand.vmem [shape: f32[1,64], index: 8, kind: input, shape index: {}]   ;;  %s9058_s9 = inlined_call_operand.vmem [shape: f32[64,128], index: 9, kind: input, shape index: {}]   ;;  %s9059_s10 = inlined_call_operand.vmem [shape: f32[1,128], index: 10, kind: input, shape index: {}]   ;;  %s9060_s11 = inlined_call_operand.vmem [shape: f32[128,784], index: 11, kind: input, shape index: {}]   ;;  %s9061_s12 = inlined_call_operand.vmem [shape: f32[1,784], index: 12, kind: input, shape index: {}]   ;;  %s9062_s13 = inlined_call_operand.vmem [shape: f32[512,784], index: 13, kind: output, shape index: {0}]   ;;  %s9063_s14 = inlined_call_operand.vmem [shape: f32[512,128], index: 14, kind: output, shape index: {1}]  }
   0x1 LB: > { %s4830_s30 = sadd.s32 4294967295, %s6636_s29   ;;  %p4834_p0 = scmp.ge.s32.totalorder %s6636_s29, 1  ;;  %s6636_s29 = sphi %s6715_s29, %s25_s29  }
   0x2   : > { %p417_p1 = scmp.lt.s32.totalorder %s6636_s29, 3 }
   0x4   : > { %p418_p2 = pnand %p4834_p0, %p417_p1 }
   0x5   : > { %v714_v0 = vld [vmem:[%s9050_s1] sm:$0xff] (!%p418_p2)  ;;  %v715_v1 = vld [vmem:[%s9050_s1 + $0x8] sm:$0xff] (!%p418_p2)  ;;  %v716_v2 = vld [vmem:[%s9050_s1 + $0x10] sm:$0xff] (!%p418_p2)  ;;  %s4835_s21 = sshll.u32 (!%p418_p2), %s4830_s30, 5  ;;  %v6638_v3 = vmov (!%p418_p2), 0.0|0.0   ;;  %vm819_vm0 = vcmask (!%p418_p2), 130048  }
   0x6   : > { %421 = sbr.rel (%p418_p2) target bundleno = 1925 (0x785), region = 72  ;;  %5622 = vmatprep.subr.bf16.mxu0 (!%p418_p2), %v6638_v3  ;;  %v5623_v4 = vpack.c.bf16 (!%p418_p2), %v715_v1, %v714_v0  ;;  %v717_v5 = vld [vmem:[%s9050_s1 + $0x18] sm:$0xff] (!%p418_p2)  ;;  %p471_p3 = scmp.lt.s32.totalorder (!%p418_p2), %s4835_s21, 63  ;;  %v718_v7 = vld [vmem:[%s9050_s1 + $0x20] sm:$0xff] (!%p418_p2)  ;;  %v719_v8 = vld [vmem:[%s9050_s1 + $0x28] sm:$0xff] (!%p418_p2)  ;;  %vm2143_vm1 = vcmask (!%p418_p2), 523264  }
   0x7   : > { %v5626_v6 = vpack.c.bf16 (!%p418_p2), %v717_v5, %v716_v2  ;;  %v5629_v9 = vpack.c.bf16 (!%p418_p2), %v719_v8, %v718_v7  ;;  %v720_v10 = vld [vmem:[%s9050_s1 + $0x30] sm:$0xff] (!%p418_p2)  ;;  %v721_v11 = vld [vmem:[%s9050_s1 + $0x38] sm:$0xff] (!%p418_p2)  ;;  %v722_v14 = vld [vmem:[%s9050_s1 + $0x40] sm:$0xff] (!%p418_p2) }
   0x8   : > { %5624 = vmatpush1.bf16.msra.mxu0 (!%p418_p2), %v5623_v4  ;;  %v5632_v13 = vpack.c.bf16 (!%p418_p2), %v721_v11, %v720_v10  ;;  %v723_v15 = vld [vmem:[%s9050_s1 + $0x48] sm:$0xff] (!%p418_p2)  ;;  %v724_v17 = vld [vmem:[%s9050_s1 + $0x50] sm:$0xff] (!%p418_p2)  ;;  %v725_v18 = vld [vmem:[%s9050_s1 + $0x58] sm:$0xff] (!%p418_p2) }
   0x9   : > { %5625 = vmatprep.subr.bf16.mxu0 (!%p418_p2), %v6638_v3  ;;  %v5635_v16 = vpack.c.bf16 (!%p418_p2), %v723_v15, %v722_v14  ;;  %v5638_v19 = vpack.c.bf16 (!%p418_p2), %v725_v18, %v724_v17  ;;  %v726_v20 = vld [vmem:[%s9050_s1 + $0x60] sm:$0xff] (!%p418_p2)  ;;  %v727_v21 = vld [vmem:[%s9050_s1 + $0x68] sm:$0xff] (!%p418_p2)  ;;  %v728_v23 = vld [vmem:[%s9050_s1 + $0x70] sm:$0xff] (!%p418_p2) }
   0xa   : > { %v5641_v22 = vpack.c.bf16 (!%p418_p2), %v727_v21, %v726_v20  ;;  %v729_v24 = vld [vmem:[%s9050_s1 + $0x78] sm:$0xff] (!%p418_p2)  ;;  %v730_v26 = vld [vmem:[%s9050_s1 + $0x80] sm:$0xff] (!%p418_p2)  ;;  %v731_v27 = vld [vmem:[%s9050_s1 + $0x88] sm:$0xff] (!%p418_p2) }
   0xb   : > { %v5644_v25 = vpack.c.bf16 (!%p418_p2), %v729_v24, %v728_v23  ;;  %v5647_v28 = vpack.c.bf16 (!%p418_p2), %v731_v27, %v730_v26  ;;  %v732_v29 = vld [vmem:[%s9050_s1 + $0x90] sm:$0xff] (!%p418_p2)  ;;  %v733_v30 = vld [vmem:[%s9050_s1 + $0x98] sm:$0xff] (!%p418_p2)  ;;  %v734_v32 = vld [vmem:[%s9050_s1 + $0xa0] sm:$0xff] (!%p418_p2) }
   0xc   : > { %5627 = vmatpush1.bf16.msra.mxu0 (!%p418_p2), %v5626_v6  ;;  %v5650_v31 = vpack.c.bf16 (!%p418_p2), %v733_v30, %v732_v29  ;;  %v735_v33 = vld [vmem:[%s9050_s1 + $0xa8] sm:$0xff] (!%p418_p2)  ;;  %v736_v35 = vld [vmem:[%s9050_s1 + $0xb0] sm:$0xff] (!%p418_p2)  ;;  %v737_v36 = vld [vmem:[%s9050_s1 + $0xb8] sm:$0xff] (!%p418_p2) }
   0xd   : > { %s9065_s21 = smov (!%p471_p3, %s4835_s21), 63  ;;  %5628 = vmatprep.subr.bf16.mxu0 %v6638_v3  ;;  %v5653_v34 = vpack.c.bf16 %v735_v33, %v734_v32  ;;  %v5656_v37 = vpack.c.bf16 %v737_v36, %v736_v35  ;;  %v738_v38 = vld [vmem:[%s9050_s1 + $0xc0] sm:$0xff]  ;;  %v739_v39 = vld [vmem:[%s9050_s1 + $0xc8] sm:$0xff]  ;;  %v740_v41 = vld [vmem:[%s9050_s1 + $0xd0] sm:$0xff] }
   0xe   : > { %s6170_s28 = smul.u32 56, %s9065_s21  ;;  %v5659_v40 = vpack.c.bf16 %v739_v39, %v738_v38  ;;  %v741_v42 = vld [vmem:[%s9050_s1 + $0xd8] sm:$0xff]  ;;  %v742_v44 = vld [vmem:[%s9050_s1 + $0xe0] sm:$0xff]  ;;  %v743_v45 = vld [vmem:[%s9050_s1 + $0xe8] sm:$0xff] }
   0xf   : > { %v5662_v43 = vpack.c.bf16 %v741_v42, %v740_v41  ;;  %v5665_v46 = vpack.c.bf16 %v743_v45, %v742_v44  ;;  %v744_v47 = vld [vmem:[%s9050_s1 + $0xf0] sm:$0xff]  ;;  %v745_v48 = vld [vmem:[%s9050_s1 + $0xf8] sm:$0xff]  ;;  %v746_v50 = vld [vmem:[%s9050_s1 + $0x100] sm:$0xff] }
  0x10   : > { %s6751_s16 = scalar_lea.vmem %s9049_s0, %s6170_s28  ;;  %5630 = vmatpush1.bf16.msra.mxu0 %v5629_v9  ;;  %v5668_v49 = vpack.c.bf16 %v745_v48, %v744_v47  ;;  %v747_v51 = vld [vmem:[%s9050_s1 + $0x108] sm:$0xff]  ;;  %v748_v55 = vld [vmem:[%s9050_s1 + $0x110] sm:$0xff]  ;;  %v749_v56 = vld [vmem:[%s9050_s1 + $0x118] sm:$0xff]  ;;  %s8535_s24 = scalar_lea.vmem %s9062_s13, %s6170_s28 }
  0x11   : > { %v491_v12 = vld [vmem:[%s6751_s16 + $0x8] sm:$0xff]  ;;  %5631 = vmatprep.subr.bf16.mxu0 %v6638_v3  ;;  %v490_v52 = vld [vmem:[%s6751_s16] sm:$0xff]  ;;  %v5671_v53 = vpack.c.bf16 %v747_v51, %v746_v50  ;;  %v497_v57 = vld [vmem:[%s6751_s16 + $0x38] sm:$0xff]  ;;  %v5674_v58 = vpack.c.bf16 %v749_v56, %v748_v55 }
  0x12   : > { %980 = vmatprep.mubr.f32.mxu0 %v491_v12  ;;  %v498_v54 = vld [vmem:[%s6751_s16 + $0x40] sm:$0xff]  ;;  %v505_v59 = vld [vmem:[%s6751_s16 + $0x78] sm:$0xff]  ;;  %v751_v61 = vld [vmem:[%s9050_s1 + $0x128] sm:$0xff] }
  0x13   : > { %v750_v60 = vld [vmem:[%s9050_s1 + $0x120] sm:$0xff]  ;;  %v504_v62 = vld [vmem:[%s6751_s16 + $0x70] sm:$0xff]  ;;  %v753_v2 = vld [vmem:[%s9050_s1 + $0x138] sm:$0xff] }
  0x14   : > { %5633 = vmatpush1.bf16.msra.mxu0 %v5632_v13  ;;  %v5677_v63 = vpack.c.bf16 %v751_v61, %v750_v60  ;;  %v512_v0 = vld [vmem:[%s6751_s16 + $0xb0] sm:$0xff]  ;;  %v511_v4 = vld [vmem:[%s6751_s16 + $0xa8] sm:$0xff]  ;;  %v754_v7 = vld [vmem:[%s9050_s1 + $0x140] sm:$0xff] }
  0x15   : > { %5634 = vmatprep.subr.bf16.mxu0 %v6638_v3  ;;  %v752_v1 = vld [vmem:[%s9050_s1 + $0x130] sm:$0xff]  ;;  %v519_v6 = vld [vmem:[%s6751_s16 + $0xe8] sm:$0xff]  ;;  %v518_v9 = vld [vmem:[%s6751_s16 + $0xe0] sm:$0xff] }
  0x16   : > { %v5680_v5 = vpack.c.bf16 %v753_v2, %v752_v1  ;;  %v755_v8 = vld [vmem:[%s9050_s1 + $0x148] sm:$0xff]  ;;  %v526_v11 = vld [vmem:[%s6751_s16 + $0x120] sm:$0xff]  ;;  %v756_v12 = vld [vmem:[%s9050_s1 + $0x150] sm:$0xff] }
  0x17   : > { %v5683_v10 = vpack.c.bf16 %v755_v8, %v754_v7  ;;  %v757_v13 = vld [vmem:[%s9050_s1 + $0x158] sm:$0xff]  ;;  %v758_v17 = vld [vmem:[%s9050_s1 + $0x160] sm:$0xff]  ;;  %v759_v18 = vld [vmem:[%s9050_s1 + $0x168] sm:$0xff] }
  0x18   : > { %5636 = vmatpush1.bf16.msra.mxu0 %v5635_v16  ;;  %v525_v14 = vld [vmem:[%s6751_s16 + $0x118] sm:$0xff]  ;;  %v5686_v15 = vpack.c.bf16 %v757_v13, %v756_v12  ;;  %v5689_v20 = vpack.c.bf16 %v759_v18, %v758_v17  ;;  %v540_v21 = vld [vmem:[%s6751_s16 + $0x190] sm:$0xff]  ;;  %v539_v24 = vld [vmem:[%s6751_s16 + $0x188] sm:$0xff] }
  0x19   : > { %5637 = vmatprep.subr.bf16.mxu0 %v6638_v3  ;;  %v533_v16 = vld [vmem:[%s6751_s16 + $0x158] sm:$0xff]  ;;  %v547_v26 = vld [vmem:[%s6751_s16 + $0x1c8] sm:$0xff]  ;;  %v762_v27 = vld [vmem:[%s9050_s1 + $0x180] sm:$0xff] }
  0x1a   : > { %v761_v23 = vld [vmem:[%s9050_s1 + $0x178] sm:$0xff]  ;;  %v546_v29 = vld [vmem:[%s6751_s16 + $0x1c0] sm:$0xff]  ;;  %v764_v32 = vld [vmem:[%s9050_s1 + $0x190] sm:$0xff] }
  0x1b   : > { %v765_v33 = vld [vmem:[%s9050_s1 + $0x198] sm:$0xff]  ;;  %v767_v38 = vld [vmem:[%s9050_s1 + $0x1a8] sm:$0xff]  ;;  %v560_v39 = vld [vmem:[%s6751_s16 + $0x230] sm:$0xff] }
  0x1c   : > { %5639 = vmatpush1.bf16.msra.mxu0 %v5638_v19  ;;  %v532_v19 = vld [vmem:[%s6751_s16 + $0x150] sm:$0xff]  ;;  %v5698_v35 = vpack.c.bf16 %v765_v33, %v764_v32  ;;  %v561_v36 = vld [vmem:[%s6751_s16 + $0x238] sm:$0xff]  ;;  %v567_v44 = vld [vmem:[%s6751_s16 + $0x268] sm:$0xff] }
  0x1d   : > { %5640 = vmatprep.subr.bf16.mxu0 %v6638_v3  ;;  %v568_v41 = vld [vmem:[%s6751_s16 + $0x270] sm:$0xff]  ;;  %v770_v47 = vld [vmem:[%s9050_s1 + $0x1c0] sm:$0xff]  ;;  %v771_v48 = vld [vmem:[%s9050_s1 + $0x1c8] sm:$0xff] }
  0x1e   : > { %v768_v42 = vld [vmem:[%s9050_s1 + $0x1b0] sm:$0xff]  ;;  %v5707_v50 = vpack.c.bf16 %v771_v48, %v770_v47  ;;  %v582_v51 = vld [vmem:[%s6751_s16 + $0x2e0] sm:$0xff]  ;;  %v589_v56 = vld [vmem:[%s6751_s16 + $0x318] sm:$0xff] }
  0x1f   : > { %v596_v61 = vld [vmem:[%s6751_s16 + $0x350] sm:$0xff]  ;;  %v603_v2 = vld [vmem:[%s6751_s16 + $0x388] sm:$0xff]  ;;  %v617_v7 = vld [vmem:[%s6751_s16 + $0x3f8] sm:$0xff] }
  0x20   : > { %5642 = vmatpush1.bf16.msra.mxu0 %v5641_v22  ;;  %v760_v22 = vld [vmem:[%s9050_s1 + $0x170] sm:$0xff]  ;;  %v630_v12 = vld [vmem:[%s6751_s16 + $0x460] sm:$0xff]  ;;  %v651_v18 = vld [vmem:[%s6751_s16 + $0x508] sm:$0xff] }
  0x21   : > { %5643 = vmatprep.subr.bf16.mxu0 %v6638_v3  ;;  %v616_v8 = vld [vmem:[%s6751_s16 + $0x3f0] sm:$0xff]  ;;  %v638_v13 = vld [vmem:[%s6751_s16 + $0x4a0] sm:$0xff]  ;;  %v503_v47 = vld [vmem:[%s6751_s16 + $0x68] sm:$0xff] }
  0x22   : > { %v652_v17 = vld [vmem:[%s6751_s16 + $0x510] sm:$0xff]  ;;  %v499_v48 = vld [vmem:[%s6751_s16 + $0x48] sm:$0xff] }
  0x23   : > { %v700_v32 = vld [vmem:[%s6751_s16 + $0x690] sm:$0xff] }
  0x24   : > { %5645 = vmatpush1.bf16.msra.mxu0 %v5644_v25  ;;  %v5692_v25 = vpack.c.bf16 %v761_v23, %v760_v22  ;;  %v665_v22 = vld [vmem:[%s6751_s16 + $0x578] sm:$0xff]  ;;  %v708_v33 = vld [vmem:[%s6751_s16 + $0x6d0] sm:$0xff] }
  0x25   : > { %5646 = vmatprep.subr.bf16.mxu0 %v6638_v3  ;;  %v673_v23 = vld [vmem:[%s6751_s16 + $0x5b8] sm:$0xff] }
  0x28   : > { %5648 = vmatpush1.bf16.msra.mxu0 %v5647_v28  ;;  %v763_v28 = vld [vmem:[%s9050_s1 + $0x188] sm:$0xff] }
  0x29   : > { %5649 = vmatprep.subr.bf16.mxu0 %v6638_v3  ;;  %v5695_v30 = vpack.c.bf16 %v763_v28, %v762_v27  ;;  %v687_v27 = vld [vmem:[%s6751_s16 + $0x628] sm:$0xff]  ;;  %v686_v28 = vld [vmem:[%s6751_s16 + $0x620] sm:$0xff] }
  0x2c   : > { %5651 = vmatpush1.bf16.msra.mxu0 %v5650_v31  ;;  %v554_v31 = vld [vmem:[%s6751_s16 + $0x200] sm:$0xff] }
  0x2d   : > { %5652 = vmatprep.subr.bf16.mxu0 %v6638_v3 }
  0x30   : > { %5654 = vmatpush1.bf16.msra.mxu0 %v5653_v34  ;;  %v553_v34 = vld [vmem:[%s6751_s16 + $0x1f8] sm:$0xff] }
  0x31   : > { %5655 = vmatprep.subr.bf16.mxu0 %v6638_v3 }
  0x34   : > { %5657 = vmatpush1.bf16.msra.mxu0 %v5656_v37  ;;  %v766_v37 = vld [vmem:[%s9050_s1 + $0x1a0] sm:$0xff] }
  0x35   : > { %5658 = vmatprep.subr.bf16.mxu0 %v6638_v3 }
  0x38   : > { %5660 = vmatpush1.bf16.msra.mxu0 %v5659_v40  ;;  %v5701_v40 = vpack.c.bf16 %v767_v38, %v766_v37  ;;  %v779_v37 = vld [vmem:[%s9050_s1 + $0x208] sm:$0xff]  ;;  %v810_v38 = vld [vmem:[%s9050_s1 + $0x300] sm:$0xff] }
  0x39   : > { %5661 = vmatprep.subr.bf16.mxu0 %v6638_v3 }
  0x3c   : > { %5663 = vmatpush1.bf16.msra.mxu0 %v5662_v43  ;;  %v769_v43 = vld [vmem:[%s9050_s1 + $0x1b8] sm:$0xff] }
  0x3d   : > { %5664 = vmatprep.subr.bf16.mxu0 %v6638_v3  ;;  %v5704_v45 = vpack.c.bf16 %v769_v43, %v768_v42  ;;  %v500_v43 = vld [vmem:[%s6751_s16 + $0x50] sm:$0xff] }
  0x40   : > { %5666 = vmatpush1.bf16.msra.mxu0 %v5665_v46  ;;  %v575_v46 = vld [vmem:[%s6751_s16 + $0x2a8] sm:$0xff] }
  0x41   : > { %5667 = vmatprep.subr.bf16.mxu0 %v6638_v3 }
  0x44   : > { %5669 = vmatpush1.bf16.msra.mxu0 %v5668_v49  ;;  %v574_v49 = vld [vmem:[%s6751_s16 + $0x2a0] sm:$0xff] }
  0x45   : > { %5670 = vmatprep.subr.bf16.mxu0 %v6638_v3 }
  0x47   : > { %981 = vmatmul.mubr.f32.vlgmr.msra.gmra.mrb[0].mxu0 %v490_v52  ;;  %v772_v52 = vld [vmem:[%s9050_s1 + $0x1d0] sm:$0xff] }
  0x48   : > { %5672 = vmatpush1.bf16.msra.mxu0 %v5671_v53  ;;  %985 = vmatprep.mubr.f32.mxu0 %v498_v54  ;;  %v773_v53 = vld [vmem:[%s9050_s1 + $0x1d8] sm:$0xff] }
  0x49   : > { %5673 = vmatprep.subr.bf16.mxu0 %v6638_v3  ;;  %v581_v54 = vld [vmem:[%s6751_s16 + $0x2d8] sm:$0xff]  ;;  %v5710_v55 = vpack.c.bf16 %v773_v53, %v772_v52  ;;  %v783_v52 = vld [vmem:[%s9050_s1 + $0x228] sm:$0xff]  ;;  %v506_v53 = vld [vmem:[%s6751_s16 + $0x80] sm:$0xff] }
  0x4b   : > { %986 = vmatmul.mubr.f32.gmra.mrb[2].mxu0 %v497_v57  ;;  %v774_v57 = vld [vmem:[%s9050_s1 + $0x1e0] sm:$0xff] }
  0x4c   : > { %990 = vmatprep.mubr.f32.mxu0 %v505_v59  ;;  %5675 = vmatpush1.bf16.msra.mxu0 %v5674_v58  ;;  %v775_v58 = vld [vmem:[%s9050_s1 + $0x1e8] sm:$0xff]  ;;  %v588_v59 = vld [vmem:[%s6751_s16 + $0x310] sm:$0xff] }
  0x4d   : > { %5676 = vmatprep.subr.bf16.mxu0 %v6638_v3  ;;  %v5713_v60 = vpack.c.bf16 %v775_v58, %v774_v57  ;;  %v785_v57 = vld [vmem:[%s9050_s1 + $0x238] sm:$0xff]  ;;  %v510_v58 = vld [vmem:[%s6751_s16 + $0xa0] sm:$0xff] }
  0x4f   : > { %991 = vmatmul.mubr.f32.gmra.mrb[4].mxu0 %v504_v62  ;;  %v776_v62 = vld [vmem:[%s9050_s1 + $0x1f0] sm:$0xff] }
  0x50   : > { %995 = vmatprep.mubr.f32.mxu0 %v512_v0  ;;  %5678 = vmatpush1.bf16.msra.mxu0 %v5677_v63  ;;  %v777_v63 = vld [vmem:[%s9050_s1 + $0x1f8] sm:$0xff]  ;;  %v595_v0 = vld [vmem:[%s6751_s16 + $0x348] sm:$0xff] }
  0x51   : > { %5679 = vmatprep.subr.bf16.mxu0 %v6638_v3  ;;  %v5716_v1 = vpack.c.bf16 %v777_v63, %v776_v62  ;;  %v521_v62 = vld [vmem:[%s6751_s16 + $0xf8] sm:$0xff]  ;;  %v786_v63 = vld [vmem:[%s9050_s1 + $0x240] sm:$0xff] }
  0x53   : > { %996 = vmatmul.mubr.f32.gmra.mrb[6].mxu0 %v511_v4  ;;  %v602_v4 = vld [vmem:[%s6751_s16 + $0x380] sm:$0xff] }
  0x54   : > { %1000 = vmatprep.mubr.f32.mxu0 %v519_v6  ;;  %5681 = vmatpush1.bf16.msra.mxu0 %v5680_v5  ;;  %v610_v5 = vld [vmem:[%s6751_s16 + $0x3c0] sm:$0xff]  ;;  %v609_v6 = vld [vmem:[%s6751_s16 + $0x3b8] sm:$0xff] }
  0x55   : > { %5682 = vmatprep.subr.bf16.mxu0 %v6638_v3 }
  0x57   : > { %1001 = vmatmul.mubr.f32.gmra.mrb[8].mxu0 %v518_v9  ;;  %v624_v9 = vld [vmem:[%s6751_s16 + $0x430] sm:$0xff] }
  0x58   : > { %1005 = vmatprep.mubr.f32.mxu0 %v526_v11  ;;  %5684 = vmatpush1.bf16.msra.mxu0 %v5683_v10  ;;  %v623_v10 = vld [vmem:[%s6751_s16 + $0x428] sm:$0xff] }
  0x59   : > { %5685 = vmatprep.subr.bf16.mxu0 %v6638_v3  ;;  %v631_v11 = vld [vmem:[%s6751_s16 + $0x468] sm:$0xff] }
  0x5b   : > { %1006 = vmatmul.mubr.f32.gmra.mrb[10].mxu0 %v525_v14  ;;  %v637_v14 = vld [vmem:[%s6751_s16 + $0x498] sm:$0xff] }
  0x5c   : > { %1010 = vmatprep.mubr.f32.mxu0 %v533_v16  ;;  %5687 = vmatpush1.bf16.msra.mxu0 %v5686_v15  ;;  %v645_v15 = vld [vmem:[%s6751_s16 + $0x4d8] sm:$0xff]  ;;  %v644_v16 = vld [vmem:[%s6751_s16 + $0x4d0] sm:$0xff] }
  0x5d   : > { %5688 = vmatprep.subr.bf16.mxu0 %v6638_v3 }
  0x5f   : > { %1011 = vmatmul.mubr.f32.gmra.mrb[12].mxu0 %v532_v19  ;;  %v659_v19 = vld [vmem:[%s6751_s16 + $0x548] sm:$0xff] }
  0x60   : > { %1015 = vmatprep.mubr.f32.mxu0 %v540_v21  ;;  %5690 = vmatpush1.bf16.msra.mxu0 %v5689_v20  ;;  %v658_v20 = vld [vmem:[%s6751_s16 + $0x540] sm:$0xff] }
  0x61   : > { %5691 = vmatprep.subr.bf16.mxu0 %v6638_v3  ;;  %v666_v21 = vld [vmem:[%s6751_s16 + $0x580] sm:$0xff] }
  0x63   : > { %1016 = vmatmul.mubr.f32.gmra.mrb[14].mxu0 %v539_v24  ;;  %v672_v24 = vld [vmem:[%s6751_s16 + $0x5b0] sm:$0xff] }
  0x64   : > { %1020 = vmatprep.mubr.f32.mxu0 %v547_v26  ;;  %5693 = vmatpush1.bf16.msra.mxu0 %v5692_v25  ;;  %v680_v25 = vld [vmem:[%s6751_s16 + $0x5f0] sm:$0xff]  ;;  %v679_v26 = vld [vmem:[%s6751_s16 + $0x5e8] sm:$0xff] }
  0x65   : > { %5694 = vmatprep.subr.bf16.mxu0 %v6638_v3 }
  0x67   : > { %1021 = vmatmul.mubr.f32.gmra.mrb[16].mxu0 %v546_v29  ;;  %v694_v29 = vld [vmem:[%s6751_s16 + $0x660] sm:$0xff] }
  0x68   : > { %1025 = vmatprep.mubr.f32.mxu0 %v554_v31  ;;  %5696 = vmatpush1.bf16.msra.mxu0 %v5695_v30  ;;  %v693_v30 = vld [vmem:[%s6751_s16 + $0x658] sm:$0xff] }
  0x69   : > { %5697 = vmatprep.subr.bf16.mxu0 %v6638_v3  ;;  %v701_v31 = vld [vmem:[%s6751_s16 + $0x698] sm:$0xff] }
  0x6b   : > { %1026 = vmatmul.mubr.f32.gmra.mrb[18].mxu0 %v553_v34  ;;  %v707_v34 = vld [vmem:[%s6751_s16 + $0x6c8] sm:$0xff] }
  0x6c   : > { %1030 = vmatprep.mubr.f32.mxu0 %v561_v36  ;;  %5699 = vmatpush1.bf16.msra.mxu0 %v5698_v35  ;;  %v493_v35 = vld [vmem:[%s6751_s16 + $0x18] sm:$0xff]  ;;  %v778_v36 = vld [vmem:[%s9050_s1 + $0x200] sm:$0xff] }
  0x6d   : > { %5700 = vmatprep.subr.bf16.mxu0 %v6638_v3  ;;  %v5719_v42 = vpack.c.bf16 %v779_v37, %v778_v36  ;;  %v798_v36 = vld [vmem:[%s9050_s1 + $0x2a0] sm:$0xff]  ;;  %v799_v37 = vld [vmem:[%s9050_s1 + $0x2a8] sm:$0xff] }
  0x6f   : > { %1031 = vmatmul.mubr.f32.gmra.mrb[20].mxu0 %v560_v39  ;;  %v811_v39 = vld [vmem:[%s9050_s1 + $0x308] sm:$0xff] }
  0x70   : > { %1035 = vmatprep.mubr.f32.mxu0 %v568_v41  ;;  %5702 = vmatpush1.bf16.msra.mxu0 %v5701_v40  ;;  %v5766_v40 = vpack.c.bf16 %v811_v39, %v810_v38  ;;  %v492_v41 = vld [vmem:[%s6751_s16 + $0x10] sm:$0xff]  ;;  %v562_v38 = vld [vmem:[%s6751_s16 + $0x240] sm:$0xff]  ;;  %v5749_v39 = vpack.c.bf16 %v799_v37, %v798_v36  ;;  %v667_v36 = vld [vmem:[%s6751_s16 + $0x588] sm:$0xff] }
  0x71   : > { %5703 = vmatprep.subr.bf16.mxu0 %v6638_v3  ;;  %v675_v37 = vld [vmem:[%s6751_s16 + $0x5c8] sm:$0xff] }
  0x72   : > { %5767 = vmatprep.subr.bf16.mxu1 %v5766_v40 }
  0x73   : > { %1036 = vmatmul.mubr.f32.gmra.mrb[22].mxu0 %v567_v44  ;;  %v780_v44 = vld [vmem:[%s9050_s1 + $0x210] sm:$0xff]  ;;  %5769 = vmatpush3.bf16.msra.mxu1 %v5766_v40  ;;  %v570_v40 = vld [vmem:[%s6751_s16 + $0x280] sm:$0xff] }
  0x74   : > { %1040 = vmatprep.mubr.f32.mxu0 %v575_v46  ;;  %5705 = vmatpush1.bf16.msra.mxu0 %v5704_v45  ;;  %v781_v45 = vld [vmem:[%s9050_s1 + $0x218] sm:$0xff]  ;;  %v496_v46 = vld [vmem:[%s6751_s16 + $0x30] sm:$0xff] }
  0x75   : > { %5706 = vmatprep.subr.bf16.mxu0 %v6638_v3  ;;  %5206 = vmatprep.mubr.msk.f32.mxu1 %vm819_vm0, %v496_v46 }
  0x76   : > { %5207 = vmatmul.mubr.msk.f32.vlgmr.msra.gmra.mrb[0].mxu1 %vm819_vm0, %v503_v47  ;;  %v577_v47 = vld [vmem:[%s6751_s16 + $0x2b8] sm:$0xff] }
  0x77   : > { %1041 = vmatmul.mubr.f32.gmra.mrb[24].mxu0 %v574_v49  ;;  %v5722_v49 = vpack.c.bf16 %v781_v45, %v780_v44  ;;  %5209 = vmatprep.mubr.msk.f32.mxu1 %vm819_vm0, %v510_v58  ;;  %v573_v44 = vld [vmem:[%s6751_s16 + $0x298] sm:$0xff] }
  0x78   : > { %1045 = vmatprep.mubr.f32.mxu0 %v582_v51  ;;  %5708 = vmatpush1.bf16.msra.mxu0 %v5707_v50  ;;  %v507_v50 = vld [vmem:[%s6751_s16 + $0x88] sm:$0xff]  ;;  %v782_v51 = vld [vmem:[%s9050_s1 + $0x220] sm:$0xff]  ;;  %v569_v45 = vld [vmem:[%s6751_s16 + $0x278] sm:$0xff] }
  0x79   : > { %5709 = vmatprep.subr.bf16.mxu0 %v6638_v3 }
  0x7b   : > { %1046 = vmatmul.mubr.f32.gmra.mrb[26].mxu0 %v581_v54  ;;  %v5725_v54 = vpack.c.bf16 %v783_v52, %v782_v51  ;;  %v584_v52 = vld [vmem:[%s6751_s16 + $0x2f0] sm:$0xff] }
  0x7c   : > { %1050 = vmatprep.mubr.f32.mxu0 %v589_v56  ;;  %5711 = vmatpush1.bf16.msra.mxu0 %v5710_v55  ;;  %v514_v55 = vld [vmem:[%s6751_s16 + $0xc0] sm:$0xff]  ;;  %v784_v56 = vld [vmem:[%s9050_s1 + $0x230] sm:$0xff] }
  0x7d   : > { %5712 = vmatprep.subr.bf16.mxu0 %v6638_v3 }
  0x7f   : > { %1051 = vmatmul.mubr.f32.gmra.mrb[28].mxu0 %v588_v59  ;;  %v517_v59 = vld [vmem:[%s6751_s16 + $0xd8] sm:$0xff] }
  0x80   : > { %1055 = vmatprep.mubr.f32.mxu0 %v596_v61  ;;  %5714 = vmatpush1.bf16.msra.mxu0 %v5713_v60  ;;  %v513_v60 = vld [vmem:[%s6751_s16 + $0xb8] sm:$0xff]  ;;  %v5728_v61 = vpack.c.bf16 %v785_v57, %v784_v56  ;;  %v587_v56 = vld [vmem:[%s6751_s16 + $0x308] sm:$0xff] }
  0x81   : > { %5715 = vmatprep.subr.bf16.mxu0 %v6638_v3  ;;  %5210 = vmatmul.mubr.msk.f32.gmra.mrb[2].mxu1 %vm819_vm0, %v517_v59  ;;  %v583_v57 = vld [vmem:[%s6751_s16 + $0x2e8] sm:$0xff] }
  0x82   : > { %v591_v59 = vld [vmem:[%s6751_s16 + $0x328] sm:$0xff] }
  0x83   : > { %1056 = vmatmul.mubr.f32.gmra.mrb[30].mxu0 %v595_v0  ;;  %v787_v0 = vld [vmem:[%s9050_s1 + $0x248] sm:$0xff] }
  0x84   : > { %1060 = vmatprep.mubr.f32.mxu0 %v603_v2  ;;  %5717 = vmatpush1.bf16.msra.mxu0 %v5716_v1  ;;  %v520_v1 = vld [vmem:[%s6751_s16 + $0xf0] sm:$0xff]  ;;  %v5731_v2 = vpack.c.bf16 %v787_v0, %v786_v63  ;;  %v598_v0 = vld [vmem:[%s6751_s16 + $0x360] sm:$0xff] }
  0x85   : > { %5718 = vmatprep.subr.bf16.mxu0 %v6638_v3 }
  0x87   : > { %1061 = vmatmul.mubr.f32.gmra.mrb[32].mxu0 %v602_v4  ;;  %v528_v4 = vld [vmem:[%s6751_s16 + $0x130] sm:$0xff] }
  0x88   : > { %1065 = vmatprep.mubr.f32.mxu0 %v610_v5  ;;  %v788_v5 = vld [vmem:[%s9050_s1 + $0x250] sm:$0xff] }
  0x8b   : > { %1066 = vmatmul.mubr.f32.gmra.mrb[34].mxu0 %v609_v6  ;;  %v789_v6 = vld [vmem:[%s9050_s1 + $0x258] sm:$0xff] }
  0x8c   : > { %1070 = vmatprep.mubr.f32.mxu0 %v617_v7  ;;  %v524_v7 = vld [vmem:[%s6751_s16 + $0x110] sm:$0xff] }
  0x8d   : > { %5212 = vmatprep.mubr.msk.f32.mxu1 %vm819_vm0, %v524_v7 }
  0x8f   : > { %1071 = vmatmul.mubr.f32.gmra.mrb[36].mxu0 %v616_v8  ;;  %v531_v8 = vld [vmem:[%s6751_s16 + $0x148] sm:$0xff] }
  0x90   : > { %1075 = vmatprep.mubr.f32.mxu0 %v624_v9  ;;  %v527_v9 = vld [vmem:[%s6751_s16 + $0x128] sm:$0xff]  ;;  %5213 = vmatmul.mubr.msk.f32.gmra.mrb[4].mxu1 %vm819_vm0, %v531_v8  ;;  %v605_v8 = vld [vmem:[%s6751_s16 + $0x398] sm:$0xff] }
  0x93   : > { %1076 = vmatmul.mubr.f32.gmra.mrb[38].mxu0 %v623_v10  ;;  %v5734_v10 = vpack.c.bf16 %v789_v6, %v788_v5  ;;  %v601_v5 = vld [vmem:[%s6751_s16 + $0x378] sm:$0xff] }
  0x94   : > { %1080 = vmatprep.mubr.f32.mxu0 %v631_v11  ;;  %v535_v11 = vld [vmem:[%s6751_s16 + $0x168] sm:$0xff]  ;;  %v597_v6 = vld [vmem:[%s6751_s16 + $0x358] sm:$0xff] }
  0x97   : > { %1081 = vmatmul.mubr.f32.gmra.mrb[40].mxu0 %v630_v12  ;;  %v790_v12 = vld [vmem:[%s9050_s1 + $0x260] sm:$0xff] }
  0x98   : > { %1085 = vmatprep.mubr.f32.mxu0 %v638_v13  ;;  %v791_v13 = vld [vmem:[%s9050_s1 + $0x268] sm:$0xff] }
  0x9b   : > { %1086 = vmatmul.mubr.f32.gmra.mrb[42].mxu0 %v637_v14  ;;  %v534_v14 = vld [vmem:[%s6751_s16 + $0x160] sm:$0xff] }
  0x9c   : > { %1090 = vmatprep.mubr.f32.mxu0 %v645_v15  ;;  %v5737_v15 = vpack.c.bf16 %v791_v13, %v790_v12  ;;  %v615_v12 = vld [vmem:[%s6751_s16 + $0x3e8] sm:$0xff] }
  0x9d   : > { %v619_v13 = vld [vmem:[%s6751_s16 + $0x408] sm:$0xff] }
  0x9f   : > { %1091 = vmatmul.mubr.f32.gmra.mrb[44].mxu0 %v644_v16  ;;  %v542_v16 = vld [vmem:[%s6751_s16 + $0x1a0] sm:$0xff] }
  0xa0   : > { %1095 = vmatprep.mubr.f32.mxu0 %v652_v17  ;;  %v792_v17 = vld [vmem:[%s9050_s1 + $0x270] sm:$0xff] }
  0xa3   : > { %1096 = vmatmul.mubr.f32.gmra.mrb[46].mxu0 %v651_v18  ;;  %v793_v18 = vld [vmem:[%s9050_s1 + $0x278] sm:$0xff] }
  0xa4   : > { %1100 = vmatprep.mubr.f32.mxu0 %v659_v19  ;;  %v538_v19 = vld [vmem:[%s6751_s16 + $0x180] sm:$0xff] }
  0xa5   : > { %5215 = vmatprep.mubr.msk.f32.mxu1 %vm819_vm0, %v538_v19  ;;  %v633_v19 = vld [vmem:[%s6751_s16 + $0x478] sm:$0xff] }
  0xa7   : > { %1101 = vmatmul.mubr.f32.gmra.mrb[48].mxu0 %v658_v20  ;;  %v545_v20 = vld [vmem:[%s6751_s16 + $0x1b8] sm:$0xff] }
  0xa8   : > { %1105 = vmatprep.mubr.f32.mxu0 %v666_v21  ;;  %v541_v21 = vld [vmem:[%s6751_s16 + $0x198] sm:$0xff]  ;;  %5216 = vmatmul.mubr.msk.f32.gmra.mrb[6].mxu1 %vm819_vm0, %v545_v20  ;;  %v632_v20 = vld [vmem:[%s6751_s16 + $0x470] sm:$0xff] }
  0xab   : > { %1106 = vmatmul.mubr.f32.gmra.mrb[50].mxu0 %v665_v22  ;;  %v5740_v22 = vpack.c.bf16 %v793_v18, %v792_v17  ;;  %v629_v17 = vld [vmem:[%s6751_s16 + $0x458] sm:$0xff] }
  0xac   : > { %1110 = vmatprep.mubr.f32.mxu0 %v673_v23  ;;  %v549_v23 = vld [vmem:[%s6751_s16 + $0x1d8] sm:$0xff] }
  0xad   : > { %v625_v18 = vld [vmem:[%s6751_s16 + $0x438] sm:$0xff] }
  0xaf   : > { %1111 = vmatmul.mubr.f32.gmra.mrb[52].mxu0 %v672_v24  ;;  %v794_v24 = vld [vmem:[%s9050_s1 + $0x280] sm:$0xff] }
  0xb0   : > { %1115 = vmatprep.mubr.f32.mxu0 %v680_v25  ;;  %v795_v25 = vld [vmem:[%s9050_s1 + $0x288] sm:$0xff] }
  0xb3   : > { %1116 = vmatmul.mubr.f32.gmra.mrb[54].mxu0 %v679_v26  ;;  %v548_v26 = vld [vmem:[%s6751_s16 + $0x1d0] sm:$0xff] }
  0xb4   : > { %1120 = vmatprep.mubr.f32.mxu0 %v687_v27  ;;  %v5743_v27 = vpack.c.bf16 %v795_v25, %v794_v24  ;;  %v639_v24 = vld [vmem:[%s6751_s16 + $0x4a8] sm:$0xff] }
  0xb5   : > { %v647_v25 = vld [vmem:[%s6751_s16 + $0x4e8] sm:$0xff] }
  0xb7   : > { %1121 = vmatmul.mubr.f32.gmra.mrb[56].mxu0 %v686_v28  ;;  %v556_v28 = vld [vmem:[%s6751_s16 + $0x210] sm:$0xff] }
  0xb8   : > { %1125 = vmatprep.mubr.f32.mxu0 %v694_v29  ;;  %v796_v29 = vld [vmem:[%s9050_s1 + $0x290] sm:$0xff] }
  0xbb   : > { %1126 = vmatmul.mubr.f32.gmra.mrb[58].mxu0 %v693_v30  ;;  %v797_v30 = vld [vmem:[%s9050_s1 + $0x298] sm:$0xff] }
  0xbc   : > { %1130 = vmatprep.mubr.f32.mxu0 %v701_v31  ;;  %v552_v31 = vld [vmem:[%s6751_s16 + $0x1f0] sm:$0xff] }
  0xbd   : > { %5218 = vmatprep.mubr.msk.f32.mxu1 %vm819_vm0, %v552_v31  ;;  %v661_v31 = vld [vmem:[%s6751_s16 + $0x558] sm:$0xff] }
  0xbf   : > { %1131 = vmatmul.mubr.f32.gmra.mrb[60].mxu0 %v700_v32  ;;  %v559_v32 = vld [vmem:[%s6751_s16 + $0x228] sm:$0xff] }
  0xc0   : > { %1135 = vmatprep.mubr.f32.mxu0 %v708_v33  ;;  %v555_v33 = vld [vmem:[%s6751_s16 + $0x208] sm:$0xff]  ;;  %5219 = vmatmul.mubr.msk.f32.gmra.mrb[8].mxu1 %vm819_vm0, %v559_v32  ;;  %v660_v32 = vld [vmem:[%s6751_s16 + $0x550] sm:$0xff] }
  0xc3   : > { %1136 = vmatmul.mubr.f32.gmra.mrb[62].mxu0 %v707_v34  ;;  %v5746_v34 = vpack.c.bf16 %v797_v30, %v796_v29  ;;  %v657_v29 = vld [vmem:[%s6751_s16 + $0x538] sm:$0xff] }
  0xc4   : > { %1205 = vmatprep.mubr.f32.mxu0 %v493_v35  ;;  %v563_v35 = vld [vmem:[%s6751_s16 + $0x248] sm:$0xff]  ;;  %v653_v30 = vld [vmem:[%s6751_s16 + $0x518] sm:$0xff] }
  0xc7   : > { %1206 = vmatmul.mubr.f32.vlgmr.msra.gmra.mrb[0].mxu0 %v492_v41  ;;  %v800_v41 = vld [vmem:[%s9050_s1 + $0x2b0] sm:$0xff] }
  0xc8   : > { %5720 = vmatpush1.bf16.msra.mxu0 %v5719_v42  ;;  %1210 = vmatprep.mubr.f32.mxu0 %v500_v43  ;;  %v801_v42 = vld [vmem:[%s9050_s1 + $0x2b8] sm:$0xff]  ;;  %v566_v43 = vld [vmem:[%s6751_s16 + $0x260] sm:$0xff] }
  0xc9   : > { %5721 = vmatprep.subr.bf16.mxu0 %v6638_v3  ;;  %5221 = vmatprep.mubr.msk.f32.mxu1 %vm819_vm0, %v566_v43  ;;  %v5752_v46 = vpack.c.bf16 %v801_v42, %v800_v41  ;;  %v685_v41 = vld [vmem:[%s6751_s16 + $0x618] sm:$0xff] }
  0xca   : > { %5222 = vmatmul.mubr.msk.f32.gmra.mrb[10].mxu1 %vm819_vm0, %v573_v44  ;;  %v681_v42 = vld [vmem:[%s6751_s16 + $0x5f8] sm:$0xff]  ;;  %v688_v44 = vld [vmem:[%s6751_s16 + $0x630] sm:$0xff] }
  0xcb   : > { %1211 = vmatmul.mubr.f32.gmra.mrb[2].mxu0 %v499_v48  ;;  %v802_v48 = vld [vmem:[%s9050_s1 + $0x2c0] sm:$0xff]  ;;  %v689_v43 = vld [vmem:[%s6751_s16 + $0x638] sm:$0xff] }
  0xcc   : > { %1215 = vmatprep.mubr.f32.mxu0 %v507_v50  ;;  %5723 = vmatpush1.bf16.msra.mxu0 %v5722_v49  ;;  %v803_v49 = vld [vmem:[%s9050_s1 + $0x2c8] sm:$0xff]  ;;  %v576_v50 = vld [vmem:[%s6751_s16 + $0x2b0] sm:$0xff] }
  0xcd   : > { %5724 = vmatprep.subr.bf16.mxu0 %v6638_v3  ;;  %v5755_v51 = vpack.c.bf16 %v803_v49, %v802_v48  ;;  %v695_v48 = vld [vmem:[%s6751_s16 + $0x668] sm:$0xff] }
  0xce   : > { %v703_v49 = vld [vmem:[%s6751_s16 + $0x6a8] sm:$0xff] }
  0xcf   : > { %1216 = vmatmul.mubr.f32.gmra.mrb[4].mxu0 %v506_v53  ;;  %v804_v53 = vld [vmem:[%s9050_s1 + $0x2d0] sm:$0xff] }
  0xd0   : > { %1220 = vmatprep.mubr.f32.mxu0 %v514_v55  ;;  %5726 = vmatpush1.bf16.msra.mxu0 %v5725_v54  ;;  %v805_v54 = vld [vmem:[%s9050_s1 + $0x2d8] sm:$0xff]  ;;  %v580_v55 = vld [vmem:[%s6751_s16 + $0x2d0] sm:$0xff] }
  0xd1   : > { %5727 = vmatprep.subr.bf16.mxu0 %v6638_v3  ;;  %5224 = vmatprep.mubr.msk.f32.mxu1 %vm819_vm0, %v580_v55  ;;  %v5758_v58 = vpack.c.bf16 %v805_v54, %v804_v53  ;;  %v713_v53 = vld [vmem:[%s6751_s16 + $0x6f8] sm:$0xff]  ;;  %v495_v55 = vld [vmem:[%s6751_s16 + $0x28] sm:$0xff] }
  0xd2   : > { %5225 = vmatmul.mubr.msk.f32.gmra.mrb[12].mxu1 %vm819_vm0, %v587_v56  ;;  %v709_v54 = vld [vmem:[%s6751_s16 + $0x6d8] sm:$0xff]  ;;  %v1848_v56 = vld [vmem:[%s9052_s3] sm:$0xff] }
  0xd3   : > { %1221 = vmatmul.mubr.f32.gmra.mrb[6].mxu0 %v513_v60  ;;  %v806_v60 = vld [vmem:[%s9050_s1 + $0x2e0] sm:$0xff] }
  0xd4   : > { %1225 = vmatprep.mubr.f32.mxu0 %v521_v62  ;;  %5729 = vmatpush1.bf16.msra.mxu0 %v5728_v61  ;;  %v807_v61 = vld [vmem:[%s9050_s1 + $0x2e8] sm:$0xff]  ;;  %v590_v62 = vld [vmem:[%s6751_s16 + $0x320] sm:$0xff] }
  0xd5   : > { %5730 = vmatprep.subr.bf16.mxu0 %v6638_v3  ;;  %v5761_v63 = vpack.c.bf16 %v807_v61, %v806_v60  ;;  %v1851_v61 = vld [vmem:[%s9052_s3 + $0x18] sm:$0xff] }
  0xd7   : > { %1226 = vmatmul.mubr.f32.gmra.mrb[8].mxu0 %v520_v1  ;;  %v808_v1 = vld [vmem:[%s9050_s1 + $0x2f0] sm:$0xff] }
  0xd8   : > { %1230 = vmatprep.mubr.f32.mxu0 %v528_v4  ;;  %5732 = vmatpush1.bf16.msra.mxu0 %v5731_v2  ;;  %v809_v2 = vld [vmem:[%s9050_s1 + $0x2f8] sm:$0xff]  ;;  %v594_v4 = vld [vmem:[%s6751_s16 + $0x340] sm:$0xff] }
  0xd9   : > { %5733 = vmatprep.subr.bf16.mxu0 %v6638_v3  ;;  %5227 = vmatprep.mubr.msk.f32.mxu1 %vm819_vm0, %v594_v4  ;;  %v5764_v7 = vpack.c.bf16 %v809_v2, %v808_v1  ;;  %v1853_v1 = vld [vmem:[%s9052_s3 + $0x28] sm:$0xff]  ;;  %v501_v2 = vld [vmem:[%s6751_s16 + $0x58] sm:$0xff] }
  0xda   : > { %5228 = vmatmul.mubr.msk.f32.gmra.mrb[14].mxu1 %vm819_vm0, %v601_v5  ;;  %v509_v5 = vld [vmem:[%s6751_s16 + $0x98] sm:$0xff] }
  0xdb   : > { %1231 = vmatmul.mubr.f32.gmra.mrb[10].mxu0 %v527_v9  ;;  %v604_v9 = vld [vmem:[%s6751_s16 + $0x390] sm:$0xff] }
  0xdc   : > { %1235 = vmatprep.mubr.f32.mxu0 %v535_v11  ;;  %5735 = vmatpush1.bf16.msra.mxu0 %v5734_v10  ;;  %v612_v10 = vld [vmem:[%s6751_s16 + $0x3d0] sm:$0xff] }
  0xdd   : > { %5736 = vmatprep.subr.bf16.mxu0 %v6638_v3  ;;  %v608_v11 = vld [vmem:[%s6751_s16 + $0x3b0] sm:$0xff] }
  0xde   : > { %5230 = vmatprep.mubr.msk.f32.mxu1 %vm819_vm0, %v608_v11  ;;  %v1856_v11 = vld [vmem:[%s9052_s3 + $0x40] sm:$0xff] }
  0xdf   : > { %1236 = vmatmul.mubr.f32.gmra.mrb[12].mxu0 %v534_v14  ;;  %5231 = vmatmul.mubr.msk.f32.gmra.mrb[16].mxu1 %vm819_vm0, %v615_v12  ;;  %v618_v14 = vld [vmem:[%s6751_s16 + $0x400] sm:$0xff]  ;;  %v1857_v12 = vld [vmem:[%s9052_s3 + $0x48] sm:$0xff] }
  0xe0   : > { %1240 = vmatprep.mubr.f32.mxu0 %v542_v16  ;;  %5738 = vmatpush1.bf16.msra.mxu0 %v5737_v15  ;;  %v626_v15 = vld [vmem:[%s6751_s16 + $0x440] sm:$0xff] }
  0xe1   : > { %5739 = vmatprep.subr.bf16.mxu0 %v6638_v3  ;;  %v622_v16 = vld [vmem:[%s6751_s16 + $0x420] sm:$0xff] }
  0xe2   : > { %5233 = vmatprep.mubr.msk.f32.mxu1 %vm819_vm0, %v622_v16  ;;  %v1859_v16 = vld [vmem:[%s9052_s3 + $0x58] sm:$0xff] }
  0xe3   : > { %1241 = vmatmul.mubr.f32.gmra.mrb[14].mxu0 %v541_v21  ;;  %5234 = vmatmul.mubr.msk.f32.gmra.mrb[18].mxu1 %vm819_vm0, %v629_v17  ;;  %v640_v21 = vld [vmem:[%s6751_s16 + $0x4b0] sm:$0xff]  ;;  %v522_v17 = vld [vmem:[%s6751_s16 + $0x100] sm:$0xff] }
  0xe4   : > { %1245 = vmatprep.mubr.f32.mxu0 %v549_v23  ;;  %5741 = vmatpush1.bf16.msra.mxu0 %v5740_v22  ;;  %v636_v22 = vld [vmem:[%s6751_s16 + $0x490] sm:$0xff]  ;;  %v643_v23 = vld [vmem:[%s6751_s16 + $0x4c8] sm:$0xff] }
  0xe5   : > { %5742 = vmatprep.subr.bf16.mxu0 %v6638_v3  ;;  %5236 = vmatprep.mubr.msk.f32.mxu1 %vm819_vm0, %v636_v22  ;;  %v529_v22 = vld [vmem:[%s6751_s16 + $0x138] sm:$0xff] }
  0xe7   : > { %1246 = vmatmul.mubr.f32.gmra.mrb[16].mxu0 %v548_v26  ;;  %5237 = vmatmul.mubr.msk.f32.gmra.mrb[20].mxu1 %vm819_vm0, %v643_v23  ;;  %v646_v26 = vld [vmem:[%s6751_s16 + $0x4e0] sm:$0xff] }
  0xe8   : > { %1250 = vmatprep.mubr.f32.mxu0 %v556_v28  ;;  %5744 = vmatpush1.bf16.msra.mxu0 %v5743_v27  ;;  %v654_v27 = vld [vmem:[%s6751_s16 + $0x520] sm:$0xff] }
  0xe9   : > { %5745 = vmatprep.subr.bf16.mxu0 %v6638_v3  ;;  %v650_v28 = vld [vmem:[%s6751_s16 + $0x500] sm:$0xff] }
  0xea   : > { %5239 = vmatprep.mubr.msk.f32.mxu1 %vm819_vm0, %v650_v28  ;;  %v551_v28 = vld [vmem:[%s6751_s16 + $0x1e8] sm:$0xff] }
  0xeb   : > { %1251 = vmatmul.mubr.f32.gmra.mrb[18].mxu0 %v555_v33  ;;  %5240 = vmatmul.mubr.msk.f32.gmra.mrb[22].mxu1 %vm819_vm0, %v657_v29  ;;  %v668_v33 = vld [vmem:[%s6751_s16 + $0x590] sm:$0xff]  ;;  %v550_v29 = vld [vmem:[%s6751_s16 + $0x1e0] sm:$0xff] }
  0xec   : > { %1255 = vmatprep.mubr.f32.mxu0 %v563_v35  ;;  %5747 = vmatpush1.bf16.msra.mxu0 %v5746_v34  ;;  %v664_v34 = vld [vmem:[%s6751_s16 + $0x570] sm:$0xff]  ;;  %v671_v35 = vld [vmem:[%s6751_s16 + $0x5a8] sm:$0xff] }
  0xed   : > { %5748 = vmatprep.subr.bf16.mxu0 %v6638_v3  ;;  %5242 = vmatprep.mubr.msk.f32.mxu1 %vm819_vm0, %v664_v34  ;;  %v572_v34 = vld [vmem:[%s6751_s16 + $0x290] sm:$0xff] }
  0xef   : > { %1256 = vmatmul.mubr.f32.gmra.mrb[20].mxu0 %v562_v38  ;;  %5243 = vmatmul.mubr.msk.f32.gmra.mrb[24].mxu1 %vm819_vm0, %v671_v35  ;;  %v674_v38 = vld [vmem:[%s6751_s16 + $0x5c0] sm:$0xff]  ;;  %v571_v35 = vld [vmem:[%s6751_s16 + $0x288] sm:$0xff] }
  0xf0   : > { %1260 = vmatprep.mubr.f32.mxu0 %v570_v40  ;;  %5750 = vmatpush1.bf16.msra.mxu0 %v5749_v39  ;;  %v682_v39 = vld [vmem:[%s6751_s16 + $0x600] sm:$0xff] }
  0xf1   : > { %5751 = vmatprep.subr.bf16.mxu0 %v6638_v3  ;;  %v678_v40 = vld [vmem:[%s6751_s16 + $0x5e0] sm:$0xff] }
  0xf2   : > { %5245 = vmatprep.mubr.msk.f32.mxu1 %vm819_vm0, %v678_v40  ;;  %v593_v40 = vld [vmem:[%s6751_s16 + $0x338] sm:$0xff] }
  0xf3   : > { %1261 = vmatmul.mubr.f32.gmra.mrb[22].mxu0 %v569_v45  ;;  %5246 = vmatmul.mubr.msk.f32.gmra.mrb[26].mxu1 %vm819_vm0, %v685_v41  ;;  %v696_v45 = vld [vmem:[%s6751_s16 + $0x670] sm:$0xff] }
  0xf4   : > { %1265 = vmatprep.mubr.f32.mxu0 %v577_v47  ;;  %5753 = vmatpush1.bf16.msra.mxu0 %v5752_v46  ;;  %v692_v46 = vld [vmem:[%s6751_s16 + $0x650] sm:$0xff]  ;;  %v699_v47 = vld [vmem:[%s6751_s16 + $0x688] sm:$0xff] }
  0xf5   : > { %5754 = vmatprep.subr.bf16.mxu0 %v6638_v3  ;;  %5248 = vmatprep.mubr.msk.f32.mxu1 %vm819_vm0, %v692_v46  ;;  %v592_v41 = vld [vmem:[%s6751_s16 + $0x330] sm:$0xff]  ;;  %v614_v46 = vld [vmem:[%s6751_s16 + $0x3e0] sm:$0xff] }
  0xf7   : > { %1266 = vmatmul.mubr.f32.gmra.mrb[24].mxu0 %v576_v50  ;;  %5249 = vmatmul.mubr.msk.f32.gmra.mrb[28].mxu1 %vm819_vm0, %v699_v47  ;;  %v702_v50 = vld [vmem:[%s6751_s16 + $0x6a0] sm:$0xff]  ;;  %v613_v47 = vld [vmem:[%s6751_s16 + $0x3d8] sm:$0xff] }
  0xf8   : > { %1270 = vmatprep.mubr.f32.mxu0 %v584_v52  ;;  %5756 = vmatpush1.bf16.msra.mxu0 %v5755_v51  ;;  %v710_v51 = vld [vmem:[%s6751_s16 + $0x6e0] sm:$0xff] }
  0xf9   : > { %5757 = vmatprep.subr.bf16.mxu0 %v6638_v3  ;;  %v706_v52 = vld [vmem:[%s6751_s16 + $0x6c0] sm:$0xff] }
  0xfa   : > { %5251 = vmatprep.mubr.msk.f32.mxu1 %vm819_vm0, %v706_v52  ;;  %v635_v52 = vld [vmem:[%s6751_s16 + $0x488] sm:$0xff] }
  0xfb   : > { %1271 = vmatmul.mubr.f32.gmra.mrb[26].mxu0 %v583_v57  ;;  %5252 = vmatmul.mubr.msk.f32.gmra.mrb[30].mxu1 %vm819_vm0, %v713_v53  ;;  %v1849_v57 = vld [vmem:[%s9052_s3 + $0x8] sm:$0xff]  ;;  %v634_v53 = vld [vmem:[%s6751_s16 + $0x480] sm:$0xff] }
  0xfc   : > { %1275 = vmatprep.mubr.f32.mxu0 %v591_v59  ;;  %5759 = vmatpush1.bf16.msra.mxu0 %v5758_v58  ;;  %v1850_v58 = vld [vmem:[%s9052_s3 + $0x10] sm:$0xff]  ;;  %v494_v59 = vld [vmem:[%s6751_s16 + $0x20] sm:$0xff]  ;;  %v5770_v60 = vpack.c.bf16 %v1849_v57, %v1848_v56  ;;  %v649_v56 = vld [vmem:[%s6751_s16 + $0x4f8] sm:$0xff] }
  0xfd   : > { %5760 = vmatprep.subr.bf16.mxu0 %v6638_v3  ;;  %v648_v57 = vld [vmem:[%s6751_s16 + $0x4f0] sm:$0xff] }
  0xfe   : > { %5771 = vmatprep.subr.bf16.mxu1 %v5770_v60 }
  0xff   : > { %1276 = vmatmul.mubr.f32.gmra.mrb[28].mxu0 %v590_v62  ;;  %v502_v62 = vld [vmem:[%s6751_s16 + $0x60] sm:$0xff]  ;;  %5773 = vmatpush3.bf16.msra.mxu1 %v5770_v60 }
 0x100   : > { %1280 = vmatprep.mubr.f32.mxu0 %v598_v0  ;;  %5762 = vmatpush1.bf16.msra.mxu0 %v5761_v63  ;;  %v5774_v63 = vpack.c.bf16 %v1851_v61, %v1850_v58  ;;  %v1852_v0 = vld [vmem:[%s9052_s3 + $0x20] sm:$0xff]  ;;  %v1862_v61 = vld [vmem:[%s9052_s3 + $0x70] sm:$0xff] }
 0x101   : > { %5763 = vmatprep.subr.bf16.mxu0 %v6638_v3  ;;  %v611_v3 = vld [vmem:[%s6751_s16 + $0x3c8] sm:$0xff]  ;;  %v5778_v4 = vpack.c.bf16 %v1853_v1, %v1852_v0 }
 0x102   : > { %5775 = vmatprep.subr.bf16.mxu1 %v5774_v63  ;;  %v655_v0 = vld [vmem:[%s6751_s16 + $0x528] sm:$0xff] }
 0x103   : > { %1281 = vmatmul.mubr.f32.gmra.mrb[30].mxu0 %v597_v6  ;;  %v1854_v6 = vld [vmem:[%s9052_s3 + $0x30] sm:$0xff]  ;;  %5777 = vmatpush3.bf16.msra.mxu1 %v5774_v63  ;;  %v663_v1 = vld [vmem:[%s6751_s16 + $0x568] sm:$0xff] }
 0x104   : > { %1285 = vmatprep.mubr.f32.mxu0 %v605_v8  ;;  %5765 = vmatpush1.bf16.msra.mxu0 %v5764_v7  ;;  %v1855_v7 = vld [vmem:[%s9052_s3 + $0x38] sm:$0xff]  ;;  %v508_v8 = vld [vmem:[%s6751_s16 + $0x90] sm:$0xff] }
 0x105   : > { %5779 = vmatprep.subr.bf16.mxu1 %v5778_v4 }
 0x107   : > { %1286 = vmatmul.mubr.f32.gmra.mrb[32].mxu0 %v604_v9  ;;  %v5782_v9 = vpack.c.bf16 %v1855_v7, %v1854_v6  ;;  %5781 = vmatpush3.bf16.msra.mxu1 %v5778_v4  ;;  %v669_v7 = vld [vmem:[%s6751_s16 + $0x598] sm:$0xff] }
 0x108   : > { %1290 = vmatprep.mubr.f32.mxu0 %v612_v10  ;;  %v516_v10 = vld [vmem:[%s6751_s16 + $0xd0] sm:$0xff] }
 0x109   : > { %5783 = vmatprep.subr.bf16.mxu1 %v5782_v9 }
 0x10b   : > { %1291 = vmatmul.mubr.f32.gmra.mrb[34].mxu0 %v611_v3  ;;  %v515_v3 = vld [vmem:[%s6751_s16 + $0xc8] sm:$0xff]  ;;  %5785 = vmatpush3.bf16.msra.mxu1 %v5782_v9  ;;  %v676_v9 = vld [vmem:[%s6751_s16 + $0x5d0] sm:$0xff] }
 0x10c   : > { %1295 = vmatprep.mubr.f32.mxu0 %v619_v13  ;;  %v5786_v13 = vpack.c.bf16 %v1857_v12, %v1856_v11  ;;  %v684_v11 = vld [vmem:[%s6751_s16 + $0x610] sm:$0xff] }
 0x10e   : > { %5787 = vmatprep.subr.bf16.mxu1 %v5786_v13 }
 0x10f   : > { %1296 = vmatmul.mubr.f32.gmra.mrb[36].mxu0 %v618_v14  ;;  %v523_v14 = vld [vmem:[%s6751_s16 + $0x108] sm:$0xff]  ;;  %5789 = vmatpush3.bf16.msra.mxu1 %v5786_v13 }
 0x110   : > { %1300 = vmatprep.mubr.f32.mxu0 %v626_v15  ;;  %v1858_v15 = vld [vmem:[%s9052_s3 + $0x50] sm:$0xff]  ;;  %v691_v13 = vld [vmem:[%s6751_s16 + $0x648] sm:$0xff] }
 0x113   : > { %1301 = vmatmul.mubr.f32.gmra.mrb[38].mxu0 %v625_v18  ;;  %v5790_v18 = vpack.c.bf16 %v1859_v16, %v1858_v15  ;;  %v698_v16 = vld [vmem:[%s6751_s16 + $0x680] sm:$0xff] }
 0x114   : > { %1305 = vmatprep.mubr.f32.mxu0 %v633_v19  ;;  %v530_v19 = vld [vmem:[%s6751_s16 + $0x140] sm:$0xff] }
 0x115   : > { %5791 = vmatprep.subr.bf16.mxu1 %v5790_v18 }
 0x116   : > { %5793 = vmatpush3.bf16.msra.mxu1 %v5790_v18  ;;  %v697_v18 = vld [vmem:[%s6751_s16 + $0x678] sm:$0xff] }
 0x117   : > { %1306 = vmatmul.mubr.f32.gmra.mrb[40].mxu0 %v632_v20  ;;  %v1860_v20 = vld [vmem:[%s9052_s3 + $0x60] sm:$0xff] }
 0x118   : > { %1310 = vmatprep.mubr.f32.mxu0 %v640_v21  ;;  %v1861_v21 = vld [vmem:[%s9052_s3 + $0x68] sm:$0xff] }
 0x119   : > { %v5794_v23 = vpack.c.bf16 %v1861_v21, %v1860_v20  ;;  %v704_v20 = vld [vmem:[%s6751_s16 + $0x6b0] sm:$0xff] }
 0x11b   : > { %1311 = vmatmul.mubr.f32.gmra.mrb[42].mxu0 %v639_v24  ;;  %v537_v24 = vld [vmem:[%s6751_s16 + $0x178] sm:$0xff]  ;;  %5795 = vmatprep.subr.bf16.mxu1 %v5794_v23 }
 0x11c   : > { %1315 = vmatprep.mubr.f32.mxu0 %v647_v25  ;;  %v536_v25 = vld [vmem:[%s6751_s16 + $0x170] sm:$0xff]  ;;  %5797 = vmatpush3.bf16.msra.mxu1 %v5794_v23 }
 0x11f   : > { %1316 = vmatmul.mubr.f32.gmra.mrb[44].mxu0 %v646_v26  ;;  %v544_v26 = vld [vmem:[%s6751_s16 + $0x1b0] sm:$0xff] }
 0x120   : > { %1320 = vmatprep.mubr.f32.mxu0 %v654_v27  ;;  %v543_v27 = vld [vmem:[%s6751_s16 + $0x1a8] sm:$0xff] }
 0x123   : > { %1321 = vmatmul.mubr.f32.gmra.mrb[46].mxu0 %v653_v30  ;;  %v558_v30 = vld [vmem:[%s6751_s16 + $0x220] sm:$0xff] }
 0x124   : > { %1325 = vmatprep.mubr.f32.mxu0 %v661_v31  ;;  %v557_v31 = vld [vmem:[%s6751_s16 + $0x218] sm:$0xff] }
 0x127   : > { %1326 = vmatmul.mubr.f32.gmra.mrb[48].mxu0 %v660_v32  ;;  %v565_v32 = vld [vmem:[%s6751_s16 + $0x258] sm:$0xff] }
 0x128   : > { %1330 = vmatprep.mubr.f32.mxu0 %v668_v33  ;;  %v564_v33 = vld [vmem:[%s6751_s16 + $0x250] sm:$0xff] }
 0x12b   : > { %1331 = vmatmul.mubr.f32.gmra.mrb[50].mxu0 %v667_v36  ;;  %v579_v36 = vld [vmem:[%s6751_s16 + $0x2c8] sm:$0xff] }
 0x12c   : > { %1335 = vmatprep.mubr.f32.mxu0 %v675_v37  ;;  %v578_v37 = vld [vmem:[%s6751_s16 + $0x2c0] sm:$0xff] }
 0x12f   : > { %1336 = vmatmul.mubr.f32.gmra.mrb[52].mxu0 %v674_v38  ;;  %v586_v38 = vld [vmem:[%s6751_s16 + $0x300] sm:$0xff] }
 0x130   : > { %1340 = vmatprep.mubr.f32.mxu0 %v682_v39  ;;  %v585_v39 = vld [vmem:[%s6751_s16 + $0x2f8] sm:$0xff] }
 0x133   : > { %1341 = vmatmul.mubr.f32.gmra.mrb[54].mxu0 %v681_v42  ;;  %v600_v42 = vld [vmem:[%s6751_s16 + $0x370] sm:$0xff] }
 0x134   : > { %1345 = vmatprep.mubr.f32.mxu0 %v689_v43  ;;  %v599_v43 = vld [vmem:[%s6751_s16 + $0x368] sm:$0xff] }
 0x137   : > { %1346 = vmatmul.mubr.f32.gmra.mrb[56].mxu0 %v688_v44  ;;  %v607_v44 = vld [vmem:[%s6751_s16 + $0x3a8] sm:$0xff] }
 0x138   : > { %1350 = vmatprep.mubr.f32.mxu0 %v696_v45  ;;  %v606_v45 = vld [vmem:[%s6751_s16 + $0x3a0] sm:$0xff] }
 0x13b   : > { %1351 = vmatmul.mubr.f32.gmra.mrb[58].mxu0 %v695_v48  ;;  %v621_v48 = vld [vmem:[%s6751_s16 + $0x418] sm:$0xff] }
 0x13c   : > { %1355 = vmatprep.mubr.f32.mxu0 %v703_v49  ;;  %v620_v49 = vld [vmem:[%s6751_s16 + $0x410] sm:$0xff] }
 0x13f   : > { %1356 = vmatmul.mubr.f32.gmra.mrb[60].mxu0 %v702_v50  ;;  %v628_v50 = vld [vmem:[%s6751_s16 + $0x450] sm:$0xff] }
 0x140   : > { %1360 = vmatprep.mubr.f32.mxu0 %v710_v51  ;;  %v627_v51 = vld [vmem:[%s6751_s16 + $0x448] sm:$0xff] }
 0x143   : > { %1361 = vmatmul.mubr.f32.gmra.mrb[62].mxu0 %v709_v54  ;;  %v642_v54 = vld [vmem:[%s6751_s16 + $0x4c0] sm:$0xff] }
 0x144   : > { %1430 = vmatprep.mubr.f32.mxu0 %v495_v55  ;;  %v641_v55 = vld [vmem:[%s6751_s16 + $0x4b8] sm:$0xff] }
 0x147   : > { %1431 = vmatmul.mubr.f32.vlgmr.msra.gmra.mrb[0].mxu0 %v494_v59  ;;  %v656_v59 = vld [vmem:[%s6751_s16 + $0x530] sm:$0xff] }
 0x148   : > { %1435 = vmatprep.mubr.f32.mxu0 %v502_v62  ;;  %v1863_v62 = vld [vmem:[%s9052_s3 + $0x78] sm:$0xff] }
 0x149   : > { %v7355_v58 = vpop.f32.mrb[0].mxu1  ;;  %v5798_v63 = vpack.c.bf16 %v1863_v62, %v1862_v61  ;;  %v2130_v61 = vld [vmem:[%s9054_s5 + $0x10] sm:$0xff] }
 0x14a   : > { %v7358_v60 = vpop.f32.mrb[1].mxu1 }
 0x14b   : > { %1436 = vmatmul.mubr.f32.gmra.mrb[2].mxu0 %v501_v2  ;;  %5799 = vmatprep.subr.bf16.mxu1 %v5798_v63  ;;  %v662_v2 = vld [vmem:[%s6751_s16 + $0x560] sm:$0xff] }
 0x14c   : > { %1440 = vmatprep.mubr.f32.mxu0 %v509_v5  ;;  %5801 = vmatpush3.bf16.msra.mxu1 %v5798_v63  ;;  %v670_v5 = vld [vmem:[%s6751_s16 + $0x5a0] sm:$0xff] }
 0x14f   : > { %1441 = vmatmul.mubr.f32.gmra.mrb[4].mxu0 %v508_v8  ;;  %v677_v8 = vld [vmem:[%s6751_s16 + $0x5d8] sm:$0xff] }
 0x150   : > { %1445 = vmatprep.mubr.f32.mxu0 %v516_v10 }
 0x153   : > { %1446 = vmatmul.mubr.f32.gmra.mrb[6].mxu0 %v515_v3  ;;  %v683_v3 = vld [vmem:[%s6751_s16 + $0x608] sm:$0xff] }
 0x154   : > { %1450 = vmatprep.mubr.f32.mxu0 %v523_v14  ;;  %v7369_v4 = vpop.f32.mrb[2].mxu1  ;;  %v690_v14 = vld [vmem:[%s6751_s16 + $0x640] sm:$0xff] }
 0x155   : > { %v7372_v6 = vpop.f32.mrb[3].mxu1 }
 0x157   : > { %1451 = vmatmul.mubr.f32.gmra.mrb[8].mxu0 %v522_v17 }
 0x158   : > { %1455 = vmatprep.mubr.f32.mxu0 %v530_v19  ;;  %v705_v19 = vld [vmem:[%s6751_s16 + $0x6b8] sm:$0xff] }
 0x15b   : > { %1456 = vmatmul.mubr.f32.gmra.mrb[10].mxu0 %v529_v22  ;;  %v712_v22 = vld [vmem:[%s6751_s16 + $0x6f0] sm:$0xff] }
 0x15c   : > { %1460 = vmatprep.mubr.f32.mxu0 %v537_v24  ;;  %v711_v24 = vld [vmem:[%s6751_s16 + $0x6e8] sm:$0xff]  ;;  %s4840_s16 = sshll.u32 %s9065_s21, 3 }
 0x15d   : > { %s7668_s26 = scalar_lea.vmem %s9063_s14, %s4840_s16 }
 0x15f   : > { %1461 = vmatmul.mubr.f32.gmra.mrb[12].mxu0 %v536_v25 }
 0x160   : > { %1465 = vmatprep.mubr.f32.mxu0 %v544_v26 }
 0x163   : > { %1466 = vmatmul.mubr.f32.gmra.mrb[14].mxu0 %v543_v27  ;;  %v7377_v10 = vpop.f32.mrb[4].mxu1 }
 0x164   : > { %1470 = vmatprep.mubr.f32.mxu0 %v551_v28  ;;  %v7380_v12 = vpop.f32.mrb[5].mxu1 }
 0x167   : > { %1471 = vmatmul.mubr.f32.gmra.mrb[16].mxu0 %v550_v29 }
 0x168   : > { %1475 = vmatprep.mubr.f32.mxu0 %v558_v30 }
 0x16b   : > { %1476 = vmatmul.mubr.f32.gmra.mrb[18].mxu0 %v557_v31 }
 0x16c   : > { %1480 = vmatprep.mubr.f32.mxu0 %v565_v32 }
 0x16f   : > { %1481 = vmatmul.mubr.f32.gmra.mrb[20].mxu0 %v564_v33 }
 0x170   : > { %1485 = vmatprep.mubr.f32.mxu0 %v572_v34 }
 0x173   : > { %1486 = vmatmul.mubr.f32.gmra.mrb[22].mxu0 %v571_v35 }
 0x174   : > { %1490 = vmatprep.mubr.f32.mxu0 %v579_v36 }
 0x177   : > { %1491 = vmatmul.mubr.f32.gmra.mrb[24].mxu0 %v578_v37 }
 0x178   : > { %1495 = vmatprep.mubr.f32.mxu0 %v586_v38 }
 0x17b   : > { %1496 = vmatmul.mubr.f32.gmra.mrb[26].mxu0 %v585_v39  ;;  %v7385_v15 = vpop.f32.mrb[6].mxu1 }
 0x17c   : > { %1500 = vmatprep.mubr.f32.mxu0 %v593_v40  ;;  %v7388_v17 = vpop.f32.mrb[7].mxu1 }
 0x17f   : > { %1501 = vmatmul.mubr.f32.gmra.mrb[28].mxu0 %v592_v41 }
 0x180   : > { %1505 = vmatprep.mubr.f32.mxu0 %v600_v42 }
 0x183   : > { %1506 = vmatmul.mubr.f32.gmra.mrb[30].mxu0 %v599_v43 }
 0x184   : > { %1510 = vmatprep.mubr.f32.mxu0 %v607_v44 }
 0x187   : > { %1511 = vmatmul.mubr.f32.gmra.mrb[32].mxu0 %v606_v45 }
 0x188   : > { %1515 = vmatprep.mubr.f32.mxu0 %v614_v46 }
 0x18b   : > { %1516 = vmatmul.mubr.f32.gmra.mrb[34].mxu0 %v613_v47  ;;  %v7446_v47 = vld [vmem:[%s9051_s2] ss:$0 sm:$0xff] }
 0x18c   : > { %1520 = vmatprep.mubr.f32.mxu0 %v621_v48 }
 0x18f   : > { %1521 = vmatmul.mubr.f32.gmra.mrb[36].mxu0 %v620_v49 }
 0x190   : > { %1525 = vmatprep.mubr.f32.mxu0 %v628_v50 }
 0x193   : > { %1526 = vmatmul.mubr.f32.gmra.mrb[38].mxu0 %v627_v51  ;;  %v7393_v21 = vpop.f32.mrb[8].mxu1 }
 0x194   : > { %1530 = vmatprep.mubr.f32.mxu0 %v635_v52  ;;  %v7396_v23 = vpop.f32.mrb[9].mxu1  ;;  %v2128_v52 = vld [vmem:[%s9054_s5] sm:$0xff] }
 0x197   : > { %1531 = vmatmul.mubr.f32.gmra.mrb[40].mxu0 %v634_v53  ;;  %v2129_v53 = vld [vmem:[%s9054_s5 + $0x8] sm:$0xff] }
 0x198   : > { %1535 = vmatprep.mubr.f32.mxu0 %v642_v54 }
 0x19b   : > { %1536 = vmatmul.mubr.f32.gmra.mrb[42].mxu0 %v641_v55  ;;  %v5802_v55 = vpack.c.bf16 %v2129_v53, %v2128_v52 }
 0x19c   : > { %1540 = vmatprep.mubr.f32.mxu0 %v649_v56 }
 0x19d   : > { %v7399_v25 = vpop.f32.mrb[10].mxu1  ;;  %5803 = vmatprep.subr.bf16.mxu1 %v5802_v55 }
 0x19e   : > { %v7401_v26 = vpop.f32.mrb[11].mxu1 }
 0x19f   : > { %1541 = vmatmul.mubr.f32.gmra.mrb[44].mxu0 %v648_v57 }
 0x1a0   : > { %1545 = vmatprep.mubr.f32.mxu0 %v656_v59 }
 0x1a3   : > { %1546 = vmatmul.mubr.f32.gmra.mrb[46].mxu0 %v655_v0 }
 0x1a4   : > { %1550 = vmatprep.mubr.f32.mxu0 %v663_v1 }
 0x1a5   : > { %v7403_v27 = vpop.f32.mrb[12].mxu1 }
 0x1a6   : > { %v7405_v28 = vpop.f32.mrb[13].mxu1 }
 0x1a7   : > { %1551 = vmatmul.mubr.f32.gmra.mrb[48].mxu0 %v662_v2 }
 0x1a8   : > { %1555 = vmatprep.mubr.f32.mxu0 %v670_v5 }
 0x1ab   : > { %1556 = vmatmul.mubr.f32.gmra.mrb[50].mxu0 %v669_v7  ;;  %v2132_v7 = vld [vmem:[%s9054_s5 + $0x20] sm:$0xff] }
 0x1ac   : > { %1560 = vmatprep.mubr.f32.mxu0 %v677_v8  ;;  %v2133_v8 = vld [vmem:[%s9054_s5 + $0x28] sm:$0xff] }
 0x1ad   : > { %v7407_v29 = vpop.f32.mrb[14].mxu1 }
 0x1ae   : > { %v7409_v30 = vpop.f32.mrb[15].mxu1 }
 0x1af   : > { %1561 = vmatmul.mubr.f32.gmra.mrb[52].mxu0 %v676_v9 }
 0x1b0   : > { %1565 = vmatprep.mubr.f32.mxu0 %v684_v11 }
 0x1b2   : > { %v7411_v31 = vpop.f32.mrb[16].mxu1 }
 0x1b3   : > { %1566 = vmatmul.mubr.f32.gmra.mrb[54].mxu0 %v683_v3  ;;  %v7413_v32 = vpop.f32.mrb[17].mxu1 }
 0x1b4   : > { %1570 = vmatprep.mubr.f32.mxu0 %v691_v13 }
 0x1b6   : > { %v7415_v33 = vpop.f32.mrb[18].mxu1 }
 0x1b7   : > { %1571 = vmatmul.mubr.f32.gmra.mrb[56].mxu0 %v690_v14  ;;  %v7417_v34 = vpop.f32.mrb[19].mxu1  ;;  %v5810_v14 = vpack.c.bf16 %v2133_v8, %v2132_v7 }
 0x1b8   : > { %1575 = vmatprep.mubr.f32.mxu0 %v698_v16  ;;  %v2134_v16 = vld [vmem:[%s9054_s5 + $0x30] sm:$0xff] }
 0x1ba   : > { %v7419_v35 = vpop.f32.mrb[20].mxu1 }
 0x1bb   : > { %1576 = vmatmul.mubr.f32.gmra.mrb[58].mxu0 %v697_v18  ;;  %v7421_v36 = vpop.f32.mrb[21].mxu1  ;;  %v2135_v18 = vld [vmem:[%s9054_s5 + $0x38] sm:$0xff] }
 0x1bc   : > { %1580 = vmatprep.mubr.f32.mxu0 %v705_v19 }
 0x1be   : > { %v7423_v37 = vpop.f32.mrb[22].mxu1 }
 0x1bf   : > { %1581 = vmatmul.mubr.f32.gmra.mrb[60].mxu0 %v704_v20  ;;  %v7425_v38 = vpop.f32.mrb[23].mxu1 }
 0x1c0   : > { %1585 = vmatprep.mubr.f32.mxu0 %v712_v22 }
 0x1c2   : > { %v7427_v39 = vpop.f32.mrb[24].mxu1 }
 0x1c3   : > { %1586 = vmatmul.mubr.f32.gmra.mrb[62].mxu0 %v711_v24  ;;  %v7429_v40 = vpop.f32.mrb[25].mxu1 }
 0x1c6   : > { %v7431_v41 = vpop.f32.mrb[26].mxu1 }
 0x1c7   : > { %v7433_v42 = vpop.f32.mrb[27].mxu1 }
 0x1ca   : > { %v7435_v43 = vpop.f32.mrb[28].mxu1 }
 0x1cb   : > { %v7437_v44 = vpop.f32.mrb[29].mxu1 }
 0x1ce   : > { %v7439_v45 = vpop.f32.mrb[30].mxu1 }
 0x1cf   : > { %v7441_v46 = vpop.f32.mrb[31].mxu1 }
 0x21a   : > { %v1432_v48 = vpop.f32.mrb[0].mxu0 }
 0x21b   : > { %v6010_v49 = vadd.f32 %v7446_v47, %v1432_v48  ;;  %v1434_v50 = vpop.f32.mrb[1].mxu0  ;;  %v5814_v48 = vpack.c.bf16 %v2135_v18, %v2134_v16 }
 0x21d   : > { %v1658_v51 = vadd.f32 %v6010_v49, %v7358_v60  ;;  %v2131_v60 = vld [vmem:[%s9054_s5 + $0x18] sm:$0xff] }
 0x21e   : > { %v1437_v54 = vpop.f32.mrb[2].mxu0  ;;  %v5806_v5 = vpack.c.bf16 %v2131_v60, %v2130_v61 }
 0x21f   : > { %v6011_v56 = vadd.f32 %v7446_v47, %v1437_v54  ;;  %v1439_v57 = vpop.f32.mrb[3].mxu0  ;;  %v1816_v59 = vmax.f32 %v1658_v51, 0.0 }
 0x221   : > { %v1663_v62 = vadd.f32 %v6011_v56, %v7355_v58  ;;  %5286 = vmatprep.mubr.f32.mxu1 %v1816_v59 }
 0x222   : > { %v1442_v63 = vpop.f32.mrb[4].mxu0 }
 0x223   : > { %v1817_v0 = vmax.f32 %v1663_v62, 0.0  ;;  %v6012_v1 = vadd.f32 %v7446_v47, %v1442_v63  ;;  %v1444_v2 = vpop.f32.mrb[5].mxu0 }
 0x225   : > { %v1668_v9 = vadd.f32 %v6012_v1, %v7372_v6  ;;  %5287 = vmatmul.mubr.f32.vlgmr.msra.gmra.mrb[32].mxu1 %v1817_v0 }
 0x226   : > { %v1447_v11 = vpop.f32.mrb[6].mxu0  ;;  %5805 = vmatpush3.bf16.msra.mxu1 %v5802_v55 }
 0x227   : > { %v6013_v58 = vadd.f32 %v7446_v47, %v1447_v11  ;;  %v1449_v3 = vpop.f32.mrb[7].mxu0  ;;  %v1818_v13 = vmax.f32 %v1668_v9, 0.0  ;;  %5807 = vmatprep.subr.bf16.mxu1 %v5806_v5 }
 0x229   : > { %v1673_v19 = vadd.f32 %v6013_v58, %v7369_v4  ;;  %5289 = vmatprep.mubr.f32.mxu1 %v1818_v13 }
 0x22a   : > { %v1452_v6 = vpop.f32.mrb[8].mxu0  ;;  %5809 = vmatpush3.bf16.msra.mxu1 %v5806_v5 }
 0x22b   : > { %v1819_v20 = vmax.f32 %v1673_v19, 0.0  ;;  %v6014_v22 = vadd.f32 %v7446_v47, %v1452_v6  ;;  %v1454_v24 = vpop.f32.mrb[9].mxu0  ;;  %5811 = vmatprep.subr.bf16.mxu1 %v5810_v14 }
 0x22d   : > { %v1678_v49 = vadd.f32 %v6014_v22, %v7380_v12  ;;  %5290 = vmatmul.mubr.f32.gmra.mrb[34].mxu1 %v1819_v20 }
 0x22e   : > { %v1457_v50 = vpop.f32.mrb[10].mxu0  ;;  %5813 = vmatpush3.bf16.msra.mxu1 %v5810_v14 }
 0x22f   : > { %v6015_v51 = vadd.f32 %v7446_v47, %v1457_v50  ;;  %v1459_v52 = vpop.f32.mrb[11].mxu0  ;;  %v1820_v53 = vmax.f32 %v1678_v49, 0.0  ;;  %5815 = vmatprep.subr.bf16.mxu1 %v5814_v48 }
 0x231   : > { %v1683_v4 = vadd.f32 %v6015_v51, %v7377_v10  ;;  %5292 = vmatprep.mubr.f32.mxu1 %v1820_v53 }
 0x232   : > { %v1462_v54 = vpop.f32.mrb[12].mxu0  ;;  %5817 = vmatpush3.bf16.msra.mxu1 %v5814_v48 }
 0x233   : > { %v1821_v55 = vmax.f32 %v1683_v4, 0.0  ;;  %v6016_v56 = vadd.f32 %v7446_v47, %v1462_v54  ;;  %v1464_v57 = vpop.f32.mrb[13].mxu0 }
 0x235   : > { %v1688_v59 = vadd.f32 %v6016_v56, %v7388_v17  ;;  %5293 = vmatmul.mubr.f32.gmra.mrb[36].mxu1 %v1821_v55 }
 0x236   : > { %v1467_v12 = vpop.f32.mrb[14].mxu0 }
 0x237   : > { %v6017_v61 = vadd.f32 %v7446_v47, %v1467_v12  ;;  %v1469_v60 = vpop.f32.mrb[15].mxu0  ;;  %v1822_v62 = vmax.f32 %v1688_v59, 0.0 }
 0x239   : > { %v1693_v63 = vadd.f32 %v6017_v61, %v7385_v15  ;;  %5295 = vmatprep.mubr.f32.mxu1 %v1822_v62 }
 0x23a   : > { %v1472_v0 = vpop.f32.mrb[16].mxu0 }
 0x23b   : > { %v1823_v10 = vmax.f32 %v1693_v63, 0.0  ;;  %v6018_v1 = vadd.f32 %v7446_v47, %v1472_v0  ;;  %v1474_v2 = vpop.f32.mrb[17].mxu0 }
 0x23d   : > { %v1698_v5 = vadd.f32 %v6018_v1, %v7396_v23  ;;  %5296 = vmatmul.mubr.f32.gmra.mrb[38].mxu1 %v1823_v10 }
 0x23e   : > { %v1477_v7 = vpop.f32.mrb[18].mxu0 }
 0x23f   : > { %v6019_v17 = vadd.f32 %v7446_v47, %v1477_v7  ;;  %v1479_v8 = vpop.f32.mrb[19].mxu0  ;;  %v1824_v9 = vmax.f32 %v1698_v5, 0.0 }
 0x241   : > { %v1703_v11 = vadd.f32 %v6019_v17, %v7393_v21  ;;  %5298 = vmatprep.mubr.f32.mxu1 %v1824_v9 }
 0x242   : > { %v1482_v58 = vpop.f32.mrb[20].mxu0 }
 0x243   : > { %v1825_v3 = vmax.f32 %v1703_v11, 0.0  ;;  %v6020_v15 = vadd.f32 %v7446_v47, %v1482_v58  ;;  %v1484_v13 = vpop.f32.mrb[21].mxu0 }
 0x245   : > { %v1708_v14 = vadd.f32 %v6020_v15, %v7401_v26  ;;  %5299 = vmatmul.mubr.f32.gmra.mrb[40].mxu1 %v1825_v3 }
 0x246   : > { %v1487_v16 = vpop.f32.mrb[22].mxu0 }
 0x247   : > { %v6021_v23 = vadd.f32 %v7446_v47, %v1487_v16  ;;  %v1489_v18 = vpop.f32.mrb[23].mxu0  ;;  %v1826_v19 = vmax.f32 %v1708_v14, 0.0 }
 0x249   : > { %v1713_v6 = vadd.f32 %v6021_v23, %v7399_v25  ;;  %5301 = vmatprep.mubr.f32.mxu1 %v1826_v19 }
 0x24a   : > { %v1492_v20 = vpop.f32.mrb[24].mxu0 }
 0x24b   : > { %v1827_v22 = vmax.f32 %v1713_v6, 0.0  ;;  %v6022_v21 = vadd.f32 %v7446_v47, %v1492_v20  ;;  %v1494_v24 = vpop.f32.mrb[25].mxu0 }
 0x24d   : > { %v1718_v48 = vadd.f32 %v6022_v21, %v7405_v28  ;;  %5302 = vmatmul.mubr.f32.gmra.mrb[42].mxu1 %v1827_v22 }
 0x24e   : > { %v1497_v49 = vpop.f32.mrb[26].mxu0 }
 0x24f   : > { %v6023_v26 = vadd.f32 %v7446_v47, %v1497_v49  ;;  %v1499_v50 = vpop.f32.mrb[27].mxu0  ;;  %v1828_v51 = vmax.f32 %v1718_v48, 0.0 }
 0x251   : > { %v1723_v52 = vadd.f32 %v6023_v26, %v7403_v27  ;;  %5304 = vmatprep.mubr.f32.mxu1 %v1828_v51 }
 0x252   : > { %v1502_v53 = vpop.f32.mrb[28].mxu0 }
 0x253   : > { %v1829_v4 = vmax.f32 %v1723_v52, 0.0  ;;  %v6024_v25 = vadd.f32 %v7446_v47, %v1502_v53  ;;  %v1504_v54 = vpop.f32.mrb[29].mxu0 }
 0x255   : > { %v1728_v55 = vadd.f32 %v6024_v25, %v7409_v30  ;;  %5305 = vmatmul.mubr.f32.gmra.mrb[44].mxu1 %v1829_v4 }
 0x256   : > { %v1507_v56 = vpop.f32.mrb[30].mxu0 }
 0x257   : > { %v6025_v28 = vadd.f32 %v7446_v47, %v1507_v56  ;;  %v1509_v57 = vpop.f32.mrb[31].mxu0  ;;  %v1830_v59 = vmax.f32 %v1728_v55, 0.0 }
 0x259   : > { %v1733_v12 = vadd.f32 %v6025_v28, %v7407_v29  ;;  %5307 = vmatprep.mubr.f32.mxu1 %v1830_v59 }
 0x25a   : > { %v1512_v61 = vpop.f32.mrb[32].mxu0 }
 0x25b   : > { %v1831_v60 = vmax.f32 %v1733_v12, 0.0  ;;  %v6026_v27 = vadd.f32 %v7446_v47, %v1512_v61  ;;  %v1514_v62 = vpop.f32.mrb[33].mxu0 }
 0x25d   : > { %v1738_v63 = vadd.f32 %v6026_v27, %v7413_v32  ;;  %5308 = vmatmul.mubr.f32.gmra.mrb[46].mxu1 %v1831_v60 }
 0x25e   : > { %v1517_v0 = vpop.f32.mrb[34].mxu0 }
 0x25f   : > { %v6027_v30 = vadd.f32 %v7446_v47, %v1517_v0  ;;  %v1519_v10 = vpop.f32.mrb[35].mxu0  ;;  %v1832_v1 = vmax.f32 %v1738_v63, 0.0 }
 0x261   : > { %v1743_v2 = vadd.f32 %v6027_v30, %v7411_v31  ;;  %5310 = vmatprep.mubr.f32.mxu1 %v1832_v1 }
 0x262   : > { %v1522_v5 = vpop.f32.mrb[36].mxu0 }
 0x263   : > { %v1833_v7 = vmax.f32 %v1743_v2, 0.0  ;;  %v6028_v29 = vadd.f32 %v7446_v47, %v1522_v5  ;;  %v1524_v17 = vpop.f32.mrb[37].mxu0 }
 0x265   : > { %v1748_v8 = vadd.f32 %v6028_v29, %v7417_v34  ;;  %5311 = vmatmul.mubr.f32.gmra.mrb[48].mxu1 %v1833_v7 }
 0x266   : > { %v1527_v9 = vpop.f32.mrb[38].mxu0 }
 0x267   : > { %v6029_v32 = vadd.f32 %v7446_v47, %v1527_v9  ;;  %v1529_v11 = vpop.f32.mrb[39].mxu0  ;;  %v1834_v58 = vmax.f32 %v1748_v8, 0.0 }
 0x269   : > { %v1753_v3 = vadd.f32 %v6029_v32, %v7415_v33  ;;  %5313 = vmatprep.mubr.f32.mxu1 %v1834_v58 }
 0x26a   : > { %v1532_v15 = vpop.f32.mrb[40].mxu0 }
 0x26b   : > { %v1835_v13 = vmax.f32 %v1753_v3, 0.0  ;;  %v6030_v31 = vadd.f32 %v7446_v47, %v1532_v15  ;;  %v1534_v14 = vpop.f32.mrb[41].mxu0 }
 0x26d   : > { %v1758_v16 = vadd.f32 %v6030_v31, %v7421_v36  ;;  %5314 = vmatmul.mubr.f32.gmra.mrb[50].mxu1 %v1835_v13 }
 0x26e   : > { %v1537_v23 = vpop.f32.mrb[42].mxu0 }
 0x26f   : > { %v6031_v34 = vadd.f32 %v7446_v47, %v1537_v23  ;;  %v1539_v18 = vpop.f32.mrb[43].mxu0  ;;  %v1836_v19 = vmax.f32 %v1758_v16, 0.0  ;;  %v2499_v23 = vld [vmem:[%s9056_s7 + $0x10] sm:$0xff] }
 0x271   : > { %v1763_v6 = vadd.f32 %v6031_v34, %v7419_v35  ;;  %5316 = vmatprep.mubr.f32.mxu1 %v1836_v19  ;;  %v2500_v34 = vld [vmem:[%s9056_s7 + $0x18] sm:$0xff] }
 0x272   : > { %v1542_v20 = vpop.f32.mrb[44].mxu0 }
 0x273   : > { %v1837_v22 = vmax.f32 %v1763_v6, 0.0  ;;  %v6032_v33 = vadd.f32 %v7446_v47, %v1542_v20  ;;  %v1544_v21 = vpop.f32.mrb[45].mxu0  ;;  %v5822_v6 = vpack.c.bf16 %v2500_v34, %v2499_v23  ;;  %v2501_v20 = vld [vmem:[%s9056_s7 + $0x20] sm:$0xff] }
 0x275   : > { %v1768_v24 = vadd.f32 %v6032_v33, %v7425_v38  ;;  %5317 = vmatmul.mubr.f32.gmra.mrb[52].mxu1 %v1837_v22  ;;  %v2502_v22 = vld [vmem:[%s9056_s7 + $0x28] sm:$0xff] }
 0x276   : > { %v1547_v48 = vpop.f32.mrb[46].mxu0 }
 0x277   : > { %v6033_v36 = vadd.f32 %v7446_v47, %v1547_v48  ;;  %v1549_v49 = vpop.f32.mrb[47].mxu0  ;;  %v1838_v26 = vmax.f32 %v1768_v24, 0.0  ;;  %v5826_v48 = vpack.c.bf16 %v2502_v22, %v2501_v20 }
 0x278   : > { %v2503_v49 = vld [vmem:[%s9056_s7 + $0x30] sm:$0xff] }
 0x279   : > { %v1773_v50 = vadd.f32 %v6033_v36, %v7423_v37  ;;  %5319 = vmatprep.mubr.f32.mxu1 %v1838_v26  ;;  %v2504_v26 = vld [vmem:[%s9056_s7 + $0x38] sm:$0xff] }
 0x27a   : > { %v1552_v51 = vpop.f32.mrb[48].mxu0 }
 0x27b   : > { %v1839_v52 = vmax.f32 %v1773_v50, 0.0  ;;  %v6034_v35 = vadd.f32 %v7446_v47, %v1552_v51  ;;  %v1554_v53 = vpop.f32.mrb[49].mxu0 }
 0x27c   : > { %v2506_v53 = vld [vmem:[%s9056_s7 + $0x48] sm:$0xff] }
 0x27d   : > { %v1778_v4 = vadd.f32 %v6034_v35, %v7429_v40  ;;  %5320 = vmatmul.mubr.f32.gmra.mrb[54].mxu1 %v1839_v52  ;;  %v5830_v52 = vpack.c.bf16 %v2504_v26, %v2503_v49  ;;  %v2505_v35 = vld [vmem:[%s9056_s7 + $0x40] sm:$0xff] }
 0x27e   : > { %v1557_v25 = vpop.f32.mrb[50].mxu0 }
 0x27f   : > { %v6035_v38 = vadd.f32 %v7446_v47, %v1557_v25  ;;  %v1559_v54 = vpop.f32.mrb[51].mxu0  ;;  %v1840_v55 = vmax.f32 %v1778_v4, 0.0 }
 0x280   : > { %v5834_v54 = vpack.c.bf16 %v2506_v53, %v2505_v35 }
 0x281   : > { %v1783_v56 = vadd.f32 %v6035_v38, %v7427_v39  ;;  %5322 = vmatprep.mubr.f32.mxu1 %v1840_v55 }
 0x282   : > { %v1562_v28 = vpop.f32.mrb[52].mxu0 }
 0x283   : > { %v1841_v57 = vmax.f32 %v1783_v56, 0.0  ;;  %v6036_v37 = vadd.f32 %v7446_v47, %v1562_v28  ;;  %v1564_v59 = vpop.f32.mrb[53].mxu0  ;;  %v2507_v56 = vld [vmem:[%s9056_s7 + $0x50] sm:$0xff]  ;;  %v2508_v28 = vld [vmem:[%s9056_s7 + $0x58] sm:$0xff] }
 0x284   : > { %v5838_v59 = vpack.c.bf16 %v2508_v28, %v2507_v56 }
 0x285   : > { %v1788_v12 = vadd.f32 %v6036_v37, %v7433_v42  ;;  %5323 = vmatmul.mubr.f32.gmra.mrb[56].mxu1 %v1841_v57 }
 0x286   : > { %v1567_v61 = vpop.f32.mrb[54].mxu0 }
 0x287   : > { %v6037_v40 = vadd.f32 %v7446_v47, %v1567_v61  ;;  %v1569_v60 = vpop.f32.mrb[55].mxu0  ;;  %v1842_v27 = vmax.f32 %v1788_v12, 0.0  ;;  %v2509_v12 = vld [vmem:[%s9056_s7 + $0x60] sm:$0xff]  ;;  %v2510_v61 = vld [vmem:[%s9056_s7 + $0x68] sm:$0xff] }
 0x289   : > { %v1793_v62 = vadd.f32 %v6037_v40, %v7431_v41  ;;  %5325 = vmatprep.mubr.f32.mxu1 %v1842_v27 }
 0x28a   : > { %v1572_v63 = vpop.f32.mrb[56].mxu0 }
 0x28b   : > { %v1843_v0 = vmax.f32 %v1793_v62, 0.0  ;;  %v6038_v39 = vadd.f32 %v7446_v47, %v1572_v63  ;;  %v1574_v30 = vpop.f32.mrb[57].mxu0  ;;  %v5842_v62 = vpack.c.bf16 %v2510_v61, %v2509_v12 }
 0x28d   : > { %v1798_v10 = vadd.f32 %v6038_v39, %v7437_v44  ;;  %5326 = vmatmul.mubr.f32.gmra.mrb[58].mxu1 %v1843_v0  ;;  %v2511_v0 = vld [vmem:[%s9056_s7 + $0x70] sm:$0xff]  ;;  %v2512_v39 = vld [vmem:[%s9056_s7 + $0x78] sm:$0xff] }
 0x28e   : > { %v1577_v1 = vpop.f32.mrb[58].mxu0 }
 0x28f   : > { %v6039_v42 = vadd.f32 %v7446_v47, %v1577_v1  ;;  %v1579_v2 = vpop.f32.mrb[59].mxu0  ;;  %v1844_v5 = vmax.f32 %v1798_v10, 0.0  ;;  %v5846_v1 = vpack.c.bf16 %v2512_v39, %v2511_v0 }
 0x291   : > { %v1803_v7 = vadd.f32 %v6039_v42, %v7435_v43  ;;  %5328 = vmatprep.mubr.f32.mxu1 %v1844_v5  ;;  %v7539_v43 = vld [vmem:[%s9053_s4] ss:$0 sm:$0xff] }
 0x292   : > { %v1582_v29 = vpop.f32.mrb[60].mxu0 }
 0x293   : > { %v1845_v17 = vmax.f32 %v1803_v7, 0.0  ;;  %v6040_v41 = vadd.f32 %v7446_v47, %v1582_v29  ;;  %v1584_v8 = vpop.f32.mrb[61].mxu0 }
 0x295   : > { %v1808_v9 = vadd.f32 %v6040_v41, %v7441_v46  ;;  %5329 = vmatmul.mubr.f32.gmra.mrb[60].mxu1 %v1845_v17  ;;  %v2497_v46 = vld [vmem:[%s9056_s7] sm:$0xff] }
 0x296   : > { %v1587_v32 = vpop.f32.mrb[62].mxu0 }
 0x297   : > { %v6041_v44 = vadd.f32 %v7446_v47, %v1587_v32  ;;  %v1589_v11 = vpop.f32.mrb[63].mxu0  ;;  %v1846_v58 = vmax.f32 %v1808_v9, 0.0  ;;  %v2498_v47 = vld [vmem:[%s9056_s7 + $0x8] sm:$0xff] }
 0x298   : > { %v5818_v31 = vpack.c.bf16 %v2498_v47, %v2497_v46 }
 0x299   : > { %v1813_v3 = vadd.f32 %v6041_v44, %v7439_v45  ;;  %5331 = vmatprep.mubr.f32.mxu1 %v1846_v58 }
 0x29a   : > { %5819 = vmatprep.subr.bf16.mxu1 %v5818_v31 }
 0x29b   : > { %v1847_v15 = vmax.f32 %v1813_v3, 0.0 }
 0x29d   : > { %5332 = vmatmul.mubr.f32.gmra.mrb[62].mxu1 %v1847_v15 }
 0x2f8   : > { %v5288_v13 = vpop.f32.mrb[32].mxu1 }
 0x2f9   : > { %v1943_v45 = vadd.f32 %v5288_v13, %v7539_v43  ;;  %v1937_v14 = vpop.f32.mrb[33].mxu1 }
 0x2fa   : > { %v1938_v16 = vadd.f32 %v7539_v43, %v1937_v14 }
 0x2fb   : > { %v2097_v19 = vmax.f32 %v1943_v45, 0.0 }
 0x2fc   : > { %v2096_v18 = vmax.f32 %v1938_v16, 0.0 }
 0x2fe   : > { %5350 = vmatprep.mubr.msk.f32.mxu1 %vm2143_vm1, %v2096_v18 }
 0x2ff   : > { %5351 = vmatmul.mubr.msk.f32.vlgmr.msra.gmra.mrb[64].mxu1 %vm2143_vm1, %v2097_v19 }
 0x300   : > { %v5291_v33 = vpop.f32.mrb[34].mxu1  ;;  %5821 = vmatpush3.bf16.msra.mxu1 %v5818_v31 }
 0x301   : > { %v1953_v21 = vadd.f32 %v5291_v33, %v7539_v43  ;;  %v1947_v24 = vpop.f32.mrb[35].mxu1  ;;  %5823 = vmatprep.subr.bf16.mxu1 %v5822_v6 }
 0x302   : > { %v1948_v36 = vadd.f32 %v7539_v43, %v1947_v24 }
 0x303   : > { %v2099_v51 = vmax.f32 %v1953_v21, 0.0 }
 0x304   : > { %v2098_v50 = vmax.f32 %v1948_v36, 0.0  ;;  %5825 = vmatpush3.bf16.msra.mxu1 %v5822_v6 }
 0x305   : > { %5827 = vmatprep.subr.bf16.mxu1 %v5826_v48 }
 0x306   : > { %5353 = vmatprep.mubr.msk.f32.mxu1 %vm2143_vm1, %v2098_v50 }
 0x307   : > { %5354 = vmatmul.mubr.msk.f32.gmra.mrb[66].mxu1 %vm2143_vm1, %v2099_v51 }
 0x308   : > { %v5294_v4 = vpop.f32.mrb[36].mxu1  ;;  %5829 = vmatpush3.bf16.msra.mxu1 %v5826_v48 }
 0x309   : > { %v1963_v25 = vadd.f32 %v5294_v4, %v7539_v43  ;;  %v1957_v38 = vpop.f32.mrb[37].mxu1  ;;  %5831 = vmatprep.subr.bf16.mxu1 %v5830_v52 }
 0x30a   : > { %v1958_v55 = vadd.f32 %v7539_v43, %v1957_v38 }
 0x30b   : > { %v2101_v37 = vmax.f32 %v1963_v25, 0.0 }
 0x30c   : > { %v2100_v57 = vmax.f32 %v1958_v55, 0.0  ;;  %5833 = vmatpush3.bf16.msra.mxu1 %v5830_v52 }
 0x30d   : > { %5835 = vmatprep.subr.bf16.mxu1 %v5834_v54 }
 0x30e   : > { %5356 = vmatprep.mubr.msk.f32.mxu1 %vm2143_vm1, %v2100_v57 }
 0x30f   : > { %5357 = vmatmul.mubr.msk.f32.gmra.mrb[68].mxu1 %vm2143_vm1, %v2101_v37 }
 0x310   : > { %v5297_v40 = vpop.f32.mrb[38].mxu1  ;;  %5837 = vmatpush3.bf16.msra.mxu1 %v5834_v54 }
 0x311   : > { %v1973_v60 = vadd.f32 %v5297_v40, %v7539_v43  ;;  %v1967_v27 = vpop.f32.mrb[39].mxu1  ;;  %5839 = vmatprep.subr.bf16.mxu1 %v5838_v59 }
 0x312   : > { %v1968_v63 = vadd.f32 %v7539_v43, %v1967_v27 }
 0x313   : > { %v2103_v10 = vmax.f32 %v1973_v60, 0.0 }
 0x314   : > { %v2102_v30 = vmax.f32 %v1968_v63, 0.0  ;;  %5841 = vmatpush3.bf16.msra.mxu1 %v5838_v59 }
 0x315   : > { %5843 = vmatprep.subr.bf16.mxu1 %v5842_v62 }
 0x316   : > { %5359 = vmatprep.mubr.msk.f32.mxu1 %vm2143_vm1, %v2102_v30 }
 0x317   : > { %5360 = vmatmul.mubr.msk.f32.gmra.mrb[70].mxu1 %vm2143_vm1, %v2103_v10 }
 0x318   : > { %v5300_v42 = vpop.f32.mrb[40].mxu1  ;;  %5845 = vmatpush3.bf16.msra.mxu1 %v5842_v62 }
 0x319   : > { %v1983_v2 = vadd.f32 %v5300_v42, %v7539_v43  ;;  %v1977_v5 = vpop.f32.mrb[41].mxu1  ;;  %5847 = vmatprep.subr.bf16.mxu1 %v5846_v1 }
 0x31a   : > { %v1978_v7 = vadd.f32 %v7539_v43, %v1977_v5 }
 0x31b   : > { %v2105_v17 = vmax.f32 %v1983_v2, 0.0 }
 0x31c   : > { %v2104_v29 = vmax.f32 %v1978_v7, 0.0  ;;  %5849 = vmatpush3.bf16.msra.mxu1 %v5846_v1 }
 0x31e   : > { %5362 = vmatprep.mubr.msk.f32.mxu1 %vm2143_vm1, %v2104_v29 }
 0x31f   : > { %5363 = vmatmul.mubr.msk.f32.gmra.mrb[72].mxu1 %vm2143_vm1, %v2105_v17 }
 0x320   : > { %v5303_v41 = vpop.f32.mrb[42].mxu1 }
 0x321   : > { %v1993_v8 = vadd.f32 %v5303_v41, %v7539_v43  ;;  %v1987_v9 = vpop.f32.mrb[43].mxu1 }
 0x322   : > { %v1988_v32 = vadd.f32 %v7539_v43, %v1987_v9 }
 0x323   : > { %v2107_v11 = vmax.f32 %v1993_v8, 0.0 }
 0x324   : > { %v2106_v44 = vmax.f32 %v1988_v32, 0.0  ;;  %v2777_v32 = vld [vmem:[%s9058_s9] sm:$0xff] }
 0x326   : > { %5365 = vmatprep.mubr.msk.f32.mxu1 %vm2143_vm1, %v2106_v44  ;;  %v2778_v44 = vld [vmem:[%s9058_s9 + $0x8] sm:$0xff] }
 0x327   : > { %5366 = vmatmul.mubr.msk.f32.gmra.mrb[74].mxu1 %vm2143_vm1, %v2107_v11  ;;  %v7663_v11 = vld [vmem:[%s9055_s6] ss:$0 sm:$0xff] }
 0x328   : > { %v5306_v58 = vpop.f32.mrb[44].mxu1 }
 0x329   : > { %v2003_v3 = vadd.f32 %v5306_v58, %v7539_v43  ;;  %v1997_v15 = vpop.f32.mrb[45].mxu1 }
 0x32a   : > { %v1998_v46 = vadd.f32 %v7539_v43, %v1997_v15  ;;  %v2780_v15 = vld [vmem:[%s9058_s9 + $0x18] sm:$0xff] }
 0x32b   : > { %v2109_v13 = vmax.f32 %v2003_v3, 0.0  ;;  %v2779_v3 = vld [vmem:[%s9058_s9 + $0x10] sm:$0xff] }
 0x32c   : > { %v2108_v47 = vmax.f32 %v1998_v46, 0.0 }
 0x32e   : > { %5368 = vmatprep.mubr.msk.f32.mxu1 %vm2143_vm1, %v2108_v47 }
 0x32f   : > { %5369 = vmatmul.mubr.msk.f32.gmra.mrb[76].mxu1 %vm2143_vm1, %v2109_v13 }
 0x330   : > { %v5309_v31 = vpop.f32.mrb[46].mxu1 }
 0x331   : > { %v2013_v45 = vadd.f32 %v5309_v31, %v7539_v43  ;;  %v2007_v14 = vpop.f32.mrb[47].mxu1  ;;  %v5854_v31 = vpack.c.bf16 %v2780_v15, %v2779_v3 }
 0x332   : > { %v2008_v16 = vadd.f32 %v7539_v43, %v2007_v14  ;;  %v2782_v14 = vld [vmem:[%s9058_s9 + $0x28] sm:$0xff] }
 0x333   : > { %v2111_v34 = vmax.f32 %v2013_v45, 0.0  ;;  %v2781_v45 = vld [vmem:[%s9058_s9 + $0x20] sm:$0xff] }
 0x334   : > { %v2110_v23 = vmax.f32 %v2008_v16, 0.0  ;;  %v5858_v16 = vpack.c.bf16 %v2782_v14, %v2781_v45 }
 0x336   : > { %5371 = vmatprep.mubr.msk.f32.mxu1 %vm2143_vm1, %v2110_v23 }
 0x337   : > { %5372 = vmatmul.mubr.msk.f32.gmra.mrb[78].mxu1 %vm2143_vm1, %v2111_v34  ;;  %v2783_v34 = vld [vmem:[%s9058_s9 + $0x30] sm:$0xff] }
 0x338   : > { %v5312_v18 = vpop.f32.mrb[48].mxu1 }
 0x339   : > { %v2023_v19 = vadd.f32 %v5312_v18, %v7539_v43  ;;  %v2017_v6 = vpop.f32.mrb[49].mxu1  ;;  %v2784_v18 = vld [vmem:[%s9058_s9 + $0x38] sm:$0xff] }
 0x33a   : > { %v2018_v20 = vadd.f32 %v7539_v43, %v2017_v6 }
 0x33b   : > { %v2113_v33 = vmax.f32 %v2023_v19, 0.0 }
 0x33c   : > { %v2112_v22 = vmax.f32 %v2018_v20, 0.0 }
 0x33e   : > { %5374 = vmatprep.mubr.msk.f32.mxu1 %vm2143_vm1, %v2112_v22  ;;  %v5862_v22 = vpack.c.bf16 %v2784_v18, %v2783_v34  ;;  %v3146_v34 = vld [vmem:[%s9060_s11 + $0x8] sm:$0xff]  ;;  %v3153_v18 = vld [vmem:[%s9060_s11 + $0x40] sm:$0xff] }
 0x33f   : > { %5375 = vmatmul.mubr.msk.f32.gmra.mrb[80].mxu1 %vm2143_vm1, %v2113_v33 }
 0x340   : > { %v5315_v21 = vpop.f32.mrb[50].mxu1 }
 0x341   : > { %v2033_v24 = vadd.f32 %v5315_v21, %v7539_v43  ;;  %v2027_v48 = vpop.f32.mrb[51].mxu1 }
 0x342   : > { %v2028_v36 = vadd.f32 %v7539_v43, %v2027_v48 }
 0x343   : > { %v2115_v26 = vmax.f32 %v2033_v24, 0.0 }
 0x344   : > { %v2114_v49 = vmax.f32 %v2028_v36, 0.0 }
 0x346   : > { %5377 = vmatprep.mubr.msk.f32.mxu1 %vm2143_vm1, %v2114_v49 }
 0x347   : > { %5378 = vmatmul.mubr.msk.f32.gmra.mrb[82].mxu1 %vm2143_vm1, %v2115_v26 }
 0x348   : > { %v5318_v50 = vpop.f32.mrb[52].mxu1 }
 0x349   : > { %v2043_v51 = vadd.f32 %v5318_v50, %v7539_v43  ;;  %v2037_v52 = vpop.f32.mrb[53].mxu1 }
 0x34a   : > { %v2038_v35 = vadd.f32 %v7539_v43, %v2037_v52 }
 0x34b   : > { %v2117_v4 = vmax.f32 %v2043_v51, 0.0 }
 0x34c   : > { %v2116_v53 = vmax.f32 %v2038_v35, 0.0 }
 0x34e   : > { %5380 = vmatprep.mubr.msk.f32.mxu1 %vm2143_vm1, %v2116_v53 }
 0x34f   : > { %5381 = vmatmul.mubr.msk.f32.gmra.mrb[84].mxu1 %vm2143_vm1, %v2117_v4 }
 0x350   : > { %v5321_v25 = vpop.f32.mrb[54].mxu1 }
 0x351   : > { %v2053_v38 = vadd.f32 %v5321_v25, %v7539_v43  ;;  %v2047_v54 = vpop.f32.mrb[55].mxu1 }
 0x352   : > { %v2048_v55 = vadd.f32 %v7539_v43, %v2047_v54 }
 0x353   : > { %v2119_v28 = vmax.f32 %v2053_v38, 0.0 }
 0x354   : > { %v2118_v56 = vmax.f32 %v2048_v55, 0.0 }
 0x356   : > { %5383 = vmatprep.mubr.msk.f32.mxu1 %vm2143_vm1, %v2118_v56 }
 0x357   : > { %5384 = vmatmul.mubr.msk.f32.gmra.mrb[86].mxu1 %vm2143_vm1, %v2119_v28 }
 0x358   : > { %v5324_v57 = vpop.f32.mrb[56].mxu1 }
 0x359   : > { %v2063_v37 = vadd.f32 %v5324_v57, %v7539_v43  ;;  %v2057_v59 = vpop.f32.mrb[57].mxu1 }
 0x35a   : > { %v2058_v12 = vadd.f32 %v7539_v43, %v2057_v59 }
 0x35b   : > { %v2121_v40 = vmax.f32 %v2063_v37, 0.0 }
 0x35c   : > { %v2120_v61 = vmax.f32 %v2058_v12, 0.0 }
 0x35e   : > { %5386 = vmatprep.mubr.msk.f32.mxu1 %vm2143_vm1, %v2120_v61 }
 0x35f   : > { %5387 = vmatmul.mubr.msk.f32.gmra.mrb[88].mxu1 %vm2143_vm1, %v2121_v40 }
 0x360   : > { %v5327_v60 = vpop.f32.mrb[58].mxu1 }
 0x361   : > { %v2073_v27 = vadd.f32 %v5327_v60, %v7539_v43  ;;  %v2067_v62 = vpop.f32.mrb[59].mxu1 }
 0x362   : > { %v2068_v63 = vadd.f32 %v7539_v43, %v2067_v62 }
 0x363   : > { %v2123_v39 = vmax.f32 %v2073_v27, 0.0 }
 0x364   : > { %v2122_v0 = vmax.f32 %v2068_v63, 0.0 }
 0x366   : > { %5389 = vmatprep.mubr.msk.f32.mxu1 %vm2143_vm1, %v2122_v0 }
 0x367   : > { %5390 = vmatmul.mubr.msk.f32.gmra.mrb[90].mxu1 %vm2143_vm1, %v2123_v39 }
 0x368   : > { %v5330_v30 = vpop.f32.mrb[60].mxu1 }
 0x369   : > { %v2083_v10 = vadd.f32 %v5330_v30, %v7539_v43  ;;  %v2077_v1 = vpop.f32.mrb[61].mxu1 }
 0x36a   : > { %v2078_v42 = vadd.f32 %v7539_v43, %v2077_v1 }
 0x36b   : > { %v2125_v5 = vmax.f32 %v2083_v10, 0.0 }
 0x36c   : > { %v2124_v2 = vmax.f32 %v2078_v42, 0.0 }
 0x36e   : > { %5392 = vmatprep.mubr.msk.f32.mxu1 %vm2143_vm1, %v2124_v2 }
 0x36f   : > { %5393 = vmatmul.mubr.msk.f32.gmra.mrb[92].mxu1 %vm2143_vm1, %v2125_v5 }
 0x370   : > { %v5333_v7 = vpop.f32.mrb[62].mxu1 }
 0x371   : > { %v2093_v29 = vadd.f32 %v5333_v7, %v7539_v43  ;;  %v2087_v17 = vpop.f32.mrb[63].mxu1 }
 0x372   : > { %v2088_v41 = vadd.f32 %v7539_v43, %v2087_v17  ;;  %v5850_v43 = vpack.c.bf16 %v2778_v44, %v2777_v32 }
 0x373   : > { %v2127_v9 = vmax.f32 %v2093_v29, 0.0 }
 0x374   : > { %v2126_v8 = vmax.f32 %v2088_v41, 0.0  ;;  %5851 = vmatprep.subr.bf16.mxu1 %v5850_v43 }
 0x376   : > { %5395 = vmatprep.mubr.msk.f32.mxu1 %vm2143_vm1, %v2126_v8 }
 0x377   : > { %5396 = vmatmul.mubr.msk.f32.gmra.mrb[94].mxu1 %vm2143_vm1, %v2127_v9 }
 0x3d2   : > { %v5352_v58 = vpop.f32.mrb[64].mxu1 }
 0x3d3   : > { %v2312_v46 = vadd.f32 %v5352_v58, %v7663_v11  ;;  %v2306_v47 = vpop.f32.mrb[65].mxu1 }
 0x3d4   : > { %v2307_v13 = vadd.f32 %v7663_v11, %v2306_v47 }
 0x3d5   : > { %2466 = vst [vmem:[%s7668_s26 + $0x8] sm:$0xff] %v2312_v46 }
 0x3d6   : > { %2465 = vst [vmem:[%s7668_s26] sm:$0xff] %v2307_v13  ;;  %5430 = vmatprep.mubr.f32.mxu1 %v2307_v13 }
 0x3d7   : > { %5431 = vmatmul.mubr.f32.vlgmr.msra.gmra.mrb[96].mxu1 %v2312_v46 }
 0x3d8   : > { %5853 = vmatpush3.bf16.msra.mxu1 %v5850_v43 }
 0x3d9   : > { %5855 = vmatprep.subr.bf16.mxu1 %v5854_v31 }
 0x3da   : > { %v5355_v23 = vpop.f32.mrb[66].mxu1 }
 0x3db   : > { %v2322_v19 = vadd.f32 %v5355_v23, %v7663_v11  ;;  %v2316_v6 = vpop.f32.mrb[67].mxu1  ;;  %v7755_v23 = vld [vmem:[%s9057_s8] ss:$0 sm:$0xff] }
 0x3dc   : > { %v2317_v20 = vadd.f32 %v7663_v11, %v2316_v6  ;;  %5857 = vmatpush3.bf16.msra.mxu1 %v5854_v31  ;;  %v5866_v6 = vpack.c.bf16 %v3153_v18, %v3146_v34 }
 0x3dd   : > { %2468 = vst [vmem:[%s7668_s26 + $0x18] sm:$0xff] %v2322_v19  ;;  %5859 = vmatprep.subr.bf16.mxu1 %v5858_v16 }
 0x3de   : > { %2467 = vst [vmem:[%s7668_s26 + $0x10] sm:$0xff] %v2317_v20  ;;  %5433 = vmatprep.mubr.f32.mxu1 %v2317_v20 }
 0x3df   : > { %5434 = vmatmul.mubr.f32.gmra.mrb[98].mxu1 %v2322_v19 }
 0x3e0   : > { %5861 = vmatpush3.bf16.msra.mxu1 %v5858_v16 }
 0x3e1   : > { %5863 = vmatprep.subr.bf16.mxu1 %v5862_v22 }
 0x3e2   : > { %v5358_v33 = vpop.f32.mrb[68].mxu1 }
 0x3e3   : > { %v2332_v21 = vadd.f32 %v5358_v33, %v7663_v11  ;;  %v2326_v24 = vpop.f32.mrb[69].mxu1  ;;  %v3152_v33 = vld [vmem:[%s9060_s11 + $0x38] sm:$0xff] }
 0x3e4   : > { %v2327_v48 = vadd.f32 %v7663_v11, %v2326_v24  ;;  %5865 = vmatpush3.bf16.msra.mxu1 %v5862_v22  ;;  %v3145_v22 = vld [vmem:[%s9060_s11] sm:$0xff]  ;;  %v3160_v24 = vld [vmem:[%s9060_s11 + $0x78] sm:$0xff] }
 0x3e5   : > { %2470 = vst [vmem:[%s7668_s26 + $0x28] sm:$0xff] %v2332_v21  ;;  %5867 = vmatprep.subr.bf16.mxu1 %v5866_v6 }
 0x3e6   : > { %2469 = vst [vmem:[%s7668_s26 + $0x20] sm:$0xff] %v2327_v48  ;;  %5436 = vmatprep.mubr.f32.mxu1 %v2327_v48  ;;  %v3167_v48 = vld [vmem:[%s9060_s11 + $0xb0] sm:$0xff] }
 0x3e7   : > { %5437 = vmatmul.mubr.f32.gmra.mrb[100].mxu1 %v2332_v21 }
 0x3ea   : > { %v5361_v36 = vpop.f32.mrb[70].mxu1 }
 0x3eb   : > { %v2342_v49 = vadd.f32 %v5361_v36, %v7663_v11  ;;  %v2336_v26 = vpop.f32.mrb[71].mxu1 }
 0x3ec   : > { %v2337_v50 = vadd.f32 %v7663_v11, %v2336_v26  ;;  %v3159_v26 = vld [vmem:[%s9060_s11 + $0x70] sm:$0xff] }
 0x3ed   : > { %2472 = vst [vmem:[%s7668_s26 + $0x38] sm:$0xff] %v2342_v49 }
 0x3ee   : > { %2471 = vst [vmem:[%s7668_s26 + $0x30] sm:$0xff] %v2337_v50  ;;  %5439 = vmatprep.mubr.f32.mxu1 %v2337_v50  ;;  %v3166_v50 = vld [vmem:[%s9060_s11 + $0xa8] sm:$0xff] }
 0x3ef   : > { %5440 = vmatmul.mubr.f32.gmra.mrb[102].mxu1 %v2342_v49  ;;  %v5868_v49 = vpack.c.bf16 %v3152_v33, %v3145_v22  ;;  %v3216_v22 = vld [vmem:[%s9060_s11 + $0x238] sm:$0xff] }
 0x3f2   : > { %v5364_v51 = vpop.f32.mrb[72].mxu1 }
 0x3f3   : > { %v2352_v52 = vadd.f32 %v5364_v51, %v7663_v11  ;;  %v2346_v35 = vpop.f32.mrb[73].mxu1 }
 0x3f4   : > { %v2347_v53 = vadd.f32 %v7663_v11, %v2346_v35  ;;  %v3174_v35 = vld [vmem:[%s9060_s11 + $0xe8] sm:$0xff] }
 0x3f5   : > { %2474 = vst [vmem:[%s7668_s26 + $0x48] sm:$0xff] %v2352_v52 }
 0x3f6   : > { %2473 = vst [vmem:[%s7668_s26 + $0x40] sm:$0xff] %v2347_v53  ;;  %5442 = vmatprep.mubr.f32.mxu1 %v2347_v53  ;;  %v3148_v53 = vld [vmem:[%s9060_s11 + $0x18] sm:$0xff] }
 0x3f7   : > { %5443 = vmatmul.mubr.f32.gmra.mrb[104].mxu1 %v2352_v52  ;;  %v5870_v52 = vpack.c.bf16 %v3167_v48, %v3160_v24  ;;  %v3223_v24 = vld [vmem:[%s9060_s11 + $0x270] sm:$0xff] }
 0x3fa   : > { %v5367_v4 = vpop.f32.mrb[74].mxu1 }
 0x3fb   : > { %v2362_v25 = vadd.f32 %v5367_v4, %v7663_v11  ;;  %v2356_v38 = vpop.f32.mrb[75].mxu1  ;;  %v3155_v4 = vld [vmem:[%s9060_s11 + $0x50] sm:$0xff] }
 0x3fc   : > { %v2357_v54 = vadd.f32 %v7663_v11, %v2356_v38  ;;  %v5898_v38 = vpack.c.bf16 %v3155_v4, %v3148_v53  ;;  %v5886_v53 = vpack.c.bf16 %v3223_v24, %v3216_v22  ;;  %v3215_v4 = vld [vmem:[%s9060_s11 + $0x230] sm:$0xff] }
 0x3fd   : > { %2476 = vst [vmem:[%s7668_s26 + $0x58] sm:$0xff] %v2362_v25 }
 0x3fe   : > { %2475 = vst [vmem:[%s7668_s26 + $0x50] sm:$0xff] %v2357_v54  ;;  %5445 = vmatprep.mubr.f32.mxu1 %v2357_v54  ;;  %v3147_v54 = vld [vmem:[%s9060_s11 + $0x10] sm:$0xff]  ;;  %5899 = vmatprep.subr.bf16.mxu0 %v5898_v38  ;;  %v3230_v38 = vld [vmem:[%s9060_s11 + $0x2a8] sm:$0xff] }
 0x3ff   : > { %5446 = vmatmul.mubr.f32.gmra.mrb[106].mxu1 %v2362_v25  ;;  %v3181_v25 = vld [vmem:[%s9060_s11 + $0x120] sm:$0xff] }
 0x402   : > { %v5370_v55 = vpop.f32.mrb[76].mxu1 }
 0x403   : > { %v2372_v56 = vadd.f32 %v5370_v55, %v7663_v11  ;;  %v2366_v28 = vpop.f32.mrb[77].mxu1  ;;  %v3154_v55 = vld [vmem:[%s9060_s11 + $0x48] sm:$0xff] }
 0x404   : > { %v2367_v57 = vadd.f32 %v7663_v11, %v2366_v28  ;;  %v3162_v28 = vld [vmem:[%s9060_s11 + $0x88] sm:$0xff] }
 0x405   : > { %2478 = vst [vmem:[%s7668_s26 + $0x68] sm:$0xff] %v2372_v56 }
 0x406   : > { %2477 = vst [vmem:[%s7668_s26 + $0x60] sm:$0xff] %v2367_v57  ;;  %5448 = vmatprep.mubr.f32.mxu1 %v2367_v57  ;;  %v3169_v57 = vld [vmem:[%s9060_s11 + $0xc0] sm:$0xff] }
 0x407   : > { %5449 = vmatmul.mubr.f32.gmra.mrb[108].mxu1 %v2372_v56  ;;  %v5900_v56 = vpack.c.bf16 %v3154_v55, %v3147_v54  ;;  %v3237_v55 = vld [vmem:[%s9060_s11 + $0x2e0] sm:$0xff] }
 0x409   : > { %5901 = vmatpush1.bf16.msra.mxu0 %v5900_v56 }
 0x40a   : > { %v5373_v37 = vpop.f32.mrb[78].mxu1 }
 0x40b   : > { %v2382_v59 = vadd.f32 %v5373_v37, %v7663_v11  ;;  %v2376_v12 = vpop.f32.mrb[79].mxu1  ;;  %v3161_v37 = vld [vmem:[%s9060_s11 + $0x80] sm:$0xff] }
 0x40c   : > { %v2377_v61 = vadd.f32 %v7663_v11, %v2376_v12  ;;  %v5872_v12 = vpack.c.bf16 %v3166_v50, %v3159_v26  ;;  %v3218_v26 = vld [vmem:[%s9060_s11 + $0x248] sm:$0xff]  ;;  %v3225_v50 = vld [vmem:[%s9060_s11 + $0x280] sm:$0xff] }
 0x40d   : > { %2480 = vst [vmem:[%s7668_s26 + $0x78] sm:$0xff] %v2382_v59  ;;  %v5918_v56 = vpack.c.bf16 %v3225_v50, %v3218_v26 }
 0x40e   : > { %2479 = vst [vmem:[%s7668_s26 + $0x70] sm:$0xff] %v2377_v61  ;;  %5451 = vmatprep.mubr.f32.mxu1 %v2377_v61  ;;  %v3173_v61 = vld [vmem:[%s9060_s11 + $0xe0] sm:$0xff] }
 0x40f   : > { %5452 = vmatmul.mubr.f32.gmra.mrb[110].mxu1 %v2382_v59 }
 0x412   : > { %v5376_v40 = vpop.f32.mrb[80].mxu1 }
 0x413   : > { %v2392_v60 = vadd.f32 %v5376_v40, %v7663_v11  ;;  %v2386_v27 = vpop.f32.mrb[81].mxu1  ;;  %v3180_v40 = vld [vmem:[%s9060_s11 + $0x118] sm:$0xff] }
 0x414   : > { %v2387_v62 = vadd.f32 %v7663_v11, %v2386_v27  ;;  %v3168_v27 = vld [vmem:[%s9060_s11 + $0xb8] sm:$0xff] }
 0x415   : > { %2482 = vst [vmem:[%s7668_s26 + $0x88] sm:$0xff] %v2392_v60 }
 0x416   : > { %2481 = vst [vmem:[%s7668_s26 + $0x80] sm:$0xff] %v2387_v62  ;;  %5454 = vmatprep.mubr.f32.mxu1 %v2387_v62 }
 0x417   : > { %5455 = vmatmul.mubr.f32.gmra.mrb[112].mxu1 %v2392_v60  ;;  %v5902_v60 = vpack.c.bf16 %v3169_v57, %v3162_v28  ;;  %v3217_v28 = vld [vmem:[%s9060_s11 + $0x240] sm:$0xff]  ;;  %v3224_v57 = vld [vmem:[%s9060_s11 + $0x278] sm:$0xff] }
 0x419   : > { %5903 = vmatprep.subr.bf16.mxu0 %v5902_v60 }
 0x41a   : > { %v5379_v63 = vpop.f32.mrb[82].mxu1 }
 0x41b   : > { %v2402_v0 = vadd.f32 %v5379_v63, %v7663_v11  ;;  %v2396_v39 = vpop.f32.mrb[83].mxu1 }
 0x41c   : > { %v2397_v30 = vadd.f32 %v7663_v11, %v2396_v39  ;;  %v3188_v39 = vld [vmem:[%s9060_s11 + $0x158] sm:$0xff] }
 0x41d   : > { %2484 = vst [vmem:[%s7668_s26 + $0x98] sm:$0xff] %v2402_v0 }
 0x41e   : > { %2483 = vst [vmem:[%s7668_s26 + $0x90] sm:$0xff] %v2397_v30  ;;  %5457 = vmatprep.mubr.f32.mxu1 %v2397_v30  ;;  %v5904_v30 = vpack.c.bf16 %v3168_v27, %v3161_v37  ;;  %v3232_v37 = vld [vmem:[%s9060_s11 + $0x2b8] sm:$0xff]  ;;  %v5890_v27 = vpack.c.bf16 %v3237_v55, %v3230_v38 }
 0x41f   : > { %5458 = vmatmul.mubr.f32.gmra.mrb[114].mxu1 %v2402_v0  ;;  %v5874_v0 = vpack.c.bf16 %v3181_v25, %v3174_v35  ;;  %v3222_v25 = vld [vmem:[%s9060_s11 + $0x268] sm:$0xff] }
 0x420   : > { %5905 = vmatpush1.bf16.msra.mxu0 %v5904_v30 }
 0x422   : > { %v5382_v10 = vpop.f32.mrb[84].mxu1 }
 0x423   : > { %v2412_v1 = vadd.f32 %v5382_v10, %v7663_v11  ;;  %v2406_v42 = vpop.f32.mrb[85].mxu1  ;;  %v3176_v10 = vld [vmem:[%s9060_s11 + $0xf8] sm:$0xff] }
 0x424   : > { %v2407_v2 = vadd.f32 %v7663_v11, %v2406_v42 }
 0x425   : > { %2486 = vst [vmem:[%s7668_s26 + $0xa8] sm:$0xff] %v2412_v1 }
 0x426   : > { %2485 = vst [vmem:[%s7668_s26 + $0xa0] sm:$0xff] %v2407_v2  ;;  %5460 = vmatprep.mubr.f32.mxu1 %v2407_v2  ;;  %v3195_v2 = vld [vmem:[%s9060_s11 + $0x190] sm:$0xff] }
 0x427   : > { %5461 = vmatmul.mubr.f32.gmra.mrb[116].mxu1 %v2412_v1  ;;  %v3183_v1 = vld [vmem:[%s9060_s11 + $0x130] sm:$0xff] }
 0x42a   : > { %v5385_v5 = vpop.f32.mrb[86].mxu1 }
 0x42b   : > { %v2422_v7 = vadd.f32 %v5385_v5, %v7663_v11  ;;  %v2416_v29 = vpop.f32.mrb[87].mxu1  ;;  %v5906_v5 = vpack.c.bf16 %v3183_v1, %v3176_v10  ;;  %v3251_v10 = vld [vmem:[%s9060_s11 + $0x350] sm:$0xff] }
 0x42c   : > { %v2417_v17 = vadd.f32 %v7663_v11, %v2416_v29  ;;  %v3182_v29 = vld [vmem:[%s9060_s11 + $0x128] sm:$0xff] }
 0x42d   : > { %2488 = vst [vmem:[%s7668_s26 + $0xb8] sm:$0xff] %v2422_v7  ;;  %5907 = vmatprep.subr.bf16.mxu0 %v5906_v5 }
 0x42e   : > { %2487 = vst [vmem:[%s7668_s26 + $0xb0] sm:$0xff] %v2417_v17  ;;  %5463 = vmatprep.mubr.f32.mxu1 %v2417_v17  ;;  %v3190_v17 = vld [vmem:[%s9060_s11 + $0x168] sm:$0xff] }
 0x42f   : > { %5464 = vmatmul.mubr.f32.gmra.mrb[118].mxu1 %v2422_v7  ;;  %v3175_v7 = vld [vmem:[%s9060_s11 + $0xf0] sm:$0xff] }
 0x432   : > { %v5388_v41 = vpop.f32.mrb[88].mxu1 }
 0x433   : > { %v2432_v8 = vadd.f32 %v5388_v41, %v7663_v11  ;;  %v2426_v9 = vpop.f32.mrb[89].mxu1  ;;  %v3197_v41 = vld [vmem:[%s9060_s11 + $0x1a0] sm:$0xff] }
 0x434   : > { %v2427_v32 = vadd.f32 %v7663_v11, %v2426_v9  ;;  %v5876_v9 = vpack.c.bf16 %v3180_v40, %v3173_v61  ;;  %v5888_v61 = vpack.c.bf16 %v3222_v25, %v3215_v4 }
 0x435   : > { %2490 = vst [vmem:[%s7668_s26 + $0xc8] sm:$0xff] %v2432_v8 }
 0x436   : > { %2489 = vst [vmem:[%s7668_s26 + $0xc0] sm:$0xff] %v2427_v32  ;;  %5466 = vmatprep.mubr.f32.mxu1 %v2427_v32 }
 0x437   : > { %5467 = vmatmul.mubr.f32.gmra.mrb[120].mxu1 %v2432_v8 }
 0x43a   : > { %v5391_v44 = vpop.f32.mrb[90].mxu1 }
 0x43b   : > { %v2442_v43 = vadd.f32 %v5391_v44, %v7663_v11  ;;  %v2436_v58 = vpop.f32.mrb[91].mxu1  ;;  %v5878_v44 = vpack.c.bf16 %v3195_v2, %v3188_v39  ;;  %v3244_v39 = vld [vmem:[%s9060_s11 + $0x318] sm:$0xff]  ;;  %v3238_v2 = vld [vmem:[%s9060_s11 + $0x2e8] sm:$0xff] }
 0x43c   : > { %v2437_v3 = vadd.f32 %v7663_v11, %v2436_v58  ;;  %v3194_v58 = vld [vmem:[%s9060_s11 + $0x188] sm:$0xff] }
 0x43d   : > { %2492 = vst [vmem:[%s7668_s26 + $0xd8] sm:$0xff] %v2442_v43 }
 0x43e   : > { %2491 = vst [vmem:[%s7668_s26 + $0xd0] sm:$0xff] %v2437_v3  ;;  %5469 = vmatprep.mubr.f32.mxu1 %v2437_v3  ;;  %v3202_v3 = vld [vmem:[%s9060_s11 + $0x1c8] sm:$0xff] }
 0x43f   : > { %5470 = vmatmul.mubr.f32.gmra.mrb[122].mxu1 %v2442_v43  ;;  %v3187_v43 = vld [vmem:[%s9060_s11 + $0x150] sm:$0xff] }
 0x440   : > { %v5880_v34 = vpack.c.bf16 %v3194_v58, %v3187_v43 }
 0x442   : > { %v5394_v15 = vpop.f32.mrb[92].mxu1 }
 0x443   : > { %v2452_v46 = vadd.f32 %v5394_v15, %v7663_v11  ;;  %v2446_v47 = vpop.f32.mrb[93].mxu1  ;;  %v5908_v15 = vpack.c.bf16 %v3182_v29, %v3175_v7 }
 0x444   : > { %v2447_v13 = vadd.f32 %v7663_v11, %v2446_v47  ;;  %v5910_v47 = vpack.c.bf16 %v3197_v41, %v3190_v17  ;;  %v5894_v17 = vpack.c.bf16 %v3251_v10, %v3244_v39  ;;  %v3243_v41 = vld [vmem:[%s9060_s11 + $0x310] sm:$0xff]  ;;  %v3245_v39 = vld [vmem:[%s9060_s11 + $0x320] sm:$0xff] }
 0x445   : > { %2494 = vst [vmem:[%s7668_s26 + $0xe8] sm:$0xff] %v2452_v46  ;;  %5909 = vmatpush1.bf16.msra.mxu0 %v5908_v15 }
 0x446   : > { %2493 = vst [vmem:[%s7668_s26 + $0xe0] sm:$0xff] %v2447_v13  ;;  %5472 = vmatprep.mubr.f32.mxu1 %v2447_v13  ;;  %v3189_v13 = vld [vmem:[%s9060_s11 + $0x160] sm:$0xff]  ;;  %5911 = vmatprep.subr.bf16.mxu0 %v5910_v47 }
 0x447   : > { %5473 = vmatmul.mubr.f32.gmra.mrb[124].mxu1 %v2452_v46  ;;  %v3209_v46 = vld [vmem:[%s9060_s11 + $0x200] sm:$0xff] }
 0x448   : > { %v5882_v6 = vpack.c.bf16 %v3209_v46, %v3202_v3 }
 0x44a   : > { %v5397_v31 = vpop.f32.mrb[94].mxu1 }
 0x44b   : > { %v2462_v45 = vadd.f32 %v5397_v31, %v7663_v11  ;;  %v2456_v14 = vpop.f32.mrb[95].mxu1  ;;  %v3196_v31 = vld [vmem:[%s9060_s11 + $0x198] sm:$0xff] }
 0x44c   : > { %v2457_v16 = vadd.f32 %v7663_v11, %v2456_v14  ;;  %v3211_v14 = vld [vmem:[%s9060_s11 + $0x210] sm:$0xff]  ;;  %v5912_v33 = vpack.c.bf16 %v3196_v31, %v3189_v13 }
 0x44d   : > { %2496 = vst [vmem:[%s7668_s26 + $0xf8] sm:$0xff] %v2462_v45 }
 0x44e   : > { %2495 = vst [vmem:[%s7668_s26 + $0xf0] sm:$0xff] %v2457_v16  ;;  %5475 = vmatprep.mubr.f32.mxu1 %v2457_v16  ;;  %5913 = vmatpush1.bf16.msra.mxu0 %v5912_v33 }
 0x44f   : > { %5476 = vmatmul.mubr.f32.gmra.mrb[126].mxu1 %v2462_v45  ;;  %v3204_v45 = vld [vmem:[%s9060_s11 + $0x1d8] sm:$0xff] }
 0x450   : > { %v5914_v48 = vpack.c.bf16 %v3211_v14, %v3204_v45 }
 0x452   : > { %5915 = vmatprep.subr.bf16.mxu0 %v5914_v48 }
 0x4aa   : > { %v5432_v19 = vpop.f32.mrb[96].mxu1 }
 0x4ab   : > { %v2592_v11 = vadd.f32 %v5432_v19, %v7755_v23  ;;  %v2586_v20 = vpop.f32.mrb[97].mxu1 }
 0x4ac   : > { %v2587_v21 = vadd.f32 %v7755_v23, %v2586_v20  ;;  %v3208_v20 = vld [vmem:[%s9060_s11 + $0x1f8] sm:$0xff] }
 0x4ad   : > { %v2746_v51 = vmax.f32 %v2592_v11, 0.0  ;;  %v3201_v11 = vld [vmem:[%s9060_s11 + $0x1c0] sm:$0xff] }
 0x4ae   : > { %v2745_v36 = vmax.f32 %v2587_v21, 0.0 }
 0x4b0   : > { %5494 = vmatprep.mubr.msk.f32.mxu1 %vm2143_vm1, %v2745_v36  ;;  %v3203_v36 = vld [vmem:[%s9060_s11 + $0x1d0] sm:$0xff] }
 0x4b1   : > { %5495 = vmatmul.mubr.msk.f32.vlgmr.msra.gmra.mrb[128].mxu1 %vm2143_vm1, %v2746_v51 }
 0x4b2   : > { %v5435_v59 = vpop.f32.mrb[98].mxu1  ;;  %5869 = vmatpush1.bf16.msra.mxu1 %v5868_v49  ;;  %v3210_v49 = vld [vmem:[%s9060_s11 + $0x208] sm:$0xff] }
 0x4b3   : > { %v2602_v62 = vadd.f32 %v5435_v59, %v7755_v23  ;;  %v2596_v63 = vpop.f32.mrb[99].mxu1  ;;  %5871 = vmatprep.subr.bf16.mxu1 %v5870_v52  ;;  %v5884_v52 = vpack.c.bf16 %v3208_v20, %v3201_v11  ;;  %v5916_v54 = vpack.c.bf16 %v3210_v49, %v3203_v36  ;;  %v3239_v59 = vld [vmem:[%s9060_s11 + $0x2f0] sm:$0xff] }
 0x4b4   : > { %v2597_v42 = vadd.f32 %v7755_v23, %v2596_v63  ;;  %v3236_v63 = vld [vmem:[%s9060_s11 + $0x2d8] sm:$0xff]  ;;  %v5922_v1 = vpack.c.bf16 %v3239_v59, %v3232_v37 }
 0x4b5   : > { %v2748_v32 = vmax.f32 %v2602_v62, 0.0  ;;  %v3229_v62 = vld [vmem:[%s9060_s11 + $0x2a0] sm:$0xff]  ;;  %5917 = vmatpush1.bf16.msra.mxu0 %v5916_v54 }
 0x4b6   : > { %v2747_v8 = vmax.f32 %v2597_v42, 0.0  ;;  %5873 = vmatpush1.bf16.msra.mxu1 %v5872_v12  ;;  %5919 = vmatprep.subr.bf16.mxu0 %v5918_v56  ;;  %v3231_v42 = vld [vmem:[%s9060_s11 + $0x2b0] sm:$0xff]  ;;  %v5892_v7 = vpack.c.bf16 %v3236_v63, %v3229_v62  ;;  %v3253_v62 = vld [vmem:[%s9060_s11 + $0x360] sm:$0xff] }
 0x4b7   : > { %5875 = vmatprep.subr.bf16.mxu1 %v5874_v0  ;;  %v5920_v0 = vpack.c.bf16 %v3224_v57, %v3217_v28 }
 0x4b8   : > { %5497 = vmatprep.mubr.msk.f32.mxu1 %vm2143_vm1, %v2747_v8  ;;  %v3250_v8 = vld [vmem:[%s9060_s11 + $0x348] sm:$0xff] }
 0x4b9   : > { %5498 = vmatmul.mubr.msk.f32.gmra.mrb[130].mxu1 %vm2143_vm1, %v2748_v32  ;;  %5921 = vmatpush1.bf16.msra.mxu0 %v5920_v0 }
 0x4ba   : > { %v5438_v16 = vpop.f32.mrb[100].mxu1  ;;  %5877 = vmatpush1.bf16.msra.mxu1 %v5876_v9  ;;  %v5924_v9 = vpack.c.bf16 %v3238_v2, %v3231_v42  ;;  %5923 = vmatprep.subr.bf16.mxu0 %v5922_v1  ;;  %v6639_v2 = vmov 0.0  }
 0x4bb   : > { %v2612_v18 = vadd.f32 %v5438_v16, %v7755_v23  ;;  %v2606_v19 = vpop.f32.mrb[101].mxu1  ;;  %5879 = vmatprep.subr.bf16.mxu1 %v5878_v44  ;;  %v5896_v44 = vpack.c.bf16 %v3250_v8, %v3243_v41  ;;  %3615 = vmatprep.mubr.f32.mxu0 %v6639_v2 }
 0x4bc   : > { %v2607_v21 = vadd.f32 %v7755_v23, %v2606_v19 }
 0x4bd   : > { %v2750_v35 = vmax.f32 %v2612_v18, 0.0  ;;  %5925 = vmatpush1.bf16.msra.mxu0 %v5924_v9 }
 0x4be   : > { %v2749_v51 = vmax.f32 %v2607_v21, 0.0  ;;  %5881 = vmatpush1.bf16.msra.mxu1 %v5880_v34 }
 0x4bf   : > { %5883 = vmatprep.subr.bf16.mxu1 %v5882_v6 }
 0x4c0   : > { %5500 = vmatprep.mubr.msk.f32.mxu1 %vm2143_vm1, %v2749_v51 }
 0x4c1   : > { %5501 = vmatmul.mubr.msk.f32.gmra.mrb[132].mxu1 %vm2143_vm1, %v2750_v35 }
 0x4c2   : > { %v5441_v12 = vpop.f32.mrb[102].mxu1  ;;  %5885 = vmatpush1.bf16.msra.mxu1 %v5884_v52 }
 0x4c3   : > { %v2622_v40 = vadd.f32 %v5441_v12, %v7755_v23  ;;  %v2616_v60 = vpop.f32.mrb[103].mxu1  ;;  %5887 = vmatprep.subr.bf16.mxu1 %v5886_v53 }
 0x4c4   : > { %v2617_v30 = vadd.f32 %v7755_v23, %v2616_v60 }
 0x4c5   : > { %v2752_v29 = vmax.f32 %v2622_v40, 0.0 }
 0x4c6   : > { %v2751_v5 = vmax.f32 %v2617_v30, 0.0  ;;  %5889 = vmatpush1.bf16.msra.mxu1 %v5888_v61  ;;  %v3252_v30 = vld [vmem:[%s9060_s11 + $0x358] sm:$0xff] }
 0x4c7   : > { %5891 = vmatprep.subr.bf16.mxu1 %v5890_v27  ;;  %v3246_v27 = vld [vmem:[%s9060_s11 + $0x328] sm:$0xff]  ;;  %v5928_v10 = vpack.c.bf16 %v3252_v30, %v3245_v39  ;;  %v3192_v30 = vld [vmem:[%s9060_s11 + $0x178] sm:$0xff] }
 0x4c8   : > { %5503 = vmatprep.mubr.msk.f32.mxu1 %vm2143_vm1, %v2751_v5  ;;  %v5926_v0 = vpack.c.bf16 %v3253_v62, %v3246_v27  ;;  %v3184_v62 = vld [vmem:[%s9060_s11 + $0x138] sm:$0xff] }
 0x4c9   : > { %5504 = vmatmul.mubr.msk.f32.gmra.mrb[134].mxu1 %vm2143_vm1, %v2752_v29  ;;  %v3157_v29 = vld [vmem:[%s9060_s11 + $0x60] sm:$0xff] }
 0x4ca   : > { %v5444_v32 = vpop.f32.mrb[104].mxu1  ;;  %5893 = vmatpush1.bf16.msra.mxu1 %v5892_v7  ;;  %5927 = vmatprep.subr.bf16.mxu0 %v5926_v0  ;;  %v3150_v7 = vld [vmem:[%s9060_s11 + $0x28] sm:$0xff] }
 0x4cb   : > { %v2632_v43 = vadd.f32 %v5444_v32, %v7755_v23  ;;  %v2626_v58 = vpop.f32.mrb[105].mxu1  ;;  %5895 = vmatprep.subr.bf16.mxu1 %v5894_v17  ;;  %5929 = vmatpush1.bf16.msra.mxu0 %v5928_v10  ;;  %v5930_v8 = vpack.c.bf16 %v3157_v29, %v3150_v7  ;;  %v3186_v0 = vld [vmem:[%s9060_s11 + $0x148] sm:$0xff]  ;;  %v3199_v10 = vld [vmem:[%s9060_s11 + $0x1b0] sm:$0xff] }
 0x4cc   : > { %v2627_v3 = vadd.f32 %v7755_v23, %v2626_v58  ;;  %v3191_v7 = vld [vmem:[%s9060_s11 + $0x170] sm:$0xff] }
 0x4cd   : > { %v2754_v46 = vmax.f32 %v2632_v43, 0.0 }
 0x4ce   : > { %v2753_v15 = vmax.f32 %v2627_v3, 0.0  ;;  %5897 = vmatpush1.bf16.msra.mxu1 %v5896_v44 }
 0x4cf   : > { %5931 = vmatprep.subr.bf16.mxu1 %v5930_v8  ;;  %v3193_v8 = vld [vmem:[%s9060_s11 + $0x180] sm:$0xff] }
 0x4d0   : > { %5506 = vmatprep.mubr.msk.f32.mxu1 %vm2143_vm1, %v2753_v15 }
 0x4d1   : > { %5507 = vmatmul.mubr.msk.f32.gmra.mrb[136].mxu1 %vm2143_vm1, %v2754_v46 }
 0x4d2   : > { %v5447_v47 = vpop.f32.mrb[106].mxu1 }
 0x4d3   : > { %v2642_v13 = vadd.f32 %v5447_v47, %v7755_v23  ;;  %v2636_v31 = vpop.f32.mrb[107].mxu1 }
 0x4d4   : > { %v2637_v45 = vadd.f32 %v7755_v23, %v2636_v31 }
 0x4d5   : > { %v2756_v16 = vmax.f32 %v2642_v13, 0.0 }
 0x4d6   : > { %v2755_v14 = vmax.f32 %v2637_v45, 0.0 }
 0x4d8   : > { %5509 = vmatprep.mubr.msk.f32.mxu1 %vm2143_vm1, %v2755_v14 }
 0x4d9   : > { %5510 = vmatmul.mubr.msk.f32.gmra.mrb[138].mxu1 %vm2143_vm1, %v2756_v16 }
 0x4da   : > { %v5450_v34 = vpop.f32.mrb[108].mxu1 }
 0x4db   : > { %v2652_v18 = vadd.f32 %v5450_v34, %v7755_v23  ;;  %v2646_v19 = vpop.f32.mrb[109].mxu1 }
 0x4dc   : > { %v2647_v6 = vadd.f32 %v7755_v23, %v2646_v19 }
 0x4dd   : > { %v2758_v20 = vmax.f32 %v2652_v18, 0.0 }
 0x4de   : > { %v2757_v11 = vmax.f32 %v2647_v6, 0.0 }
 0x4e0   : > { %5512 = vmatprep.mubr.msk.f32.mxu1 %vm2143_vm1, %v2757_v11 }
 0x4e1   : > { %5513 = vmatmul.mubr.msk.f32.gmra.mrb[140].mxu1 %vm2143_vm1, %v2758_v20 }
 0x4e2   : > { %v5453_v22 = vpop.f32.mrb[110].mxu1 }
 0x4e3   : > { %v2662_v33 = vadd.f32 %v5453_v22, %v7755_v23  ;;  %v2656_v21 = vpop.f32.mrb[111].mxu1 }
 0x4e4   : > { %v2657_v24 = vadd.f32 %v7755_v23, %v2656_v21  ;;  %v3158_v21 = vld [vmem:[%s9060_s11 + $0x68] sm:$0xff] }
 0x4e5   : > { %v2760_v36 = vmax.f32 %v2662_v33, 0.0  ;;  %v3151_v33 = vld [vmem:[%s9060_s11 + $0x30] sm:$0xff] }
 0x4e6   : > { %v2759_v48 = vmax.f32 %v2657_v24, 0.0  ;;  %v8027_v24 = vpack.c.bf16 %v3158_v21, %v3151_v33  ;;  %v3226_v21 = vld [vmem:[%s9060_s11 + $0x288] sm:$0xff] }
 0x4e8   : > { %5515 = vmatprep.mubr.msk.f32.mxu1 %vm2143_vm1, %v2759_v48  ;;  %5963 = vmatprep.subr.bf16.mxu0 %v8027_v24 }
 0x4e9   : > { %5516 = vmatmul.mubr.msk.f32.gmra.mrb[142].mxu1 %vm2143_vm1, %v2760_v36  ;;  %v3149_v36 = vld [vmem:[%s9060_s11 + $0x20] sm:$0xff] }
 0x4ea   : > { %v5456_v49 = vpop.f32.mrb[112].mxu1 }
 0x4eb   : > { %v2672_v26 = vadd.f32 %v5456_v49, %v7755_v23  ;;  %v2666_v50 = vpop.f32.mrb[113].mxu1  ;;  %v3156_v49 = vld [vmem:[%s9060_s11 + $0x58] sm:$0xff] }
 0x4ec   : > { %v2667_v51 = vadd.f32 %v7755_v23, %v2666_v50  ;;  %v3164_v50 = vld [vmem:[%s9060_s11 + $0x98] sm:$0xff] }
 0x4ed   : > { %v2762_v35 = vmax.f32 %v2672_v26, 0.0 }
 0x4ee   : > { %v2761_v52 = vmax.f32 %v2667_v51, 0.0  ;;  %v3171_v51 = vld [vmem:[%s9060_s11 + $0xd0] sm:$0xff] }
 0x4f0   : > { %5518 = vmatprep.mubr.msk.f32.mxu1 %vm2143_vm1, %v2761_v52 }
 0x4f1   : > { %5519 = vmatmul.mubr.msk.f32.gmra.mrb[144].mxu1 %vm2143_vm1, %v2762_v35  ;;  %v5932_v35 = vpack.c.bf16 %v3156_v49, %v3149_v36  ;;  %v3228_v36 = vld [vmem:[%s9060_s11 + $0x298] sm:$0xff]  ;;  %v3234_v49 = vld [vmem:[%s9060_s11 + $0x2c8] sm:$0xff] }
 0x4f2   : > { %v5459_v53 = vpop.f32.mrb[114].mxu1 }
 0x4f3   : > { %v2682_v4 = vadd.f32 %v5459_v53, %v7755_v23  ;;  %v2676_v25 = vpop.f32.mrb[115].mxu1 }
 0x4f4   : > { %v2677_v38 = vadd.f32 %v7755_v23, %v2676_v25  ;;  %v5934_v25 = vpack.c.bf16 %v3171_v51, %v3164_v50 }
 0x4f5   : > { %v2764_v55 = vmax.f32 %v2682_v4, 0.0 }
 0x4f6   : > { %v2763_v54 = vmax.f32 %v2677_v38, 0.0  ;;  %v3163_v38 = vld [vmem:[%s9060_s11 + $0x90] sm:$0xff] }
 0x4f8   : > { %5521 = vmatprep.mubr.msk.f32.mxu1 %vm2143_vm1, %v2763_v54  ;;  %v3170_v54 = vld [vmem:[%s9060_s11 + $0xc8] sm:$0xff] }
 0x4f9   : > { %5522 = vmatmul.mubr.msk.f32.gmra.mrb[146].mxu1 %vm2143_vm1, %v2764_v55  ;;  %v3165_v55 = vld [vmem:[%s9060_s11 + $0xa0] sm:$0xff] }
 0x4fa   : > { %v5462_v56 = vpop.f32.mrb[116].mxu1 }
 0x4fb   : > { %v2692_v28 = vadd.f32 %v5462_v56, %v7755_v23  ;;  %v2686_v57 = vpop.f32.mrb[117].mxu1  ;;  %v3172_v56 = vld [vmem:[%s9060_s11 + $0xd8] sm:$0xff] }
 0x4fc   : > { %v2687_v37 = vadd.f32 %v7755_v23, %v2686_v57  ;;  %v3185_v57 = vld [vmem:[%s9060_s11 + $0x140] sm:$0xff] }
 0x4fd   : > { %v2766_v12 = vmax.f32 %v2692_v28, 0.0  ;;  %v3178_v28 = vld [vmem:[%s9060_s11 + $0x108] sm:$0xff] }
 0x4fe   : > { %v2765_v59 = vmax.f32 %v2687_v37, 0.0  ;;  %v5938_v27 = vpack.c.bf16 %v3185_v57, %v3178_v28  ;;  %v3248_v57 = vld [vmem:[%s9060_s11 + $0x338] sm:$0xff] }
 0x500   : > { %5524 = vmatprep.mubr.msk.f32.mxu1 %vm2143_vm1, %v2765_v59 }
 0x501   : > { %5525 = vmatmul.mubr.msk.f32.gmra.mrb[148].mxu1 %vm2143_vm1, %v2766_v12  ;;  %v5936_v12 = vpack.c.bf16 %v3170_v54, %v3163_v38  ;;  %v3240_v54 = vld [vmem:[%s9060_s11 + $0x2f8] sm:$0xff] }
 0x502   : > { %v5465_v61 = vpop.f32.mrb[118].mxu1 }
 0x503   : > { %v2702_v40 = vadd.f32 %v5465_v61, %v7755_v23  ;;  %v2696_v60 = vpop.f32.mrb[119].mxu1  ;;  %v3177_v61 = vld [vmem:[%s9060_s11 + $0x100] sm:$0xff] }
 0x504   : > { %v2697_v63 = vadd.f32 %v7755_v23, %v2696_v60 }
 0x505   : > { %v2768_v42 = vmax.f32 %v2702_v40, 0.0  ;;  %v8078_v40 = vpack.c.bf16 %v3172_v56, %v3165_v55  ;;  %v3235_v55 = vld [vmem:[%s9060_s11 + $0x2d0] sm:$0xff]  ;;  %v3242_v56 = vld [vmem:[%s9060_s11 + $0x308] sm:$0xff] }
 0x506   : > { %v2767_v1 = vmax.f32 %v2697_v63, 0.0  ;;  %v3179_v63 = vld [vmem:[%s9060_s11 + $0x110] sm:$0xff] }
 0x507   : > { %v8108_v29 = vpack.c.bf16 %v3186_v0, %v3179_v63  ;;  %v3254_v0 = vld [vmem:[%s9060_s11 + $0x368] sm:$0xff] }
 0x508   : > { %5527 = vmatprep.mubr.msk.f32.mxu1 %vm2143_vm1, %v2767_v1 }
 0x509   : > { %5528 = vmatmul.mubr.msk.f32.gmra.mrb[150].mxu1 %vm2143_vm1, %v2768_v42 }
 0x50a   : > { %v5468_v5 = vpop.f32.mrb[120].mxu1 }
 0x50b   : > { %v2712_v17 = vadd.f32 %v5468_v5, %v7755_v23  ;;  %v2706_v41 = vpop.f32.mrb[121].mxu1  ;;  %v5940_v5 = vpack.c.bf16 %v3184_v62, %v3177_v61  ;;  %v8224_v62 = vpack.c.bf16 %v3242_v56, %v3235_v55 }
 0x50c   : > { %v2707_v9 = vadd.f32 %v7755_v23, %v2706_v41  ;;  %v3198_v41 = vld [vmem:[%s9060_s11 + $0x1a8] sm:$0xff] }
 0x50d   : > { %v2770_v44 = vmax.f32 %v2712_v17, 0.0  ;;  %v5942_v17 = vpack.c.bf16 %v3199_v10, %v3192_v30  ;;  %v3256_v30 = vld [vmem:[%s9060_s11 + $0x378] sm:$0xff] }
 0x50e   : > { %v2769_v32 = vmax.f32 %v2707_v9, 0.0  ;;  %v3200_v9 = vld [vmem:[%s9060_s11 + $0x1b8] sm:$0xff] }
 0x510   : > { %5530 = vmatprep.mubr.msk.f32.mxu1 %vm2143_vm1, %v2769_v32  ;;  %v3206_v32 = vld [vmem:[%s9060_s11 + $0x1e8] sm:$0xff] }
 0x511   : > { %5531 = vmatmul.mubr.msk.f32.gmra.mrb[152].mxu1 %vm2143_vm1, %v2770_v44  ;;  %v3213_v44 = vld [vmem:[%s9060_s11 + $0x220] sm:$0xff] }
 0x512   : > { %v5471_v43 = vpop.f32.mrb[122].mxu1 }
 0x513   : > { %v2722_v58 = vadd.f32 %v5471_v43, %v7755_v23  ;;  %v2716_v3 = vpop.f32.mrb[123].mxu1 }
 0x514   : > { %v2717_v15 = vadd.f32 %v7755_v23, %v2716_v3  ;;  %v5944_v3 = vpack.c.bf16 %v3198_v41, %v3191_v7 }
 0x515   : > { %v2772_v47 = vmax.f32 %v2722_v58, 0.0 }
 0x516   : > { %v2771_v46 = vmax.f32 %v2717_v15, 0.0  ;;  %v3205_v15 = vld [vmem:[%s9060_s11 + $0x1e0] sm:$0xff] }
 0x518   : > { %5533 = vmatprep.mubr.msk.f32.mxu1 %vm2143_vm1, %v2771_v46  ;;  %v8136_v46 = vpack.c.bf16 %v3200_v9, %v3193_v8 }
 0x519   : > { %5534 = vmatmul.mubr.msk.f32.gmra.mrb[154].mxu1 %vm2143_vm1, %v2772_v47 }
 0x51a   : > { %v5474_v13 = vpop.f32.mrb[124].mxu1 }
 0x51b   : > { %v2732_v31 = vadd.f32 %v5474_v13, %v7755_v23  ;;  %v2726_v45 = vpop.f32.mrb[125].mxu1  ;;  %v5946_v13 = vpack.c.bf16 %v3213_v44, %v3206_v32 }
 0x51c   : > { %v2727_v14 = vadd.f32 %v7755_v23, %v2726_v45  ;;  %v3207_v45 = vld [vmem:[%s9060_s11 + $0x1f0] sm:$0xff] }
 0x51d   : > { %v2774_v34 = vmax.f32 %v2732_v31, 0.0  ;;  %v3212_v31 = vld [vmem:[%s9060_s11 + $0x218] sm:$0xff] }
 0x51e   : > { %v2773_v16 = vmax.f32 %v2727_v14, 0.0  ;;  %v3214_v14 = vld [vmem:[%s9060_s11 + $0x228] sm:$0xff] }
 0x520   : > { %5536 = vmatprep.mubr.msk.f32.mxu1 %vm2143_vm1, %v2773_v16 }
 0x521   : > { %5537 = vmatmul.mubr.msk.f32.gmra.mrb[156].mxu1 %vm2143_vm1, %v2774_v34  ;;  %v3220_v34 = vld [vmem:[%s9060_s11 + $0x258] sm:$0xff] }
 0x522   : > { %v5477_v18 = vpop.f32.mrb[126].mxu1 }
 0x523   : > { %v2742_v19 = vadd.f32 %v5477_v18, %v7755_v23  ;;  %v2736_v6 = vpop.f32.mrb[127].mxu1  ;;  %v3227_v18 = vld [vmem:[%s9060_s11 + $0x290] sm:$0xff] }
 0x524   : > { %v2737_v11 = vadd.f32 %v7755_v23, %v2736_v6  ;;  %v8033_v23 = vld [vmem:[%s9059_s10] ss:$0 sm:$0xff]  ;;  %v5950_v33 = vpack.c.bf16 %v3227_v18, %v3220_v34 }
 0x525   : > { %v2776_v22 = vmax.f32 %v2742_v19, 0.0 }
 0x526   : > { %v2775_v20 = vmax.f32 %v2737_v11, 0.0  ;;  %v5948_v11 = vpack.c.bf16 %v3212_v31, %v3205_v15 }
 0x528   : > { %5539 = vmatprep.mubr.msk.f32.mxu1 %vm2143_vm1, %v2775_v20  ;;  %v3219_v20 = vld [vmem:[%s9060_s11 + $0x250] sm:$0xff] }
 0x529   : > { %5540 = vmatmul.mubr.msk.f32.gmra.mrb[158].mxu1 %vm2143_vm1, %v2776_v22  ;;  %v8166_v22 = vpack.c.bf16 %v3214_v14, %v3207_v45 }
 0x52a   : > { %3358 = vmatprep.mubr.f32.mxu1 %v6639_v2 }
 0x584   : > { %v5496_v48 = vpop.f32.mrb[128].mxu1 }
 0x585   : > { %v2954_v26 = vpop.f32.mrb[129].mxu1  ;;  %v2960_v53 = vadd.f32 %v5496_v48, %v8033_v23  ;;  %v3221_v48 = vld [vmem:[%s9060_s11 + $0x260] sm:$0xff] }
 0x586   : > { %v2955_v52 = vadd.f32 %v8033_v23, %v2954_v26  ;;  %v3241_v26 = vld [vmem:[%s9060_s11 + $0x300] sm:$0xff] }
 0x587   : > { %v8072_v37 = vmax.f32 %v2960_v53, 0.0  ;;  %v8194_v53 = vpack.c.bf16 %v3228_v36, %v3221_v48  ;;  %v5954_v38 = vpack.c.bf16 %v3241_v26, %v3234_v49 }
 0x588   : > { %v8049_v4 = vmax.f32 %v2955_v52, 0.0  ;;  %v5952_v52 = vpack.c.bf16 %v3226_v21, %v3219_v20 }
 0x58a   : > { %3359 = vmatmul.mubr.f32.vlgmr.msra.gmra.mrb[160].mxu1 %v8049_v4  ;;  %3616 = vmatmul.mubr.f32.vlgmr.msra.gmra.mrb[64].mxu0 %v8049_v4 }
 0x58b   : > { %5933 = vmatpush1.bf16.msra.mxu1 %v5932_v35  ;;  %3364 = vmatprep.mubr.f32.mxu1 %v6639_v2  ;;  %v3233_v35 = vld [vmem:[%s9060_s11 + $0x2c0] sm:$0xff] }
 0x58c   : > { %v5499_v59 = vpop.f32.mrb[130].mxu1  ;;  %3621 = vmatprep.mubr.f32.mxu0 %v6639_v2  ;;  %5935 = vmatprep.subr.bf16.mxu1 %v5934_v25 }
 0x58d   : > { %v2964_v60 = vpop.f32.mrb[131].mxu1  ;;  %5965 = vmatpush3.bf16.msra.mxu0 %v8027_v24  ;;  %v2970_v1 = vadd.f32 %v5499_v59, %v8033_v23  ;;  %v3255_v59 = vld [vmem:[%s9060_s11 + $0x370] sm:$0xff] }
 0x58e   : > { %v2965_v39 = vadd.f32 %v8033_v23, %v2964_v60  ;;  %3365 = vmatmul.mubr.f32.gmra.mrb[162].mxu1 %v8072_v37  ;;  %3622 = vmatmul.mubr.f32.gmra.mrb[66].mxu0 %v8072_v37  ;;  %v5956_v60 = vpack.c.bf16 %v3240_v54, %v3233_v35  ;;  %v5958_v63 = vpack.c.bf16 %v3255_v59, %v3248_v57 }
 0x58f   : > { %3370 = vmatprep.mubr.f32.mxu1 %v6639_v2  ;;  %3627 = vmatprep.mubr.f32.mxu0 %v6639_v2  ;;  %v8130_v43 = vmax.f32 %v2970_v1, 0.0 }
 0x590   : > { %v8102_v42 = vmax.f32 %v2965_v39, 0.0  ;;  %5937 = vmatpush1.bf16.msra.mxu1 %v5936_v12  ;;  %5967 = vmatprep.subr.bf16.mxu0 %v8078_v40  ;;  %v3249_v39 = vld [vmem:[%s9060_s11 + $0x340] sm:$0xff] }
 0x591   : > { %5939 = vmatprep.subr.bf16.mxu1 %v5938_v27  ;;  %5969 = vmatpush3.bf16.msra.mxu0 %v8078_v40  ;;  %v3247_v27 = vld [vmem:[%s9060_s11 + $0x330] sm:$0xff]  ;;  %v8243_v7 = vpack.c.bf16 %v3256_v30, %v3249_v39 }
 0x592   : > { %3371 = vmatmul.mubr.f32.gmra.mrb[164].mxu1 %v8102_v42  ;;  %3628 = vmatmul.mubr.f32.gmra.mrb[68].mxu0 %v8102_v42 }
 0x593   : > { %3376 = vmatprep.mubr.f32.mxu1 %v6639_v2  ;;  %3633 = vmatprep.mubr.f32.mxu0 %v6639_v2 }
 0x594   : > { %v5502_v58 = vpop.f32.mrb[132].mxu1  ;;  %5941 = vmatpush1.bf16.msra.mxu1 %v5940_v5  ;;  %5971 = vmatprep.subr.bf16.mxu0 %v8108_v29  ;;  %v5960_v5 = vpack.c.bf16 %v3254_v0, %v3247_v27 }
 0x595   : > { %v2974_v47 = vpop.f32.mrb[133].mxu1  ;;  %5943 = vmatprep.subr.bf16.mxu1 %v5942_v17  ;;  %5973 = vmatpush3.bf16.msra.mxu0 %v8108_v29  ;;  %v2980_v19 = vadd.f32 %v5502_v58, %v8033_v23 }
 0x596   : > { %v2975_v16 = vadd.f32 %v8033_v23, %v2974_v47  ;;  %3377 = vmatmul.mubr.f32.gmra.mrb[166].mxu1 %v8130_v43  ;;  %3634 = vmatmul.mubr.f32.gmra.mrb[70].mxu0 %v8130_v43 }
 0x597   : > { %3382 = vmatprep.mubr.f32.mxu1 %v6639_v2  ;;  %3639 = vmatprep.mubr.f32.mxu0 %v6639_v2  ;;  %v8188_v50 = vmax.f32 %v2980_v19, 0.0 }
 0x598   : > { %v8160_v6 = vmax.f32 %v2975_v16, 0.0  ;;  %5945 = vmatpush1.bf16.msra.mxu1 %v5944_v3  ;;  %5975 = vmatprep.subr.bf16.mxu0 %v8136_v46 }
 0x599   : > { %5947 = vmatprep.subr.bf16.mxu1 %v5946_v13  ;;  %5977 = vmatpush3.bf16.msra.mxu0 %v8136_v46 }
 0x59a   : > { %3383 = vmatmul.mubr.f32.gmra.mrb[168].mxu1 %v8160_v6  ;;  %3640 = vmatmul.mubr.f32.gmra.mrb[72].mxu0 %v8160_v6 }
 0x59b   : > { %3388 = vmatprep.mubr.f32.mxu1 %v6639_v2  ;;  %3645 = vmatprep.mubr.f32.mxu0 %v6639_v2 }
 0x59c   : > { %v5505_v51 = vpop.f32.mrb[134].mxu1  ;;  %5949 = vmatpush1.bf16.msra.mxu1 %v5948_v11  ;;  %5979 = vmatprep.subr.bf16.mxu0 %v8166_v22 }
 0x59d   : > { %v2984_v25 = vpop.f32.mrb[135].mxu1  ;;  %5951 = vmatprep.subr.bf16.mxu1 %v5950_v33  ;;  %5981 = vmatpush3.bf16.msra.mxu0 %v8166_v22  ;;  %v2990_v12 = vadd.f32 %v5505_v51, %v8033_v23 }
 0x59e   : > { %v2985_v28 = vadd.f32 %v8033_v23, %v2984_v25  ;;  %3389 = vmatmul.mubr.f32.gmra.mrb[170].mxu1 %v8188_v50  ;;  %3646 = vmatmul.mubr.f32.gmra.mrb[74].mxu0 %v8188_v50 }
 0x59f   : > { %3394 = vmatprep.mubr.f32.mxu1 %v6639_v2  ;;  %3651 = vmatprep.mubr.f32.mxu0 %v6639_v2  ;;  %v8240_v10 = vmax.f32 %v2990_v12, 0.0 }
 0x5a0   : > { %v8218_v61 = vmax.f32 %v2985_v28, 0.0  ;;  %5953 = vmatpush1.bf16.msra.mxu1 %v5952_v52  ;;  %5983 = vmatprep.subr.bf16.mxu0 %v8194_v53 }
 0x5a1   : > { %5955 = vmatprep.subr.bf16.mxu1 %v5954_v38  ;;  %5985 = vmatpush3.bf16.msra.mxu0 %v8194_v53 }
 0x5a2   : > { %3395 = vmatmul.mubr.f32.gmra.mrb[172].mxu1 %v8218_v61  ;;  %3652 = vmatmul.mubr.f32.gmra.mrb[76].mxu0 %v8218_v61 }
 0x5a3   : > { %3400 = vmatprep.mubr.f32.mxu1 %v6639_v2  ;;  %3657 = vmatprep.mubr.f32.mxu0 %v6639_v2 }
 0x5a4   : > { %v5508_v1 = vpop.f32.mrb[136].mxu1  ;;  %5957 = vmatpush1.bf16.msra.mxu1 %v5956_v60  ;;  %5987 = vmatprep.subr.bf16.mxu0 %v8224_v62 }
 0x5a5   : > { %v2994_v17 = vpop.f32.mrb[137].mxu1  ;;  %5959 = vmatprep.subr.bf16.mxu1 %v5958_v63  ;;  %5989 = vmatpush3.bf16.msra.mxu0 %v8224_v62  ;;  %v3000_v8 = vadd.f32 %v5508_v1, %v8033_v23 }
 0x5a6   : > { %v2995_v41 = vadd.f32 %v8033_v23, %v2994_v17  ;;  %3401 = vmatmul.mubr.f32.gmra.mrb[174].mxu1 %v8240_v10  ;;  %3658 = vmatmul.mubr.f32.gmra.mrb[78].mxu0 %v8240_v10 }
 0x5a7   : > { %3406 = vmatprep.mubr.f32.mxu1 %v6639_v2  ;;  %3663 = vmatprep.mubr.f32.mxu0 %v6639_v2  ;;  %v8261_v32 = vmax.f32 %v3000_v8, 0.0 }
 0x5a8   : > { %v8252_v9 = vmax.f32 %v2995_v41, 0.0  ;;  %5961 = vmatpush1.bf16.msra.mxu1 %v5960_v5  ;;  %5991 = vmatprep.subr.bf16.mxu0 %v8243_v7 }
 0x5a9   : > { %5993 = vmatpush3.bf16.msra.mxu0 %v8243_v7  ;;  %5994 = vmatprep.subr.bf16.mxu1 %v8027_v24 }
 0x5aa   : > { %3407 = vmatmul.mubr.f32.gmra.mrb[176].mxu1 %v8252_v9  ;;  %3664 = vmatmul.mubr.f32.gmra.mrb[80].mxu0 %v8252_v9 }
 0x5ab   : > { %3412 = vmatprep.mubr.f32.mxu1 %v6639_v2  ;;  %3669 = vmatprep.mubr.f32.mxu0 %v6639_v2 }
 0x5ac   : > { %v5511_v44 = vpop.f32.mrb[138].mxu1 }
 0x5ad   : > { %v3004_v58 = vpop.f32.mrb[139].mxu1  ;;  %v3010_v15 = vadd.f32 %v5511_v44, %v8033_v23 }
 0x5ae   : > { %v3005_v3 = vadd.f32 %v8033_v23, %v3004_v58  ;;  %3413 = vmatmul.mubr.f32.gmra.mrb[178].mxu1 %v8261_v32  ;;  %3670 = vmatmul.mubr.f32.gmra.mrb[82].mxu0 %v8261_v32 }
 0x5af   : > { %3418 = vmatprep.mubr.f32.mxu1 %v6639_v2  ;;  %3675 = vmatprep.mubr.f32.mxu0 %v6639_v2  ;;  %v8275_v13 = vmax.f32 %v3010_v15, 0.0 }
 0x5b0   : > { %v8269_v47 = vmax.f32 %v3005_v3, 0.0 }
 0x5b2   : > { %3419 = vmatmul.mubr.f32.gmra.mrb[180].mxu1 %v8269_v47  ;;  %3676 = vmatmul.mubr.f32.gmra.mrb[84].mxu0 %v8269_v47 }
 0x5b3   : > { %3424 = vmatprep.mubr.f32.mxu1 %v6639_v2  ;;  %3681 = vmatprep.mubr.f32.mxu0 %v6639_v2 }
 0x5b4   : > { %v5514_v31 = vpop.f32.mrb[140].mxu1 }
 0x5b5   : > { %v3014_v45 = vpop.f32.mrb[141].mxu1  ;;  %v3020_v16 = vadd.f32 %v5514_v31, %v8033_v23 }
 0x5b6   : > { %v3015_v14 = vadd.f32 %v8033_v23, %v3014_v45  ;;  %3425 = vmatmul.mubr.f32.gmra.mrb[182].mxu1 %v8275_v13  ;;  %3682 = vmatmul.mubr.f32.gmra.mrb[86].mxu0 %v8275_v13 }
 0x5b7   : > { %3430 = vmatprep.mubr.f32.mxu1 %v6639_v2  ;;  %3687 = vmatprep.mubr.f32.mxu0 %v6639_v2  ;;  %v8289_v18 = vmax.f32 %v3020_v16, 0.0 }
 0x5b8   : > { %v8283_v34 = vmax.f32 %v3015_v14, 0.0 }
 0x5ba   : > { %3431 = vmatmul.mubr.f32.gmra.mrb[184].mxu1 %v8283_v34  ;;  %3688 = vmatmul.mubr.f32.gmra.mrb[88].mxu0 %v8283_v34 }
 0x5bb   : > { %3436 = vmatprep.mubr.f32.mxu1 %v6639_v2  ;;  %3693 = vmatprep.mubr.f32.mxu0 %v6639_v2 }
 0x5bc   : > { %v5517_v19 = vpop.f32.mrb[142].mxu1 }
 0x5bd   : > { %v3024_v11 = vpop.f32.mrb[143].mxu1  ;;  %v3030_v33 = vadd.f32 %v5517_v19, %v8033_v23 }
 0x5be   : > { %v3025_v20 = vadd.f32 %v8033_v23, %v3024_v11  ;;  %3437 = vmatmul.mubr.f32.gmra.mrb[186].mxu1 %v8289_v18  ;;  %3694 = vmatmul.mubr.f32.gmra.mrb[90].mxu0 %v8289_v18 }
 0x5bf   : > { %3442 = vmatprep.mubr.f32.mxu1 %v6639_v2  ;;  %3699 = vmatprep.mubr.f32.mxu0 %v6639_v2  ;;  %v8303_v48 = vmax.f32 %v3030_v33, 0.0 }
 0x5c0   : > { %v8297_v21 = vmax.f32 %v3025_v20, 0.0 }
 0x5c2   : > { %3443 = vmatmul.mubr.f32.gmra.mrb[188].mxu1 %v8297_v21  ;;  %3700 = vmatmul.mubr.f32.gmra.mrb[92].mxu0 %v8297_v21 }
 0x5c3   : > { %3448 = vmatprep.mubr.f32.mxu1 %v6639_v2  ;;  %3705 = vmatprep.mubr.f32.mxu0 %v6639_v2 }
 0x5c4   : > { %v5520_v36 = vpop.f32.mrb[144].mxu1 }
 0x5c5   : > { %v3034_v49 = vpop.f32.mrb[145].mxu1  ;;  %v3040_v51 = vadd.f32 %v5520_v36, %v8033_v23 }
 0x5c6   : > { %v3035_v26 = vadd.f32 %v8033_v23, %v3034_v49  ;;  %3449 = vmatmul.mubr.f32.gmra.mrb[190].mxu1 %v8303_v48  ;;  %3706 = vmatmul.mubr.f32.gmra.mrb[94].mxu0 %v8303_v48 }
 0x5c7   : > { %3454 = vmatprep.mubr.f32.mxu1 %v6639_v2  ;;  %3711 = vmatprep.mubr.f32.mxu0 %v6639_v2  ;;  %v8317_v35 = vmax.f32 %v3040_v51, 0.0 }
 0x5c8   : > { %v8311_v52 = vmax.f32 %v3035_v26, 0.0 }
 0x5ca   : > { %3455 = vmatmul.mubr.f32.gmra.mrb[192].mxu1 %v8311_v52  ;;  %3712 = vmatmul.mubr.f32.gmra.mrb[96].mxu0 %v8311_v52 }
 0x5cb   : > { %3460 = vmatprep.mubr.f32.mxu1 %v6639_v2  ;;  %3717 = vmatprep.mubr.f32.mxu0 %v6639_v2 }
 0x5cc   : > { %v5523_v25 = vpop.f32.mrb[146].mxu1 }
 0x5cd   : > { %v3044_v38 = vpop.f32.mrb[147].mxu1  ;;  %v3050_v55 = vadd.f32 %v5523_v25, %v8033_v23 }
 0x5ce   : > { %v3045_v54 = vadd.f32 %v8033_v23, %v3044_v38  ;;  %3461 = vmatmul.mubr.f32.gmra.mrb[194].mxu1 %v8317_v35  ;;  %3718 = vmatmul.mubr.f32.gmra.mrb[98].mxu0 %v8317_v35 }
 0x5cf   : > { %3466 = vmatprep.mubr.f32.mxu1 %v6639_v2  ;;  %3723 = vmatprep.mubr.f32.mxu0 %v6639_v2  ;;  %v8331_v28 = vmax.f32 %v3050_v55, 0.0 }
 0x5d0   : > { %v8325_v56 = vmax.f32 %v3045_v54, 0.0 }
 0x5d2   : > { %3467 = vmatmul.mubr.f32.gmra.mrb[196].mxu1 %v8325_v56  ;;  %3724 = vmatmul.mubr.f32.gmra.mrb[100].mxu0 %v8325_v56 }
 0x5d3   : > { %3472 = vmatprep.mubr.f32.mxu1 %v6639_v2  ;;  %3729 = vmatprep.mubr.f32.mxu0 %v6639_v2 }
 0x5d4   : > { %v5526_v57 = vpop.f32.mrb[148].mxu1 }
 0x5d5   : > { %v3054_v59 = vpop.f32.mrb[149].mxu1  ;;  %v3060_v60 = vadd.f32 %v5526_v57, %v8033_v23 }
 0x5d6   : > { %v3055_v12 = vadd.f32 %v8033_v23, %v3054_v59  ;;  %3473 = vmatmul.mubr.f32.gmra.mrb[198].mxu1 %v8331_v28  ;;  %3730 = vmatmul.mubr.f32.gmra.mrb[102].mxu0 %v8331_v28 }
 0x5d7   : > { %3478 = vmatprep.mubr.f32.mxu1 %v6639_v2  ;;  %3735 = vmatprep.mubr.f32.mxu0 %v6639_v2  ;;  %v8345_v63 = vmax.f32 %v3060_v60, 0.0 }
 0x5d8   : > { %v8339_v27 = vmax.f32 %v3055_v12, 0.0 }
 0x5da   : > { %3479 = vmatmul.mubr.f32.gmra.mrb[200].mxu1 %v8339_v27  ;;  %3736 = vmatmul.mubr.f32.gmra.mrb[104].mxu0 %v8339_v27 }
 0x5db   : > { %3484 = vmatprep.mubr.f32.mxu1 %v6639_v2  ;;  %3741 = vmatprep.mubr.f32.mxu0 %v6639_v2 }
 0x5dc   : > { %v5529_v0 = vpop.f32.mrb[150].mxu1 }
 0x5dd   : > { %v3064_v39 = vpop.f32.mrb[151].mxu1  ;;  %v3070_v1 = vadd.f32 %v5529_v0, %v8033_v23 }
 0x5de   : > { %v3065_v30 = vadd.f32 %v8033_v23, %v3064_v39  ;;  %3485 = vmatmul.mubr.f32.gmra.mrb[202].mxu1 %v8345_v63  ;;  %3742 = vmatmul.mubr.f32.gmra.mrb[106].mxu0 %v8345_v63 }
 0x5df   : > { %3490 = vmatprep.mubr.f32.mxu1 %v6639_v2  ;;  %3747 = vmatprep.mubr.f32.mxu0 %v6639_v2  ;;  %v8359_v17 = vmax.f32 %v3070_v1, 0.0 }
 0x5e0   : > { %v8353_v5 = vmax.f32 %v3065_v30, 0.0 }
 0x5e2   : > { %3491 = vmatmul.mubr.f32.gmra.mrb[204].mxu1 %v8353_v5  ;;  %3748 = vmatmul.mubr.f32.gmra.mrb[108].mxu0 %v8353_v5 }
 0x5e3   : > { %3496 = vmatprep.mubr.f32.mxu1 %v6639_v2  ;;  %3753 = vmatprep.mubr.f32.mxu0 %v6639_v2 }
 0x5e4   : > { %v5532_v41 = vpop.f32.mrb[152].mxu1 }
 0x5e5   : > { %v3074_v8 = vpop.f32.mrb[153].mxu1  ;;  %v3080_v58 = vadd.f32 %v5532_v41, %v8033_v23 }
 0x5e6   : > { %v3075_v44 = vadd.f32 %v8033_v23, %v3074_v8  ;;  %3497 = vmatmul.mubr.f32.gmra.mrb[206].mxu1 %v8359_v17  ;;  %3754 = vmatmul.mubr.f32.gmra.mrb[110].mxu0 %v8359_v17 }
 0x5e7   : > { %3502 = vmatprep.mubr.f32.mxu1 %v6639_v2  ;;  %3759 = vmatprep.mubr.f32.mxu0 %v6639_v2  ;;  %v8373_v15 = vmax.f32 %v3080_v58, 0.0 }
 0x5e8   : > { %v8367_v3 = vmax.f32 %v3075_v44, 0.0 }
 0x5ea   : > { %3503 = vmatmul.mubr.f32.gmra.mrb[208].mxu1 %v8367_v3  ;;  %3760 = vmatmul.mubr.f32.gmra.mrb[112].mxu0 %v8367_v3 }
 0x5eb   : > { %3508 = vmatprep.mubr.f32.mxu1 %v6639_v2  ;;  %3765 = vmatprep.mubr.f32.mxu0 %v6639_v2 }
 0x5ec   : > { %v5535_v31 = vpop.f32.mrb[154].mxu1 }
 0x5ed   : > { %v3084_v45 = vpop.f32.mrb[155].mxu1  ;;  %v3090_v16 = vadd.f32 %v5535_v31, %v8033_v23 }
 0x5ee   : > { %v3085_v14 = vadd.f32 %v8033_v23, %v3084_v45  ;;  %3509 = vmatmul.mubr.f32.gmra.mrb[210].mxu1 %v8373_v15  ;;  %3766 = vmatmul.mubr.f32.gmra.mrb[114].mxu0 %v8373_v15 }
 0x5ef   : > { %3514 = vmatprep.mubr.f32.mxu1 %v6639_v2  ;;  %3771 = vmatprep.mubr.f32.mxu0 %v6639_v2  ;;  %v8387_v11 = vmax.f32 %v3090_v16, 0.0 }
 0x5f0   : > { %v8381_v19 = vmax.f32 %v3085_v14, 0.0 }
 0x5f2   : > { %3515 = vmatmul.mubr.f32.gmra.mrb[212].mxu1 %v8381_v19  ;;  %3772 = vmatmul.mubr.f32.gmra.mrb[116].mxu0 %v8381_v19 }
 0x5f3   : > { %3520 = vmatprep.mubr.f32.mxu1 %v6639_v2  ;;  %3777 = vmatprep.mubr.f32.mxu0 %v6639_v2 }
 0x5f4   : > { %v5538_v20 = vpop.f32.mrb[156].mxu1 }
 0x5f5   : > { %v3094_v33 = vpop.f32.mrb[157].mxu1  ;;  %v3100_v49 = vadd.f32 %v5538_v20, %v8033_v23 }
 0x5f6   : > { %v3095_v36 = vadd.f32 %v8033_v23, %v3094_v33  ;;  %3521 = vmatmul.mubr.f32.gmra.mrb[214].mxu1 %v8387_v11  ;;  %3778 = vmatmul.mubr.f32.gmra.mrb[118].mxu0 %v8387_v11 }
 0x5f7   : > { %3526 = vmatprep.mubr.f32.mxu1 %v6639_v2  ;;  %3783 = vmatprep.mubr.f32.mxu0 %v6639_v2  ;;  %v8401_v51 = vmax.f32 %v3100_v49, 0.0 }
 0x5f8   : > { %v8395_v26 = vmax.f32 %v3095_v36, 0.0 }
 0x5fa   : > { %3527 = vmatmul.mubr.f32.gmra.mrb[216].mxu1 %v8395_v26  ;;  %3784 = vmatmul.mubr.f32.gmra.mrb[120].mxu0 %v8395_v26 }
 0x5fb   : > { %3532 = vmatprep.mubr.f32.mxu1 %v6639_v2  ;;  %3789 = vmatprep.mubr.f32.mxu0 %v6639_v2 }
 0x5fc   : > { %v5541_v25 = vpop.f32.mrb[158].mxu1 }
 0x5fd   : > { %v3104_v38 = vpop.f32.mrb[159].mxu1  ;;  %v3110_v55 = vadd.f32 %v5541_v25, %v8033_v23 }
 0x5fe   : > { %v3105_v54 = vadd.f32 %v8033_v23, %v3104_v38  ;;  %3533 = vmatmul.mubr.f32.gmra.mrb[218].mxu1 %v8401_v51  ;;  %3790 = vmatmul.mubr.f32.gmra.mrb[122].mxu0 %v8401_v51 }
 0x5ff   : > { %3538 = vmatprep.mubr.f32.mxu1 %v6639_v2  ;;  %3795 = vmatprep.mubr.f32.mxu0 %v6639_v2  ;;  %v8415_v59 = vmax.f32 %v3110_v55, 0.0 }
 0x600   : > { %v8409_v57 = vmax.f32 %v3105_v54, 0.0 }
 0x602   : > { %3539 = vmatmul.mubr.f32.gmra.mrb[220].mxu1 %v8409_v57  ;;  %3796 = vmatmul.mubr.f32.gmra.mrb[124].mxu0 %v8409_v57 }
 0x603   : > { %3544 = vmatprep.mubr.f32.mxu1 %v6639_v2  ;;  %3801 = vmatprep.mubr.f32.mxu0 %v6639_v2 }
 0x606   : > { %3545 = vmatmul.mubr.f32.gmra.mrb[222].mxu1 %v8415_v59  ;;  %3802 = vmatmul.mubr.f32.gmra.mrb[126].mxu0 %v8415_v59 }
 0x607   : > { %5574 = vmatprep.mubr.f32.mxu0 %v8049_v4  ;;  %3872 = vmatprep.mubr.f32.mxu1 %v6639_v2 }
 0x60a   : > { %3873 = vmatmul.mubr.f32.vlgmr.msra.gmra.mrb[224].mxu1 %v8049_v4  ;;  %5575 = vmatmul.mubr.f32.vlgmr.msra.gmra.mrb[128].mxu0 %v8072_v37 }
 0x60b   : > { %6002 = vmatpush3.bf16.msra.mxu1 %v8027_v24  ;;  %5577 = vmatprep.mubr.f32.mxu0 %v8102_v42  ;;  %v3259_v24 = vlaneseq }
 0x60c   : > { %3878 = vmatprep.mubr.f32.mxu1 %v6639_v2  ;;  %5995 = vmatprep.subr.bf16.mxu1 %v8078_v40 }
 0x60d   : > { %v8490_v23 = vshrl.u32 %v3259_v24, 7 }
 0x60e   : > { %3879 = vmatmul.mubr.f32.gmra.mrb[226].mxu1 %v8072_v37  ;;  %5578 = vmatmul.mubr.f32.gmra.mrb[130].mxu0 %v8130_v43 }
 0x60f   : > { %5580 = vmatprep.mubr.f32.mxu0 %v8160_v6  ;;  %3884 = vmatprep.mubr.f32.mxu1 %v6639_v2  ;;  %v3261_v4 = vsub.s32 0, %v8490_v23  ;;  %v3269_v37 = vsub.s32 2, %v8490_v23 }
 0x610   : > { %6003 = vmatpush3.bf16.msra.mxu1 %v8078_v40  ;;  %v3257_v40 = vld [vmem:[%s9061_s12] sm:$0x7f] }
 0x611   : > { %5996 = vmatprep.subr.bf16.mxu1 %v8108_v29 }
 0x612   : > { %3885 = vmatmul.mubr.f32.gmra.mrb[228].mxu1 %v8102_v42  ;;  %5581 = vmatmul.mubr.f32.gmra.mrb[132].mxu0 %v8188_v50  ;;  %v3265_v42 = vsub.s32 1, %v8490_v23 }
 0x613   : > { %5583 = vmatprep.mubr.f32.mxu0 %v8218_v61  ;;  %3890 = vmatprep.mubr.f32.mxu1 %v6639_v2 }
 0x614   : > { %6004 = vmatpush3.bf16.msra.mxu1 %v8108_v29  ;;  %v3273_v29 = vsub.s32 3, %v8490_v23 }
 0x615   : > { %5997 = vmatprep.subr.bf16.mxu1 %v8136_v46 }
 0x616   : > { %3891 = vmatmul.mubr.f32.gmra.mrb[230].mxu1 %v8130_v43  ;;  %5584 = vmatmul.mubr.f32.gmra.mrb[134].mxu0 %v8240_v10  ;;  %v8503_v43 = vrot.slane %v3257_v40, %v3261_v4 }
 0x617   : > { %5586 = vmatprep.mubr.f32.mxu0 %v8252_v9  ;;  %3896 = vmatprep.mubr.f32.mxu1 %v6639_v2 }
 0x618   : > { %6005 = vmatpush3.bf16.msra.mxu1 %v8136_v46  ;;  %v8505_v46 = vrot.slane %v3257_v40, %v3269_v37 }
 0x619   : > { %5998 = vmatprep.subr.bf16.mxu1 %v8166_v22 }
 0x61a   : > { %3897 = vmatmul.mubr.f32.gmra.mrb[232].mxu1 %v8160_v6  ;;  %5587 = vmatmul.mubr.f32.gmra.mrb[136].mxu0 %v8261_v32  ;;  %v8508_v6 = vrot.slane %v3257_v40, %v3265_v42 }
 0x61b   : > { %5589 = vmatprep.mubr.f32.mxu0 %v8269_v47  ;;  %3902 = vmatprep.mubr.f32.mxu1 %v6639_v2 }
 0x61c   : > { %6006 = vmatpush3.bf16.msra.mxu1 %v8166_v22  ;;  %v8510_v22 = vrot.slane %v3257_v40, %v3273_v29 }
 0x61d   : > { %5999 = vmatprep.subr.bf16.mxu1 %v8194_v53 }
 0x61e   : > { %3903 = vmatmul.mubr.f32.gmra.mrb[234].mxu1 %v8188_v50  ;;  %5590 = vmatmul.mubr.f32.gmra.mrb[138].mxu0 %v8275_v13 }
 0x61f   : > { %5592 = vmatprep.mubr.f32.mxu0 %v8283_v34  ;;  %3908 = vmatprep.mubr.f32.mxu1 %v6639_v2 }
 0x620   : > { %6007 = vmatpush3.bf16.msra.mxu1 %v8194_v53 }
 0x621   : > { %6000 = vmatprep.subr.bf16.mxu1 %v8224_v62 }
 0x622   : > { %3909 = vmatmul.mubr.f32.gmra.mrb[236].mxu1 %v8218_v61  ;;  %5593 = vmatmul.mubr.f32.gmra.mrb[140].mxu0 %v8289_v18 }
 0x623   : > { %5595 = vmatprep.mubr.f32.mxu0 %v8297_v21  ;;  %3914 = vmatprep.mubr.f32.mxu1 %v6639_v2 }
 0x624   : > { %6008 = vmatpush3.bf16.msra.mxu1 %v8224_v62 }
 0x625   : > { %6001 = vmatprep.subr.bf16.mxu1 %v8243_v7 }
 0x626   : > { %3915 = vmatmul.mubr.f32.gmra.mrb[238].mxu1 %v8240_v10  ;;  %5596 = vmatmul.mubr.f32.gmra.mrb[142].mxu0 %v8303_v48 }
 0x627   : > { %5598 = vmatprep.mubr.f32.mxu0 %v8311_v52  ;;  %3920 = vmatprep.mubr.f32.mxu1 %v6639_v2 }
 0x628   : > { %6009 = vmatpush3.bf16.msra.mxu1 %v8243_v7 }
 0x62a   : > { %3921 = vmatmul.mubr.f32.gmra.mrb[240].mxu1 %v8252_v9  ;;  %5599 = vmatmul.mubr.f32.gmra.mrb[144].mxu0 %v8317_v35 }
 0x62b   : > { %3926 = vmatprep.mubr.f32.mxu1 %v6639_v2 }
 0x62e   : > { %3927 = vmatmul.mubr.f32.gmra.mrb[242].mxu1 %v8261_v32 }
 0x62f   : > { %3932 = vmatprep.mubr.f32.mxu1 %v6639_v2 }
 0x632   : > { %3933 = vmatmul.mubr.f32.gmra.mrb[244].mxu1 %v8269_v47 }
 0x633   : > { %3938 = vmatprep.mubr.f32.mxu1 %v6639_v2 }
 0x636   : > { %3939 = vmatmul.mubr.f32.gmra.mrb[246].mxu1 %v8275_v13 }
 0x637   : > { %3944 = vmatprep.mubr.f32.mxu1 %v6639_v2 }
 0x63a   : > { %3945 = vmatmul.mubr.f32.gmra.mrb[248].mxu1 %v8283_v34 }
 0x63b   : > { %3950 = vmatprep.mubr.f32.mxu1 %v6639_v2 }
 0x63e   : > { %3951 = vmatmul.mubr.f32.gmra.mrb[250].mxu1 %v8289_v18 }
 0x63f   : > { %3956 = vmatprep.mubr.f32.mxu1 %v6639_v2 }
 0x642   : > { %3957 = vmatmul.mubr.f32.gmra.mrb[252].mxu1 %v8297_v21 }
 0x643   : > { %3962 = vmatprep.mubr.f32.mxu1 %v6639_v2 }
 0x646   : > { %3963 = vmatmul.mubr.f32.gmra.mrb[254].mxu1 %v8303_v48 }
 0x647   : > { %3968 = vmatprep.mubr.f32.mxu1 %v6639_v2 }
 0x64a   : > { %3969 = vmatmul.mubr.f32.gmra.mrb[0].mxu1 %v8311_v52 }
 0x64b   : > { %3974 = vmatprep.mubr.f32.mxu1 %v6639_v2 }
 0x64e   : > { %3975 = vmatmul.mubr.f32.gmra.mrb[2].mxu1 %v8317_v35 }
 0x64f   : > { %3980 = vmatprep.mubr.f32.mxu1 %v6639_v2 }
 0x652   : > { %3981 = vmatmul.mubr.f32.gmra.mrb[4].mxu1 %v8325_v56 }
 0x653   : > { %3986 = vmatprep.mubr.f32.mxu1 %v6639_v2 }
 0x656   : > { %3987 = vmatmul.mubr.f32.gmra.mrb[6].mxu1 %v8331_v28 }
 0x657   : > { %3992 = vmatprep.mubr.f32.mxu1 %v6639_v2 }
 0x65a   : > { %3993 = vmatmul.mubr.f32.gmra.mrb[8].mxu1 %v8339_v27 }
 0x65b   : > { %3998 = vmatprep.mubr.f32.mxu1 %v6639_v2 }
 0x65d   : > { %v3360_v50 = vpop.f32.mrb[160].mxu1  ;;  %v3617_v53 = vpop.f32.mrb[64].mxu0 }
 0x65e   : > { %v3361_v61 = vadd.f32 %v3360_v50, %v8503_v43  ;;  %v3618_v62 = vadd.f32 %v3617_v53, %v8505_v46  ;;  %v3362_v10 = vpop.f32.mrb[161].mxu1  ;;  %v3619_v7 = vpop.f32.mrb[65].mxu0  ;;  %3999 = vmatmul.mubr.f32.gmra.mrb[10].mxu1 %v8345_v63 }
 0x65f   : > { %v3363_v9 = vadd.f32 %v3362_v10, %v8508_v6  ;;  %v3620_v32 = vadd.f32 %v3619_v7, %v8510_v22  ;;  %4004 = vmatprep.mubr.f32.mxu1 %v6639_v2 }
 0x660   : > { %6181 = vtanh.f32 %v3361_v61 }
 0x661   : > { %6183 = vtanh.f32 %v3618_v62  ;;  %v3366_v47 = vpop.f32.mrb[162].mxu1  ;;  %v3623_v13 = vpop.f32.mrb[66].mxu0 }
 0x662   : > { %6185 = vtanh.f32 %v3363_v9  ;;  %v3367_v34 = vadd.f32 %v3366_v47, %v8503_v43  ;;  %v3624_v18 = vadd.f32 %v3623_v13, %v8505_v46  ;;  %v3368_v21 = vpop.f32.mrb[163].mxu1  ;;  %v3625_v48 = vpop.f32.mrb[67].mxu0  ;;  %4005 = vmatmul.mubr.f32.gmra.mrb[12].mxu1 %v8353_v5 }
 0x663   : > { %6187 = vtanh.f32 %v3620_v32  ;;  %v3369_v52 = vadd.f32 %v3368_v21, %v8508_v6  ;;  %v3626_v35 = vadd.f32 %v3625_v48, %v8510_v22  ;;  %4010 = vmatprep.mubr.f32.mxu1 %v6639_v2 }
 0x664   : > { %6189 = vtanh.f32 %v3367_v34 }
 0x665   : > { %6191 = vtanh.f32 %v3624_v18  ;;  %v3372_v12 = vpop.f32.mrb[164].mxu1  ;;  %v3629_v60 = vpop.f32.mrb[68].mxu0 }
 0x666   : > { %6193 = vtanh.f32 %v3369_v52  ;;  %v3373_v0 = vadd.f32 %v3372_v12, %v8503_v43  ;;  %v3630_v39 = vadd.f32 %v3629_v60, %v8505_v46  ;;  %v3374_v30 = vpop.f32.mrb[165].mxu1  ;;  %v3631_v1 = vpop.f32.mrb[69].mxu0  ;;  %4011 = vmatmul.mubr.f32.gmra.mrb[14].mxu1 %v8359_v17 }
 0x667   : > { %6195 = vtanh.f32 %v3626_v35  ;;  %v3375_v41 = vadd.f32 %v3374_v30, %v8508_v6  ;;  %v3632_v8 = vadd.f32 %v3631_v1, %v8510_v22  ;;  %4016 = vmatprep.mubr.f32.mxu1 %v6639_v2 }
 0x668   : > { %6197 = vtanh.f32 %v3373_v0 }
 0x669   : > { %6199 = vtanh.f32 %v3630_v39  ;;  %v3378_v44 = vpop.f32.mrb[166].mxu1  ;;  %v3635_v58 = vpop.f32.mrb[70].mxu0 }
 0x66a   : > { %v6182_v31 = vpop.eup %6181  ;;  %6201 = vtanh.f32 %v3375_v41  ;;  %v3379_v45 = vadd.f32 %v3378_v44, %v8503_v43  ;;  %v3636_v14 = vadd.f32 %v3635_v58, %v8505_v46  ;;  %v3380_v16 = vpop.f32.mrb[167].mxu1  ;;  %4017 = vmatmul.mubr.f32.gmra.mrb[16].mxu1 %v8367_v3 }
 0x66b   : > { %v3637_v20 = vpop.f32.mrb[71].mxu0  ;;  %v6184_v33 = vpop.eup %6183  ;;  %4514 = vst [vmem:[%s8535_s24] sm:$0xff] %v6182_v31  ;;  %6203 = vtanh.f32 %v3632_v8  ;;  %v3381_v36 = vadd.f32 %v3380_v16, %v8508_v6  ;;  %4022 = vmatprep.mubr.f32.mxu1 %v6639_v2 }
 0x66c   : > { %v3638_v49 = vadd.f32 %v3637_v20, %v8510_v22  ;;  %v6186_v25 = vpop.eup %6185  ;;  %4516 = vst [vmem:[%s8535_s24 + $0x10] sm:$0xff] %v6184_v33  ;;  %6205 = vtanh.f32 %v3379_v45 }
 0x66d   : > { %v6188_v38 = vpop.eup %6187  ;;  %4515 = vst [vmem:[%s8535_s24 + $0x8] sm:$0xff] %v6186_v25  ;;  %6207 = vtanh.f32 %v3636_v14  ;;  %v3384_v54 = vpop.f32.mrb[168].mxu1 }
 0x66e   : > { %v3641_v55 = vpop.f32.mrb[72].mxu0  ;;  %v6190_v24 = vpop.eup %6189  ;;  %4517 = vst [vmem:[%s8535_s24 + $0x18] sm:$0xff] %v6188_v38  ;;  %6209 = vtanh.f32 %v3381_v36  ;;  %v3385_v4 = vadd.f32 %v3384_v54, %v8503_v43  ;;  %4023 = vmatmul.mubr.f32.gmra.mrb[18].mxu1 %v8373_v15 }
 0x66f   : > { %v3642_v37 = vadd.f32 %v3641_v55, %v8505_v46  ;;  %v3386_v40 = vpop.f32.mrb[169].mxu1  ;;  %v3643_v42 = vpop.f32.mrb[73].mxu0  ;;  %4521 = vst [vmem:[%s8535_s24 + $0x38] sm:$0xff] %v6190_v24  ;;  %6211 = vtanh.f32 %v3638_v49  ;;  %4028 = vmatprep.mubr.f32.mxu1 %v6639_v2 }
 0x670   : > { %v6192_v29 = vpop.eup %6191  ;;  %v3387_v50 = vadd.f32 %v3386_v40, %v8508_v6  ;;  %v3644_v53 = vadd.f32 %v3643_v42, %v8510_v22  ;;  %6213 = vtanh.f32 %v3385_v4 }
 0x671   : > { %v6194_v61 = vpop.eup %6193  ;;  %4523 = vst [vmem:[%s8535_s24 + $0x48] sm:$0xff] %v6192_v29  ;;  %6215 = vtanh.f32 %v3642_v37  ;;  %v3390_v10 = vpop.f32.mrb[170].mxu1 }
 0x672   : > { %v6196_v62 = vpop.eup %6195  ;;  %4522 = vst [vmem:[%s8535_s24 + $0x40] sm:$0xff] %v6194_v61  ;;  %v3647_v7 = vpop.f32.mrb[74].mxu0  ;;  %6217 = vtanh.f32 %v3387_v50  ;;  %v3391_v32 = vadd.f32 %v3390_v10, %v8503_v43  ;;  %4029 = vmatmul.mubr.f32.gmra.mrb[20].mxu1 %v8381_v19 }
 0x673   : > { %v6198_v9 = vpop.eup %6197  ;;  %4524 = vst [vmem:[%s8535_s24 + $0x50] sm:$0xff] %v6196_v62  ;;  %v3648_v47 = vadd.f32 %v3647_v7, %v8505_v46  ;;  %v3392_v13 = vpop.f32.mrb[171].mxu1  ;;  %6219 = vtanh.f32 %v3644_v53  ;;  %4034 = vmatprep.mubr.f32.mxu1 %v6639_v2 }
 0x674   : > { %v3649_v34 = vpop.f32.mrb[75].mxu0  ;;  %v6200_v18 = vpop.eup %6199  ;;  %4528 = vst [vmem:[%s8535_s24 + $0x70] sm:$0xff] %v6198_v9  ;;  %v3393_v21 = vadd.f32 %v3392_v13, %v8508_v6  ;;  %6221 = vtanh.f32 %v3391_v32 }
 0x675   : > { %v3650_v48 = vadd.f32 %v3649_v34, %v8510_v22  ;;  %v6202_v52 = vpop.eup %6201  ;;  %4530 = vst [vmem:[%s8535_s24 + $0x80] sm:$0xff] %v6200_v18  ;;  %6223 = vtanh.f32 %v3648_v47  ;;  %v3396_v12 = vpop.f32.mrb[172].mxu1 }
 0x676   : > { %v6204_v35 = vpop.eup %6203  ;;  %4529 = vst [vmem:[%s8535_s24 + $0x78] sm:$0xff] %v6202_v52  ;;  %v3653_v60 = vpop.f32.mrb[76].mxu0  ;;  %6225 = vtanh.f32 %v3393_v21  ;;  %v3397_v39 = vadd.f32 %v3396_v12, %v8503_v43  ;;  %4035 = vmatmul.mubr.f32.gmra.mrb[22].mxu1 %v8387_v11 }
 0x677   : > { %v6206_v0 = vpop.eup %6205  ;;  %4531 = vst [vmem:[%s8535_s24 + $0x88] sm:$0xff] %v6204_v35  ;;  %v3654_v30 = vadd.f32 %v3653_v60, %v8505_v46  ;;  %v3398_v1 = vpop.f32.mrb[173].mxu1  ;;  %6227 = vtanh.f32 %v3650_v48  ;;  %4040 = vmatprep.mubr.f32.mxu1 %v6639_v2 }
 0x678   : > { %v3655_v41 = vpop.f32.mrb[77].mxu0  ;;  %v6208_v8 = vpop.eup %6207  ;;  %4535 = vst [vmem:[%s8535_s24 + $0xa8] sm:$0xff] %v6206_v0  ;;  %v3399_v44 = vadd.f32 %v3398_v1, %v8508_v6  ;;  %6229 = vtanh.f32 %v3397_v39 }
 0x679   : > { %v3656_v58 = vadd.f32 %v3655_v41, %v8510_v22  ;;  %v6210_v31 = vpop.eup %6209  ;;  %4537 = vst [vmem:[%s8535_s24 + $0xb8] sm:$0xff] %v6208_v8  ;;  %6231 = vtanh.f32 %v3654_v30  ;;  %v3402_v14 = vpop.f32.mrb[174].mxu1 }
 0x67a   : > { %v6212_v45 = vpop.eup %6211  ;;  %4536 = vst [vmem:[%s8535_s24 + $0xb0] sm:$0xff] %v6210_v31  ;;  %v3659_v16 = vpop.f32.mrb[78].mxu0  ;;  %6233 = vtanh.f32 %v3399_v44  ;;  %v3403_v33 = vadd.f32 %v3402_v14, %v8503_v43  ;;  %4041 = vmatmul.mubr.f32.gmra.mrb[24].mxu1 %v8395_v26 }
 0x67b   : > { %v6214_v20 = vpop.eup %6213  ;;  %4538 = vst [vmem:[%s8535_s24 + $0xc0] sm:$0xff] %v6212_v45  ;;  %v3660_v36 = vadd.f32 %v3659_v16, %v8505_v46  ;;  %v3404_v49 = vpop.f32.mrb[175].mxu1  ;;  %6235 = vtanh.f32 %v3656_v58  ;;  %4046 = vmatprep.mubr.f32.mxu1 %v6639_v2 }
 0x67c   : > { %v3661_v25 = vpop.f32.mrb[79].mxu0  ;;  %v6216_v38 = vpop.eup %6215  ;;  %4542 = vst [vmem:[%s8535_s24 + $0xe0] sm:$0xff] %v6214_v20  ;;  %v3405_v54 = vadd.f32 %v3404_v49, %v8508_v6  ;;  %6237 = vtanh.f32 %v3403_v33 }
 0x67d   : > { %v3662_v55 = vadd.f32 %v3661_v25, %v8510_v22  ;;  %v6218_v24 = vpop.eup %6217  ;;  %4544 = vst [vmem:[%s8535_s24 + $0xf0] sm:$0xff] %v6216_v38  ;;  %6239 = vtanh.f32 %v3660_v36  ;;  %v3408_v37 = vpop.f32.mrb[176].mxu1 }
 0x67e   : > { %v6220_v4 = vpop.eup %6219  ;;  %4543 = vst [vmem:[%s8535_s24 + $0xe8] sm:$0xff] %v6218_v24  ;;  %v3665_v40 = vpop.f32.mrb[80].mxu0  ;;  %6241 = vtanh.f32 %v3405_v54  ;;  %v3409_v29 = vadd.f32 %v3408_v37, %v8503_v43  ;;  %4047 = vmatmul.mubr.f32.gmra.mrb[26].mxu1 %v8401_v51 }
 0x67f   : > { %v6222_v42 = vpop.eup %6221  ;;  %4545 = vst [vmem:[%s8535_s24 + $0xf8] sm:$0xff] %v6220_v4  ;;  %v3666_v50 = vadd.f32 %v3665_v40, %v8505_v46  ;;  %v3410_v53 = vpop.f32.mrb[177].mxu1  ;;  %6243 = vtanh.f32 %v3662_v55  ;;  %4052 = vmatprep.mubr.f32.mxu1 %v6639_v2 }
 0x680   : > { %v3667_v61 = vpop.f32.mrb[81].mxu0  ;;  %v6224_v62 = vpop.eup %6223  ;;  %4549 = vst [vmem:[%s8535_s24 + $0x118] sm:$0xff] %v6222_v42  ;;  %v3411_v10 = vadd.f32 %v3410_v53, %v8508_v6  ;;  %6245 = vtanh.f32 %v3409_v29 }
 0x681   : > { %v3668_v7 = vadd.f32 %v3667_v61, %v8510_v22  ;;  %v6226_v9 = vpop.eup %6225  ;;  %4551 = vst [vmem:[%s8535_s24 + $0x128] sm:$0xff] %v6224_v62  ;;  %6247 = vtanh.f32 %v3666_v50  ;;  %v3414_v47 = vpop.f32.mrb[178].mxu1 }
 0x682   : > { %v6228_v32 = vpop.eup %6227  ;;  %4550 = vst [vmem:[%s8535_s24 + $0x120] sm:$0xff] %v6226_v9  ;;  %v3671_v13 = vpop.f32.mrb[82].mxu0  ;;  %6249 = vtanh.f32 %v3411_v10  ;;  %v3415_v18 = vadd.f32 %v3414_v47, %v8503_v43  ;;  %4053 = vmatmul.mubr.f32.gmra.mrb[28].mxu1 %v8409_v57 }
 0x683   : > { %v6230_v34 = vpop.eup %6229  ;;  %4552 = vst [vmem:[%s8535_s24 + $0x130] sm:$0xff] %v6228_v32  ;;  %v3672_v21 = vadd.f32 %v3671_v13, %v8505_v46  ;;  %v3416_v48 = vpop.f32.mrb[179].mxu1  ;;  %6251 = vtanh.f32 %v3668_v7  ;;  %4058 = vmatprep.mubr.f32.mxu1 %v6639_v2 }
 0x684   : > { %v3673_v52 = vpop.f32.mrb[83].mxu0  ;;  %v6232_v35 = vpop.eup %6231  ;;  %4556 = vst [vmem:[%s8535_s24 + $0x150] sm:$0xff] %v6230_v34  ;;  %v3417_v12 = vadd.f32 %v3416_v48, %v8508_v6  ;;  %6253 = vtanh.f32 %v3415_v18 }
 0x685   : > { %v3674_v60 = vadd.f32 %v3673_v52, %v8510_v22  ;;  %v6234_v0 = vpop.eup %6233  ;;  %4558 = vst [vmem:[%s8535_s24 + $0x160] sm:$0xff] %v6232_v35  ;;  %6255 = vtanh.f32 %v3672_v21  ;;  %v3420_v30 = vpop.f32.mrb[180].mxu1 }
 0x686   : > { %v6236_v39 = vpop.eup %6235  ;;  %4557 = vst [vmem:[%s8535_s24 + $0x158] sm:$0xff] %v6234_v0  ;;  %v3677_v1 = vpop.f32.mrb[84].mxu0  ;;  %6257 = vtanh.f32 %v3417_v12  ;;  %v3421_v8 = vadd.f32 %v3420_v30, %v8503_v43  ;;  %4059 = vmatmul.mubr.f32.gmra.mrb[30].mxu1 %v8415_v59 }
 0x687   : > { %v6238_v41 = vpop.eup %6237  ;;  %4559 = vst [vmem:[%s8535_s24 + $0x168] sm:$0xff] %v6236_v39  ;;  %v3678_v44 = vadd.f32 %v3677_v1, %v8505_v46  ;;  %v3422_v58 = vpop.f32.mrb[181].mxu1  ;;  %6259 = vtanh.f32 %v3674_v60  ;;  %5601 = vmatprep.mubr.f32.mxu1 %v8325_v56 }
 0x688   : > { %v3679_v2 = vpop.f32.mrb[85].mxu0  ;;  %v6240_v31 = vpop.eup %6239  ;;  %4563 = vst [vmem:[%s8535_s24 + $0x188] sm:$0xff] %v6238_v41  ;;  %v3423_v45 = vadd.f32 %v3422_v58, %v8508_v6  ;;  %6261 = vtanh.f32 %v3421_v8 }
 0x689   : > { %v3680_v14 = vadd.f32 %v3679_v2, %v8510_v22  ;;  %v6242_v16 = vpop.eup %6241  ;;  %4565 = vst [vmem:[%s8535_s24 + $0x198] sm:$0xff] %v6240_v31  ;;  %6263 = vtanh.f32 %v3678_v44  ;;  %v3426_v33 = vpop.f32.mrb[182].mxu1 }
 0x68a   : > { %v6244_v20 = vpop.eup %6243  ;;  %4564 = vst [vmem:[%s8535_s24 + $0x190] sm:$0xff] %v6242_v16  ;;  %v3683_v36 = vpop.f32.mrb[86].mxu0  ;;  %6265 = vtanh.f32 %v3423_v45  ;;  %v3427_v25 = vadd.f32 %v3426_v33, %v8503_v43  ;;  %5602 = vmatmul.mubr.f32.vlgmr.msra.gmra.mrb[32].mxu1 %v8331_v28 }
 0x68b   : > { %v6246_v49 = vpop.eup %6245  ;;  %4566 = vst [vmem:[%s8535_s24 + $0x1a0] sm:$0xff] %v6244_v20  ;;  %v3684_v38 = vadd.f32 %v3683_v36, %v8505_v46  ;;  %v3428_v54 = vpop.f32.mrb[183].mxu1  ;;  %6267 = vtanh.f32 %v3680_v14  ;;  %5604 = vmatprep.mubr.f32.mxu1 %v8339_v27 }
 0x68c   : > { %v3685_v56 = vpop.f32.mrb[87].mxu0  ;;  %v6248_v55 = vpop.eup %6247  ;;  %4570 = vst [vmem:[%s8535_s24 + $0x1c0] sm:$0xff] %v6246_v49  ;;  %v3429_v24 = vadd.f32 %v3428_v54, %v8508_v6  ;;  %6269 = vtanh.f32 %v3427_v25 }
 0x68d   : > { %v3686_v4 = vadd.f32 %v3685_v56, %v8510_v22  ;;  %v6250_v37 = vpop.eup %6249  ;;  %4572 = vst [vmem:[%s8535_s24 + $0x1d0] sm:$0xff] %v6248_v55  ;;  %6271 = vtanh.f32 %v3684_v38  ;;  %v3432_v42 = vpop.f32.mrb[184].mxu1 }
 0x68e   : > { %v6252_v40 = vpop.eup %6251  ;;  %4571 = vst [vmem:[%s8535_s24 + $0x1c8] sm:$0xff] %v6250_v37  ;;  %v3689_v29 = vpop.f32.mrb[88].mxu0  ;;  %6273 = vtanh.f32 %v3429_v24  ;;  %v3433_v50 = vadd.f32 %v3432_v42, %v8503_v43  ;;  %5605 = vmatmul.mubr.f32.gmra.mrb[34].mxu1 %v8345_v63 }
 0x68f   : > { %v6254_v28 = vpop.eup %6253  ;;  %4573 = vst [vmem:[%s8535_s24 + $0x1d8] sm:$0xff] %v6252_v40  ;;  %v3690_v53 = vadd.f32 %v3689_v29, %v8505_v46  ;;  %v3434_v61 = vpop.f32.mrb[185].mxu1  ;;  %6275 = vtanh.f32 %v3686_v4  ;;  %5607 = vmatprep.mubr.f32.mxu1 %v8353_v5 }
 0x690   : > { %v3691_v27 = vpop.f32.mrb[89].mxu0  ;;  %v6256_v62 = vpop.eup %6255  ;;  %4577 = vst [vmem:[%s8535_s24 + $0x1f8] sm:$0xff] %v6254_v28  ;;  %v3435_v10 = vadd.f32 %v3434_v61, %v8508_v6  ;;  %6277 = vtanh.f32 %v3433_v50 }
 0x691   : > { %v3692_v7 = vadd.f32 %v3691_v27, %v8510_v22  ;;  %v6258_v9 = vpop.eup %6257  ;;  %4579 = vst [vmem:[%s8535_s24 + $0x208] sm:$0xff] %v6256_v62  ;;  %6279 = vtanh.f32 %v3690_v53  ;;  %v3438_v47 = vpop.f32.mrb[186].mxu1 }
 0x692   : > { %v6260_v32 = vpop.eup %6259  ;;  %4578 = vst [vmem:[%s8535_s24 + $0x200] sm:$0xff] %v6258_v9  ;;  %v3695_v13 = vpop.f32.mrb[90].mxu0  ;;  %6281 = vtanh.f32 %v3435_v10  ;;  %v3439_v34 = vadd.f32 %v3438_v47, %v8503_v43  ;;  %5608 = vmatmul.mubr.f32.gmra.mrb[36].mxu1 %v8359_v17 }
 0x693   : > { %v6262_v63 = vpop.eup %6261  ;;  %4580 = vst [vmem:[%s8535_s24 + $0x210] sm:$0xff] %v6260_v32  ;;  %v3696_v18 = vadd.f32 %v3695_v13, %v8505_v46  ;;  %v3440_v21 = vpop.f32.mrb[187].mxu1  ;;  %6283 = vtanh.f32 %v3692_v7  ;;  %5610 = vmatprep.mubr.f32.mxu1 %v8367_v3 }
 0x694   : > { %v3697_v5 = vpop.f32.mrb[91].mxu0  ;;  %v6264_v48 = vpop.eup %6263  ;;  %4584 = vst [vmem:[%s8535_s24 + $0x230] sm:$0xff] %v6262_v63  ;;  %v3441_v52 = vadd.f32 %v3440_v21, %v8508_v6  ;;  %6285 = vtanh.f32 %v3439_v34 }
 0x695   : > { %v3698_v35 = vadd.f32 %v3697_v5, %v8510_v22  ;;  %v6266_v12 = vpop.eup %6265  ;;  %4586 = vst [vmem:[%s8535_s24 + $0x240] sm:$0xff] %v6264_v48  ;;  %6287 = vtanh.f32 %v3696_v18  ;;  %v3444_v0 = vpop.f32.mrb[188].mxu1 }
 0x696   : > { %v6268_v60 = vpop.eup %6267  ;;  %4585 = vst [vmem:[%s8535_s24 + $0x238] sm:$0xff] %v6266_v12  ;;  %v3701_v39 = vpop.f32.mrb[92].mxu0  ;;  %6289 = vtanh.f32 %v3441_v52  ;;  %v3445_v30 = vadd.f32 %v3444_v0, %v8503_v43  ;;  %5611 = vmatmul.mubr.f32.gmra.mrb[38].mxu1 %v8373_v15 }
 0x697   : > { %v6270_v17 = vpop.eup %6269  ;;  %4587 = vst [vmem:[%s8535_s24 + $0x248] sm:$0xff] %v6268_v60  ;;  %v3702_v1 = vadd.f32 %v3701_v39, %v8505_v46  ;;  %v3446_v41 = vpop.f32.mrb[189].mxu1  ;;  %6291 = vtanh.f32 %v3698_v35  ;;  %5613 = vmatprep.mubr.f32.mxu1 %v8381_v19 }
 0x698   : > { %v3703_v3 = vpop.f32.mrb[93].mxu0  ;;  %v6272_v8 = vpop.eup %6271  ;;  %4591 = vst [vmem:[%s8535_s24 + $0x268] sm:$0xff] %v6270_v17  ;;  %v3447_v44 = vadd.f32 %v3446_v41, %v8508_v6  ;;  %6293 = vtanh.f32 %v3445_v30 }
 0x699   : > { %v3704_v58 = vadd.f32 %v3703_v3, %v8510_v22  ;;  %v6274_v2 = vpop.eup %6273  ;;  %4593 = vst [vmem:[%s8535_s24 + $0x278] sm:$0xff] %v6272_v8  ;;  %6295 = vtanh.f32 %v3702_v1  ;;  %v3450_v45 = vpop.f32.mrb[190].mxu1 }
 0x69a   : > { %v6276_v31 = vpop.eup %6275  ;;  %4592 = vst [vmem:[%s8535_s24 + $0x270] sm:$0xff] %v6274_v2  ;;  %v3707_v14 = vpop.f32.mrb[94].mxu0  ;;  %6297 = vtanh.f32 %v3447_v44  ;;  %v3451_v16 = vadd.f32 %v3450_v45, %v8503_v43  ;;  %5614 = vmatmul.mubr.f32.gmra.mrb[40].mxu1 %v8387_v11 }
 0x69b   : > { %v6278_v15 = vpop.eup %6277  ;;  %4594 = vst [vmem:[%s8535_s24 + $0x280] sm:$0xff] %v6276_v31  ;;  %v3708_v20 = vadd.f32 %v3707_v14, %v8505_v46  ;;  %v3452_v33 = vpop.f32.mrb[191].mxu1  ;;  %6299 = vtanh.f32 %v3704_v58  ;;  %5616 = vmatprep.mubr.f32.mxu1 %v8395_v26 }
 0x69c   : > { %v3709_v19 = vpop.f32.mrb[95].mxu0  ;;  %v6280_v36 = vpop.eup %6279  ;;  %4598 = vst [vmem:[%s8535_s24 + $0x2a0] sm:$0xff] %v6278_v15  ;;  %v3453_v49 = vadd.f32 %v3452_v33, %v8508_v6  ;;  %6301 = vtanh.f32 %v3451_v16 }
 0x69d   : > { %v3710_v25 = vadd.f32 %v3709_v19, %v8510_v22  ;;  %v6282_v38 = vpop.eup %6281  ;;  %4600 = vst [vmem:[%s8535_s24 + $0x2b0] sm:$0xff] %v6280_v36  ;;  %6303 = vtanh.f32 %v3708_v20  ;;  %v3456_v56 = vpop.f32.mrb[192].mxu1 }
 0x69e   : > { %v6284_v54 = vpop.eup %6283  ;;  %4599 = vst [vmem:[%s8535_s24 + $0x2a8] sm:$0xff] %v6282_v38  ;;  %v3713_v55 = vpop.f32.mrb[96].mxu0  ;;  %6305 = vtanh.f32 %v3453_v49  ;;  %v3457_v24 = vadd.f32 %v3456_v56, %v8503_v43  ;;  %5617 = vmatmul.mubr.f32.gmra.mrb[42].mxu1 %v8401_v51 }
 0x69f   : > { %v6286_v11 = vpop.eup %6285  ;;  %4601 = vst [vmem:[%s8535_s24 + $0x2b8] sm:$0xff] %v6284_v54  ;;  %v3714_v4 = vadd.f32 %v3713_v55, %v8505_v46  ;;  %v3458_v37 = vpop.f32.mrb[193].mxu1  ;;  %6307 = vtanh.f32 %v3710_v25  ;;  %5619 = vmatprep.mubr.f32.mxu1 %v8409_v57 }
 0x6a0   : > { %v3715_v26 = vpop.f32.mrb[97].mxu0  ;;  %v6288_v40 = vpop.eup %6287  ;;  %4605 = vst [vmem:[%s8535_s24 + $0x2d8] sm:$0xff] %v6286_v11  ;;  %v3459_v42 = vadd.f32 %v3458_v37, %v8508_v6  ;;  %6309 = vtanh.f32 %v3457_v24 }
 0x6a1   : > { %v3716_v29 = vadd.f32 %v3715_v26, %v8510_v22  ;;  %v6290_v28 = vpop.eup %6289  ;;  %4607 = vst [vmem:[%s8535_s24 + $0x2e8] sm:$0xff] %v6288_v40  ;;  %6311 = vtanh.f32 %v3714_v4  ;;  %v3462_v53 = vpop.f32.mrb[194].mxu1 }
 0x6a2   : > { %v6292_v50 = vpop.eup %6291  ;;  %4606 = vst [vmem:[%s8535_s24 + $0x2e0] sm:$0xff] %v6290_v28  ;;  %v3719_v51 = vpop.f32.mrb[98].mxu0  ;;  %6313 = vtanh.f32 %v3459_v42  ;;  %v3463_v27 = vadd.f32 %v3462_v53, %v8503_v43  ;;  %5620 = vmatmul.mubr.f32.gmra.mrb[44].mxu1 %v8415_v59 }
 0x6a3   : > { %v6294_v61 = vpop.eup %6293  ;;  %4608 = vst [vmem:[%s8535_s24 + $0x2f0] sm:$0xff] %v6292_v50  ;;  %v3720_v62 = vadd.f32 %v3719_v51, %v8505_v46  ;;  %v3464_v10 = vpop.f32.mrb[195].mxu1  ;;  %6315 = vtanh.f32 %v3716_v29 }
 0x6a4   : > { %v3721_v57 = vpop.f32.mrb[99].mxu0  ;;  %v6296_v7 = vpop.eup %6295  ;;  %4612 = vst [vmem:[%s8535_s24 + $0x310] sm:$0xff] %v6294_v61  ;;  %v3465_v9 = vadd.f32 %v3464_v10, %v8508_v6  ;;  %6317 = vtanh.f32 %v3463_v27 }
 0x6a5   : > { %v3722_v32 = vadd.f32 %v3721_v57, %v8510_v22  ;;  %v6298_v47 = vpop.eup %6297  ;;  %4614 = vst [vmem:[%s8535_s24 + $0x320] sm:$0xff] %v6296_v7  ;;  %6319 = vtanh.f32 %v3720_v62  ;;  %v3468_v63 = vpop.f32.mrb[196].mxu1 }
 0x6a6   : > { %v6300_v13 = vpop.eup %6299  ;;  %4613 = vst [vmem:[%s8535_s24 + $0x318] sm:$0xff] %v6298_v47  ;;  %v3725_v34 = vpop.f32.mrb[100].mxu0  ;;  %6321 = vtanh.f32 %v3465_v9  ;;  %v3469_v59 = vadd.f32 %v3468_v63, %v8503_v43 }
 0x6a7   : > { %v6302_v18 = vpop.eup %6301  ;;  %4615 = vst [vmem:[%s8535_s24 + $0x328] sm:$0xff] %v6300_v13  ;;  %v3726_v21 = vadd.f32 %v3725_v34, %v8505_v46  ;;  %v3470_v5 = vpop.f32.mrb[197].mxu1  ;;  %6323 = vtanh.f32 %v3722_v32 }
 0x6a8   : > { %v3727_v48 = vpop.f32.mrb[101].mxu0  ;;  %v6304_v52 = vpop.eup %6303  ;;  %4619 = vst [vmem:[%s8535_s24 + $0x348] sm:$0xff] %v6302_v18  ;;  %v3471_v35 = vadd.f32 %v3470_v5, %v8508_v6  ;;  %6325 = vtanh.f32 %v3469_v59 }
 0x6a9   : > { %v3728_v12 = vadd.f32 %v3727_v48, %v8510_v22  ;;  %v6306_v60 = vpop.eup %6305  ;;  %4621 = vst [vmem:[%s8535_s24 + $0x358] sm:$0xff] %v6304_v52  ;;  %6327 = vtanh.f32 %v3726_v21  ;;  %v3474_v39 = vpop.f32.mrb[198].mxu1 }
 0x6aa   : > { %v6308_v0 = vpop.eup %6307  ;;  %4620 = vst [vmem:[%s8535_s24 + $0x350] sm:$0xff] %v6306_v60  ;;  %v3731_v17 = vpop.f32.mrb[102].mxu0  ;;  %6329 = vtanh.f32 %v3471_v35  ;;  %v3475_v1 = vadd.f32 %v3474_v39, %v8503_v43 }
 0x6ab   : > { %v6310_v30 = vpop.eup %6309  ;;  %4622 = vst [vmem:[%s8535_s24 + $0x360] sm:$0xff] %v6308_v0  ;;  %v3732_v41 = vadd.f32 %v3731_v17, %v8505_v46  ;;  %v3476_v3 = vpop.f32.mrb[199].mxu1  ;;  %6331 = vtanh.f32 %v3728_v12 }
 0x6ac   : > { %v3733_v8 = vpop.f32.mrb[103].mxu0  ;;  %v6312_v44 = vpop.eup %6311  ;;  %4626 = vst [vmem:[%s8535_s24 + $0x380] sm:$0xff] %v6310_v30  ;;  %v3477_v58 = vadd.f32 %v3476_v3, %v8508_v6  ;;  %6333 = vtanh.f32 %v3475_v1 }
 0x6ad   : > { %v3734_v2 = vadd.f32 %v3733_v8, %v8510_v22  ;;  %v6314_v31 = vpop.eup %6313  ;;  %4628 = vst [vmem:[%s8535_s24 + $0x390] sm:$0xff] %v6312_v44  ;;  %6335 = vtanh.f32 %v3732_v41  ;;  %v3480_v14 = vpop.f32.mrb[200].mxu1 }
 0x6ae   : > { %v6316_v45 = vpop.eup %6315  ;;  %4627 = vst [vmem:[%s8535_s24 + $0x388] sm:$0xff] %v6314_v31  ;;  %v3737_v15 = vpop.f32.mrb[104].mxu0  ;;  %6337 = vtanh.f32 %v3477_v58  ;;  %v3481_v20 = vadd.f32 %v3480_v14, %v8503_v43 }
 0x6af   : > { %v6318_v16 = vpop.eup %6317  ;;  %4629 = vst [vmem:[%s8535_s24 + $0x398] sm:$0xff] %v6316_v45  ;;  %v3738_v33 = vadd.f32 %v3737_v15, %v8505_v46  ;;  %v3482_v19 = vpop.f32.mrb[201].mxu1  ;;  %6339 = vtanh.f32 %v3734_v2 }
 0x6b0   : > { %v3739_v36 = vpop.f32.mrb[105].mxu0  ;;  %v6320_v49 = vpop.eup %6319  ;;  %4633 = vst [vmem:[%s8535_s24 + $0x3b8] sm:$0xff] %v6318_v16  ;;  %v3483_v25 = vadd.f32 %v3482_v19, %v8508_v6  ;;  %6341 = vtanh.f32 %v3481_v20 }
 0x6b1   : > { %v3740_v38 = vadd.f32 %v3739_v36, %v8510_v22  ;;  %v6322_v54 = vpop.eup %6321  ;;  %4635 = vst [vmem:[%s8535_s24 + $0x3c8] sm:$0xff] %v6320_v49  ;;  %6343 = vtanh.f32 %v3738_v33  ;;  %v3486_v55 = vpop.f32.mrb[202].mxu1 }
 0x6b2   : > { %v6324_v56 = vpop.eup %6323  ;;  %4634 = vst [vmem:[%s8535_s24 + $0x3c0] sm:$0xff] %v6322_v54  ;;  %v3743_v11 = vpop.f32.mrb[106].mxu0  ;;  %6345 = vtanh.f32 %v3483_v25  ;;  %v3487_v4 = vadd.f32 %v3486_v55, %v8503_v43 }
 0x6b3   : > { %v6326_v24 = vpop.eup %6325  ;;  %4636 = vst [vmem:[%s8535_s24 + $0x3d0] sm:$0xff] %v6324_v56  ;;  %v3744_v37 = vadd.f32 %v3743_v11, %v8505_v46  ;;  %v3488_v26 = vpop.f32.mrb[203].mxu1  ;;  %6347 = vtanh.f32 %v3740_v38 }
 0x6b4   : > { %v3745_v40 = vpop.f32.mrb[107].mxu0  ;;  %v6328_v42 = vpop.eup %6327  ;;  %4640 = vst [vmem:[%s8535_s24 + $0x3f0] sm:$0xff] %v6326_v24  ;;  %v3489_v29 = vadd.f32 %v3488_v26, %v8508_v6  ;;  %6349 = vtanh.f32 %v3487_v4 }
 0x6b5   : > { %v3746_v28 = vadd.f32 %v3745_v40, %v8510_v22  ;;  %v6330_v50 = vpop.eup %6329  ;;  %4642 = vst [vmem:[%s8535_s24 + $0x400] sm:$0xff] %v6328_v42  ;;  %6351 = vtanh.f32 %v3744_v37  ;;  %v3492_v51 = vpop.f32.mrb[204].mxu1 }
 0x6b6   : > { %v6332_v53 = vpop.eup %6331  ;;  %4641 = vst [vmem:[%s8535_s24 + $0x3f8] sm:$0xff] %v6330_v50  ;;  %v3749_v61 = vpop.f32.mrb[108].mxu0  ;;  %6353 = vtanh.f32 %v3489_v29  ;;  %v3493_v62 = vadd.f32 %v3492_v51, %v8503_v43 }
 0x6b7   : > { %v6334_v27 = vpop.eup %6333  ;;  %4643 = vst [vmem:[%s8535_s24 + $0x408] sm:$0xff] %v6332_v53  ;;  %v3750_v10 = vadd.f32 %v3749_v61, %v8505_v46  ;;  %v3494_v57 = vpop.f32.mrb[205].mxu1  ;;  %6355 = vtanh.f32 %v3746_v28 }
 0x6b8   : > { %v3751_v7 = vpop.f32.mrb[109].mxu0  ;;  %v6336_v9 = vpop.eup %6335  ;;  %4647 = vst [vmem:[%s8535_s24 + $0x428] sm:$0xff] %v6334_v27  ;;  %v3495_v32 = vadd.f32 %v3494_v57, %v8508_v6  ;;  %6357 = vtanh.f32 %v3493_v62 }
 0x6b9   : > { %v3752_v47 = vadd.f32 %v3751_v7, %v8510_v22  ;;  %v6338_v13 = vpop.eup %6337  ;;  %4649 = vst [vmem:[%s8535_s24 + $0x438] sm:$0xff] %v6336_v9  ;;  %6359 = vtanh.f32 %v3750_v10  ;;  %v3498_v34 = vpop.f32.mrb[206].mxu1 }
 0x6ba   : > { %v6340_v63 = vpop.eup %6339  ;;  %4648 = vst [vmem:[%s8535_s24 + $0x430] sm:$0xff] %v6338_v13  ;;  %v3755_v18 = vpop.f32.mrb[110].mxu0  ;;  %6361 = vtanh.f32 %v3495_v32  ;;  %v3499_v21 = vadd.f32 %v3498_v34, %v8503_v43 }
 0x6bb   : > { %v6342_v59 = vpop.eup %6341  ;;  %4650 = vst [vmem:[%s8535_s24 + $0x440] sm:$0xff] %v6340_v63  ;;  %v3756_v5 = vadd.f32 %v3755_v18, %v8505_v46  ;;  %v3500_v48 = vpop.f32.mrb[207].mxu1  ;;  %6363 = vtanh.f32 %v3752_v47 }
 0x6bc   : > { %v3757_v52 = vpop.f32.mrb[111].mxu0  ;;  %v6344_v35 = vpop.eup %6343  ;;  %4654 = vst [vmem:[%s8535_s24 + $0x460] sm:$0xff] %v6342_v59  ;;  %v3501_v12 = vadd.f32 %v3500_v48, %v8508_v6  ;;  %6365 = vtanh.f32 %v3499_v21 }
 0x6bd   : > { %v3758_v60 = vadd.f32 %v3757_v52, %v8510_v22  ;;  %v6346_v0 = vpop.eup %6345  ;;  %4656 = vst [vmem:[%s8535_s24 + $0x470] sm:$0xff] %v6344_v35  ;;  %6367 = vtanh.f32 %v3756_v5  ;;  %v3504_v17 = vpop.f32.mrb[208].mxu1 }
 0x6be   : > { %v6348_v39 = vpop.eup %6347  ;;  %4655 = vst [vmem:[%s8535_s24 + $0x468] sm:$0xff] %v6346_v0  ;;  %v3761_v30 = vpop.f32.mrb[112].mxu0  ;;  %6369 = vtanh.f32 %v3501_v12  ;;  %v3505_v41 = vadd.f32 %v3504_v17, %v8503_v43 }
 0x6bf   : > { %v6350_v1 = vpop.eup %6349  ;;  %4657 = vst [vmem:[%s8535_s24 + $0x478] sm:$0xff] %v6348_v39  ;;  %v3762_v3 = vadd.f32 %v3761_v30, %v8505_v46  ;;  %v3506_v8 = vpop.f32.mrb[209].mxu1  ;;  %6371 = vtanh.f32 %v3758_v60 }
 0x6c0   : > { %v3763_v44 = vpop.f32.mrb[113].mxu0  ;;  %v6352_v58 = vpop.eup %6351  ;;  %4661 = vst [vmem:[%s8535_s24 + $0x498] sm:$0xff] %v6350_v1  ;;  %v3507_v2 = vadd.f32 %v3506_v8, %v8508_v6  ;;  %6373 = vtanh.f32 %v3505_v41 }
 0x6c1   : > { %v3764_v31 = vadd.f32 %v3763_v44, %v8510_v22  ;;  %v6354_v45 = vpop.eup %6353  ;;  %4663 = vst [vmem:[%s8535_s24 + $0x4a8] sm:$0xff] %v6352_v58  ;;  %6375 = vtanh.f32 %v3762_v3  ;;  %v3510_v15 = vpop.f32.mrb[210].mxu1 }
 0x6c2   : > { %v6356_v14 = vpop.eup %6355  ;;  %4662 = vst [vmem:[%s8535_s24 + $0x4a0] sm:$0xff] %v6354_v45  ;;  %v3767_v16 = vpop.f32.mrb[114].mxu0  ;;  %6377 = vtanh.f32 %v3507_v2  ;;  %v3511_v33 = vadd.f32 %v3510_v15, %v8503_v43 }
 0x6c3   : > { %v6358_v20 = vpop.eup %6357  ;;  %4664 = vst [vmem:[%s8535_s24 + $0x4b0] sm:$0xff] %v6356_v14  ;;  %v3768_v19 = vadd.f32 %v3767_v16, %v8505_v46  ;;  %v3512_v36 = vpop.f32.mrb[211].mxu1  ;;  %6379 = vtanh.f32 %v3764_v31 }
 0x6c4   : > { %v3769_v49 = vpop.f32.mrb[115].mxu0  ;;  %v6360_v25 = vpop.eup %6359  ;;  %4668 = vst [vmem:[%s8535_s24 + $0x4d0] sm:$0xff] %v6358_v20  ;;  %v3513_v38 = vadd.f32 %v3512_v36, %v8508_v6  ;;  %6381 = vtanh.f32 %v3511_v33  ;;  %v3277_v33 = vsub.s32 4, %v8490_v23 }
 0x6c5   : > { %v3770_v54 = vadd.f32 %v3769_v49, %v8510_v22  ;;  %v6362_v56 = vpop.eup %6361  ;;  %4670 = vst [vmem:[%s8535_s24 + $0x4e0] sm:$0xff] %v6360_v25  ;;  %6383 = vtanh.f32 %v3768_v19  ;;  %v3516_v11 = vpop.f32.mrb[212].mxu1 }
 0x6c6   : > { %v6364_v55 = vpop.eup %6363  ;;  %4669 = vst [vmem:[%s8535_s24 + $0x4d8] sm:$0xff] %v6362_v56  ;;  %v3773_v24 = vpop.f32.mrb[116].mxu0  ;;  %6385 = vtanh.f32 %v3513_v38  ;;  %v3517_v37 = vadd.f32 %v3516_v11, %v8503_v43 }
 0x6c7   : > { %v6366_v4 = vpop.eup %6365  ;;  %4671 = vst [vmem:[%s8535_s24 + $0x4e8] sm:$0xff] %v6364_v55  ;;  %v3774_v26 = vadd.f32 %v3773_v24, %v8505_v46  ;;  %v3518_v40 = vpop.f32.mrb[213].mxu1  ;;  %6387 = vtanh.f32 %v3770_v54  ;;  %v3285_v54 = vsub.s32 6, %v8490_v23  ;;  %v3281_v24 = vsub.s32 5, %v8490_v23 }
 0x6c8   : > { %v3775_v42 = vpop.f32.mrb[117].mxu0  ;;  %v6368_v29 = vpop.eup %6367  ;;  %4675 = vst [vmem:[%s8535_s24 + $0x508] sm:$0xff] %v6366_v4  ;;  %v3519_v28 = vadd.f32 %v3518_v40, %v8508_v6  ;;  %6389 = vtanh.f32 %v3517_v37 }
 0x6c9   : > { %v3776_v50 = vadd.f32 %v3775_v42, %v8510_v22  ;;  %v6370_v53 = vpop.eup %6369  ;;  %4677 = vst [vmem:[%s8535_s24 + $0x518] sm:$0xff] %v6368_v29  ;;  %6391 = vtanh.f32 %v3774_v26  ;;  %v3522_v61 = vpop.f32.mrb[214].mxu1  ;;  %v6629_v42 = vld [vmem:[%s9061_s12] sm:$0x7f] }
 0x6ca   : > { %v6372_v51 = vpop.eup %6371  ;;  %4676 = vst [vmem:[%s8535_s24 + $0x510] sm:$0xff] %v6370_v53  ;;  %v3779_v27 = vpop.f32.mrb[118].mxu0  ;;  %6393 = vtanh.f32 %v3519_v28  ;;  %v3523_v10 = vadd.f32 %v3522_v61, %v8503_v43  ;;  %v8795_v29 = vrot.slane %v6629_v42, %v3277_v33  ;;  %v8800_v61 = vrot.slane %v6629_v42, %v3285_v54 }
 0x6cb   : > { %v6374_v62 = vpop.eup %6373  ;;  %4678 = vst [vmem:[%s8535_s24 + $0x520] sm:$0xff] %v6372_v51  ;;  %v3780_v57 = vadd.f32 %v3779_v27, %v8505_v46  ;;  %v3524_v7 = vpop.f32.mrb[215].mxu1  ;;  %6395 = vtanh.f32 %v3776_v50 }
 0x6cc   : > { %v3781_v9 = vpop.f32.mrb[119].mxu0  ;;  %v6376_v32 = vpop.eup %6375  ;;  %4682 = vst [vmem:[%s8535_s24 + $0x540] sm:$0xff] %v6374_v62  ;;  %v3525_v47 = vadd.f32 %v3524_v7, %v8508_v6  ;;  %6397 = vtanh.f32 %v3523_v10 }
 0x6cd   : > { %v3782_v13 = vadd.f32 %v3781_v9, %v8510_v22  ;;  %v6378_v63 = vpop.eup %6377  ;;  %4684 = vst [vmem:[%s8535_s24 + $0x550] sm:$0xff] %v6376_v32  ;;  %6399 = vtanh.f32 %v3780_v57  ;;  %v3528_v18 = vpop.f32.mrb[216].mxu1  ;;  %v8805_v57 = vrot.slane %v6629_v42, %v3281_v24 }
 0x6ce   : > { %v6380_v34 = vpop.eup %6379  ;;  %4683 = vst [vmem:[%s8535_s24 + $0x548] sm:$0xff] %v6378_v63  ;;  %v3785_v59 = vpop.f32.mrb[120].mxu0  ;;  %6401 = vtanh.f32 %v3525_v47  ;;  %v3529_v5 = vadd.f32 %v3528_v18, %v8503_v43 }
 0x6cf   : > { %v6382_v21 = vpop.eup %6381  ;;  %4685 = vst [vmem:[%s8535_s24 + $0x558] sm:$0xff] %v6380_v34  ;;  %v3786_v48 = vadd.f32 %v3785_v59, %v8505_v46  ;;  %v3530_v52 = vpop.f32.mrb[217].mxu1  ;;  %6403 = vtanh.f32 %v3782_v13 }
 0x6d0   : > { %v3787_v35 = vpop.f32.mrb[121].mxu0  ;;  %v6384_v12 = vpop.eup %6383  ;;  %4689 = vst [vmem:[%s8535_s24 + $0x578] sm:$0xff] %v6382_v21  ;;  %v3531_v60 = vadd.f32 %v3530_v52, %v8508_v6  ;;  %6405 = vtanh.f32 %v3529_v5 }
 0x6d1   : > { %v3788_v0 = vadd.f32 %v3787_v35, %v8510_v22  ;;  %v6386_v39 = vpop.eup %6385  ;;  %4691 = vst [vmem:[%s8535_s24 + $0x588] sm:$0xff] %v6384_v12  ;;  %6407 = vtanh.f32 %v3786_v48  ;;  %v3534_v30 = vpop.f32.mrb[218].mxu1 }
 0x6d2   : > { %v6388_v17 = vpop.eup %6387  ;;  %4690 = vst [vmem:[%s8535_s24 + $0x580] sm:$0xff] %v6386_v39  ;;  %v3791_v1 = vpop.f32.mrb[122].mxu0  ;;  %6409 = vtanh.f32 %v3531_v60  ;;  %v3535_v3 = vadd.f32 %v3534_v30, %v8503_v43 }
 0x6d3   : > { %v6390_v41 = vpop.eup %6389  ;;  %4692 = vst [vmem:[%s8535_s24 + $0x590] sm:$0xff] %v6388_v17  ;;  %v3792_v8 = vadd.f32 %v3791_v1, %v8505_v46  ;;  %v3536_v44 = vpop.f32.mrb[219].mxu1  ;;  %6411 = vtanh.f32 %v3788_v0 }
 0x6d4   : > { %v3793_v58 = vpop.f32.mrb[123].mxu0  ;;  %v6392_v2 = vpop.eup %6391  ;;  %4696 = vst [vmem:[%s8535_s24 + $0x5b0] sm:$0xff] %v6390_v41  ;;  %v3537_v31 = vadd.f32 %v3536_v44, %v8508_v6  ;;  %6413 = vtanh.f32 %v3535_v3 }
 0x6d5   : > { %v3794_v45 = vadd.f32 %v3793_v58, %v8510_v22  ;;  %v6394_v14 = vpop.eup %6393  ;;  %4698 = vst [vmem:[%s8535_s24 + $0x5c0] sm:$0xff] %v6392_v2  ;;  %6415 = vtanh.f32 %v3792_v8  ;;  %v3540_v16 = vpop.f32.mrb[220].mxu1 }
 0x6d6   : > { %v6396_v15 = vpop.eup %6395  ;;  %4697 = vst [vmem:[%s8535_s24 + $0x5b8] sm:$0xff] %v6394_v14  ;;  %v3797_v20 = vpop.f32.mrb[124].mxu0  ;;  %6417 = vtanh.f32 %v3537_v31  ;;  %v3541_v36 = vadd.f32 %v3540_v16, %v8503_v43 }
 0x6d7   : > { %v6398_v19 = vpop.eup %6397  ;;  %4699 = vst [vmem:[%s8535_s24 + $0x5c8] sm:$0xff] %v6396_v15  ;;  %v3798_v49 = vadd.f32 %v3797_v20, %v8505_v46  ;;  %v3542_v25 = vpop.f32.mrb[221].mxu1  ;;  %6419 = vtanh.f32 %v3794_v45 }
 0x6d8   : > { %v3799_v38 = vpop.f32.mrb[125].mxu0  ;;  %v6400_v56 = vpop.eup %6399  ;;  %4703 = vst [vmem:[%s8535_s24 + $0x5e8] sm:$0xff] %v6398_v19  ;;  %v3543_v55 = vadd.f32 %v3542_v25, %v8508_v6  ;;  %6421 = vtanh.f32 %v3541_v36 }
 0x6d9   : > { %v3800_v11 = vadd.f32 %v3799_v38, %v8510_v22  ;;  %v6402_v4 = vpop.eup %6401  ;;  %4705 = vst [vmem:[%s8535_s24 + $0x5f8] sm:$0xff] %v6400_v56  ;;  %6423 = vtanh.f32 %v3798_v49  ;;  %v3546_v26 = vpop.f32.mrb[222].mxu1 }
 0x6da   : > { %v6404_v37 = vpop.eup %6403  ;;  %4704 = vst [vmem:[%s8535_s24 + $0x5f0] sm:$0xff] %v6402_v4  ;;  %v3803_v40 = vpop.f32.mrb[126].mxu0  ;;  %6425 = vtanh.f32 %v3543_v55  ;;  %v3547_v23 = vadd.f32 %v3546_v26, %v8503_v43 }
 0x6db   : > { %v6406_v28 = vpop.eup %6405  ;;  %4706 = vst [vmem:[%s8535_s24 + $0x600] sm:$0xff] %v6404_v37  ;;  %v3804_v50 = vadd.f32 %v3803_v40, %v8505_v46  ;;  %v3548_v53 = vpop.f32.mrb[223].mxu1  ;;  %6427 = vtanh.f32 %v3800_v11 }
 0x6dc   : > { %v3805_v51 = vpop.f32.mrb[127].mxu0  ;;  %v6408_v27 = vpop.eup %6407  ;;  %4710 = vst [vmem:[%s8535_s24 + $0x620] sm:$0xff] %v6406_v28  ;;  %v3549_v62 = vadd.f32 %v3548_v53, %v8508_v6  ;;  %6429 = vtanh.f32 %v3547_v23 }
 0x6dd   : > { %v3806_v10 = vadd.f32 %v3805_v51, %v8510_v22  ;;  %v6410_v7 = vpop.eup %6409  ;;  %4712 = vst [vmem:[%s8535_s24 + $0x630] sm:$0xff] %v6408_v27  ;;  %6431 = vtanh.f32 %v3804_v50  ;;  %v3874_v46 = vpop.f32.mrb[224].mxu1 }
 0x6de   : > { %v6412_v43 = vpop.eup %6411  ;;  %4711 = vst [vmem:[%s8535_s24 + $0x628] sm:$0xff] %v6410_v7  ;;  %v5576_v9 = vpop.f32.mrb[128].mxu0  ;;  %6433 = vtanh.f32 %v3549_v62  ;;  %v3875_v6 = vadd.f32 %v3874_v46, %v8795_v29 }
 0x6df   : > { %v6414_v32 = vpop.eup %6413  ;;  %4713 = vst [vmem:[%s8535_s24 + $0x638] sm:$0xff] %v6412_v43  ;;  %v4137_v22 = vadd.f32 %v5576_v9, %v8800_v61  ;;  %v3876_v47 = vpop.f32.mrb[225].mxu1  ;;  %6435 = vtanh.f32 %v3806_v10 }
 0x6e0   : > { %v4131_v13 = vpop.f32.mrb[129].mxu0  ;;  %v6416_v63 = vpop.eup %6415  ;;  %4717 = vst [vmem:[%s8535_s24 + $0x658] sm:$0xff] %v6414_v32  ;;  %v3877_v34 = vadd.f32 %v3876_v47, %v8805_v57  ;;  %6437 = vtanh.f32 %v3875_v6 }
 0x6e1   : > { %v4132_v18 = vadd.f32 %v4131_v13, %v8800_v61  ;;  %v6418_v59 = vpop.eup %6417  ;;  %4719 = vst [vmem:[%s8535_s24 + $0x668] sm:$0xff] %v6416_v63  ;;  %6439 = vtanh.f32 %v4137_v22  ;;  %v3880_v5 = vpop.f32.mrb[226].mxu1 }
 0x6e2   : > { %v6420_v21 = vpop.eup %6419  ;;  %4718 = vst [vmem:[%s8535_s24 + $0x660] sm:$0xff] %v6418_v59  ;;  %v5579_v48 = vpop.f32.mrb[130].mxu0  ;;  %6441 = vtanh.f32 %v3877_v34  ;;  %v3881_v35 = vadd.f32 %v3880_v5, %v8795_v29 }
 0x6e3   : > { %v6422_v52 = vpop.eup %6421  ;;  %4720 = vst [vmem:[%s8535_s24 + $0x670] sm:$0xff] %v6420_v21  ;;  %v4147_v12 = vadd.f32 %v5579_v48, %v8800_v61  ;;  %v3882_v60 = vpop.f32.mrb[227].mxu1  ;;  %6443 = vtanh.f32 %v4132_v18 }
 0x6e4   : > { %v4141_v0 = vpop.f32.mrb[131].mxu0  ;;  %v6424_v39 = vpop.eup %6423  ;;  %4724 = vst [vmem:[%s8535_s24 + $0x690] sm:$0xff] %v6422_v52  ;;  %v3883_v17 = vadd.f32 %v3882_v60, %v8805_v57  ;;  %6445 = vtanh.f32 %v3881_v35 }
 0x6e5   : > { %v4142_v30 = vadd.f32 %v4141_v0, %v8800_v61  ;;  %v6426_v1 = vpop.eup %6425  ;;  %4726 = vst [vmem:[%s8535_s24 + $0x6a0] sm:$0xff] %v6424_v39  ;;  %6447 = vtanh.f32 %v4147_v12  ;;  %v3886_v3 = vpop.f32.mrb[228].mxu1 }
 0x6e6   : > { %v6428_v41 = vpop.eup %6427  ;;  %4725 = vst [vmem:[%s8535_s24 + $0x698] sm:$0xff] %v6426_v1  ;;  %v5582_v8 = vpop.f32.mrb[132].mxu0  ;;  %6449 = vtanh.f32 %v3883_v17  ;;  %v3887_v58 = vadd.f32 %v3886_v3, %v8795_v29 }
 0x6e7   : > { %v6430_v44 = vpop.eup %6429  ;;  %4727 = vst [vmem:[%s8535_s24 + $0x6a8] sm:$0xff] %v6428_v41  ;;  %v4157_v2 = vadd.f32 %v5582_v8, %v8800_v61  ;;  %v3888_v31 = vpop.f32.mrb[229].mxu1  ;;  %6451 = vtanh.f32 %v4142_v30 }
 0x6e8   : > { %v4151_v45 = vpop.f32.mrb[133].mxu0  ;;  %v6432_v14 = vpop.eup %6431  ;;  %4731 = vst [vmem:[%s8535_s24 + $0x6c8] sm:$0xff] %v6430_v44  ;;  %v3889_v15 = vadd.f32 %v3888_v31, %v8805_v57  ;;  %6453 = vtanh.f32 %v3887_v58 }
 0x6e9   : > { %v4152_v16 = vadd.f32 %v4151_v45, %v8800_v61  ;;  %v6434_v20 = vpop.eup %6433  ;;  %4733 = vst [vmem:[%s8535_s24 + $0x6d8] sm:$0xff] %v6432_v14  ;;  %6455 = vtanh.f32 %v4157_v2  ;;  %v3892_v19 = vpop.f32.mrb[230].mxu1 }
 0x6ea   : > { %v6436_v33 = vpop.eup %6435  ;;  %4732 = vst [vmem:[%s8535_s24 + $0x6d0] sm:$0xff] %v6434_v20  ;;  %v5585_v36 = vpop.f32.mrb[134].mxu0  ;;  %6457 = vtanh.f32 %v3889_v15  ;;  %v3893_v25 = vadd.f32 %v3892_v19, %v8795_v29 }
 0x6eb   : > { %v6438_v49 = vpop.eup %6437  ;;  %4734 = vst [vmem:[%s8535_s24 + $0x6e0] sm:$0xff] %v6436_v33  ;;  %v4167_v38 = vadd.f32 %v5585_v36, %v8800_v61  ;;  %v3894_v54 = vpop.f32.mrb[231].mxu1  ;;  %6459 = vtanh.f32 %v4152_v16 }
 0x6ec   : > { %v4161_v56 = vpop.f32.mrb[135].mxu0  ;;  %v6440_v55 = vpop.eup %6439  ;;  %4518 = vst [vmem:[%s8535_s24 + $0x20] sm:$0xff] %v6438_v49  ;;  %v3895_v11 = vadd.f32 %v3894_v54, %v8805_v57  ;;  %6461 = vtanh.f32 %v3893_v25 }
 0x6ed   : > { %v4162_v24 = vadd.f32 %v4161_v56, %v8800_v61  ;;  %v6442_v4 = vpop.eup %6441  ;;  %4527 = vst.msk [vmem:[%s8535_s24 + $0x68] sm:$0xff] %vm819_vm0, %v6440_v55  ;;  %6463 = vtanh.f32 %v4167_v38  ;;  %v3898_v26 = vpop.f32.mrb[232].mxu1 }
 0x6ee   : > { %v6444_v37 = vpop.eup %6443  ;;  %4519 = vst [vmem:[%s8535_s24 + $0x28] sm:$0xff] %v6442_v4  ;;  %v5588_v40 = vpop.f32.mrb[136].mxu0  ;;  %6465 = vtanh.f32 %v3895_v11  ;;  %v3899_v28 = vadd.f32 %v3898_v26, %v8795_v29 }
 0x6ef   : > { %v6446_v42 = vpop.eup %6445  ;;  %4520 = vst.msk [vmem:[%s8535_s24 + $0x30] sm:$0xff] %vm819_vm0, %v6444_v37  ;;  %v4177_v23 = vadd.f32 %v5588_v40, %v8800_v61  ;;  %v3900_v50 = vpop.f32.mrb[233].mxu1  ;;  %6467 = vtanh.f32 %v4162_v24 }
 0x6f0   : > { %v4171_v53 = vpop.f32.mrb[137].mxu0  ;;  %v6448_v51 = vpop.eup %6447  ;;  %4525 = vst [vmem:[%s8535_s24 + $0x58] sm:$0xff] %v6446_v42  ;;  %v3901_v27 = vadd.f32 %v3900_v50, %v8805_v57  ;;  %6469 = vtanh.f32 %v3899_v28 }
 0x6f1   : > { %v4172_v62 = vadd.f32 %v4171_v53, %v8800_v61  ;;  %v6450_v10 = vpop.eup %6449  ;;  %4541 = vst.msk [vmem:[%s8535_s24 + $0xd8] sm:$0xff] %vm819_vm0, %v6448_v51  ;;  %6471 = vtanh.f32 %v4177_v23  ;;  %v3904_v43 = vpop.f32.mrb[234].mxu1 }
 0x6f2   : > { %v6452_v7 = vpop.eup %6451  ;;  %4526 = vst [vmem:[%s8535_s24 + $0x60] sm:$0xff] %v6450_v10  ;;  %v5591_v46 = vpop.f32.mrb[138].mxu0  ;;  %6473 = vtanh.f32 %v3901_v27  ;;  %v3905_v32 = vadd.f32 %v3904_v43, %v8795_v29 }
 0x6f3   : > { %v6454_v9 = vpop.eup %6453  ;;  %4534 = vst.msk [vmem:[%s8535_s24 + $0xa0] sm:$0xff] %vm819_vm0, %v6452_v7  ;;  %v4187_v6 = vadd.f32 %v5591_v46, %v8800_v61  ;;  %v3906_v22 = vpop.f32.mrb[235].mxu1  ;;  %6475 = vtanh.f32 %v4172_v62 }
 0x6f4   : > { %v4181_v47 = vpop.f32.mrb[139].mxu0  ;;  %v6456_v13 = vpop.eup %6455  ;;  %4532 = vst [vmem:[%s8535_s24 + $0x90] sm:$0xff] %v6454_v9  ;;  %v3907_v63 = vadd.f32 %v3906_v22, %v8805_v57  ;;  %6477 = vtanh.f32 %v3905_v32 }
 0x6f5   : > { %v4182_v34 = vadd.f32 %v4181_v47, %v8800_v61  ;;  %v6458_v18 = vpop.eup %6457  ;;  %4555 = vst.msk [vmem:[%s8535_s24 + $0x148] sm:$0xff] %vm819_vm0, %v6456_v13  ;;  %6479 = vtanh.f32 %v4187_v6  ;;  %v3910_v21 = vpop.f32.mrb[236].mxu1 }
 0x6f6   : > { %v6460_v59 = vpop.eup %6459  ;;  %4533 = vst [vmem:[%s8535_s24 + $0x98] sm:$0xff] %v6458_v18  ;;  %v5594_v5 = vpop.f32.mrb[140].mxu0  ;;  %6481 = vtanh.f32 %v3907_v63  ;;  %v3911_v52 = vadd.f32 %v3910_v21, %v8795_v29 }
 0x6f7   : > { %v6462_v48 = vpop.eup %6461  ;;  %4548 = vst.msk [vmem:[%s8535_s24 + $0x110] sm:$0xff] %vm819_vm0, %v6460_v59  ;;  %v4197_v35 = vadd.f32 %v5594_v5, %v8800_v61  ;;  %v3912_v12 = vpop.f32.mrb[237].mxu1  ;;  %6483 = vtanh.f32 %v4182_v34 }
 0x6f8   : > { %v4191_v60 = vpop.f32.mrb[141].mxu0  ;;  %v6464_v0 = vpop.eup %6463  ;;  %4539 = vst [vmem:[%s8535_s24 + $0xc8] sm:$0xff] %v6462_v48  ;;  %v3913_v39 = vadd.f32 %v3912_v12, %v8805_v57  ;;  %6485 = vtanh.f32 %v3911_v52 }
 0x6f9   : > { %v4192_v17 = vadd.f32 %v4191_v60, %v8800_v61  ;;  %v6466_v30 = vpop.eup %6465  ;;  %4569 = vst.msk [vmem:[%s8535_s24 + $0x1b8] sm:$0xff] %vm819_vm0, %v6464_v0  ;;  %6487 = vtanh.f32 %v4197_v35  ;;  %v3916_v41 = vpop.f32.mrb[238].mxu1 }
 0x6fa   : > { %v6468_v1 = vpop.eup %6467  ;;  %4540 = vst [vmem:[%s8535_s24 + $0xd0] sm:$0xff] %v6466_v30  ;;  %v5597_v3 = vpop.f32.mrb[142].mxu0  ;;  %6489 = vtanh.f32 %v3913_v39  ;;  %v3917_v44 = vadd.f32 %v3916_v41, %v8795_v29 }
 0x6fb   : > { %v6470_v8 = vpop.eup %6469  ;;  %4562 = vst.msk [vmem:[%s8535_s24 + $0x180] sm:$0xff] %vm819_vm0, %v6468_v1  ;;  %v4207_v58 = vadd.f32 %v5597_v3, %v8800_v61  ;;  %v3918_v2 = vpop.f32.mrb[239].mxu1  ;;  %6491 = vtanh.f32 %v4192_v17 }
 0x6fc   : > { %v4201_v31 = vpop.f32.mrb[143].mxu0  ;;  %v6472_v45 = vpop.eup %6471  ;;  %4546 = vst [vmem:[%s8535_s24 + $0x100] sm:$0xff] %v6470_v8  ;;  %v3919_v14 = vadd.f32 %v3918_v2, %v8805_v57  ;;  %6493 = vtanh.f32 %v3917_v44 }
 0x6fd   : > { %v4202_v15 = vadd.f32 %v4201_v31, %v8800_v61  ;;  %v6474_v16 = vpop.eup %6473  ;;  %4583 = vst.msk [vmem:[%s8535_s24 + $0x228] sm:$0xff] %vm819_vm0, %v6472_v45  ;;  %6495 = vtanh.f32 %v4207_v58  ;;  %v3922_v33 = vpop.f32.mrb[240].mxu1 }
 0x6fe   : > { %v6476_v20 = vpop.eup %6475  ;;  %4547 = vst [vmem:[%s8535_s24 + $0x108] sm:$0xff] %v6474_v16  ;;  %v5600_v19 = vpop.f32.mrb[144].mxu0  ;;  %6497 = vtanh.f32 %v3919_v14  ;;  %v3923_v49 = vadd.f32 %v3922_v33, %v8795_v29 }
 0x6ff   : > { %v6478_v36 = vpop.eup %6477  ;;  %4576 = vst.msk [vmem:[%s8535_s24 + $0x1f0] sm:$0xff] %vm819_vm0, %v6476_v20  ;;  %v4217_v25 = vadd.f32 %v5600_v19, %v8800_v61  ;;  %v3924_v38 = vpop.f32.mrb[241].mxu1  ;;  %6499 = vtanh.f32 %v4202_v15 }
 0x700   : > { %v4211_v54 = vpop.f32.mrb[145].mxu0  ;;  %v6480_v56 = vpop.eup %6479  ;;  %4553 = vst [vmem:[%s8535_s24 + $0x138] sm:$0xff] %v6478_v36  ;;  %v3925_v55 = vadd.f32 %v3924_v38, %v8805_v57  ;;  %6501 = vtanh.f32 %v3923_v49 }
 0x701   : > { %v4212_v11 = vadd.f32 %v4211_v54, %v8800_v61  ;;  %v6482_v24 = vpop.eup %6481  ;;  %4597 = vst.msk [vmem:[%s8535_s24 + $0x298] sm:$0xff] %vm819_vm0, %v6480_v56  ;;  %6503 = vtanh.f32 %v4217_v25  ;;  %v3928_v37 = vpop.f32.mrb[242].mxu1 }
 0x702   : > { %v6484_v4 = vpop.eup %6483  ;;  %4554 = vst [vmem:[%s8535_s24 + $0x140] sm:$0xff] %v6482_v24  ;;  %6505 = vtanh.f32 %v3925_v55  ;;  %v3929_v40 = vadd.f32 %v3928_v37, %v8795_v29  ;;  %v3930_v42 = vpop.f32.mrb[243].mxu1 }
 0x703   : > { %v6486_v26 = vpop.eup %6485  ;;  %4590 = vst.msk [vmem:[%s8535_s24 + $0x260] sm:$0xff] %vm819_vm0, %v6484_v4  ;;  %6507 = vtanh.f32 %v4212_v11  ;;  %v3931_v23 = vadd.f32 %v3930_v42, %v8805_v57 }
 0x704   : > { %v6488_v28 = vpop.eup %6487  ;;  %4560 = vst [vmem:[%s8535_s24 + $0x170] sm:$0xff] %v6486_v26  ;;  %6509 = vtanh.f32 %v3929_v40 }
 0x705   : > { %v6490_v50 = vpop.eup %6489  ;;  %4611 = vst.msk [vmem:[%s8535_s24 + $0x308] sm:$0xff] %vm819_vm0, %v6488_v28  ;;  %6511 = vtanh.f32 %v3931_v23  ;;  %v3934_v51 = vpop.f32.mrb[244].mxu1 }
 0x706   : > { %v6492_v53 = vpop.eup %6491  ;;  %4561 = vst [vmem:[%s8535_s24 + $0x178] sm:$0xff] %v6490_v50  ;;  %v3935_v62 = vadd.f32 %v3934_v51, %v8795_v29  ;;  %v3936_v10 = vpop.f32.mrb[245].mxu1 }
 0x707   : > { %v6494_v27 = vpop.eup %6493  ;;  %4604 = vst.msk [vmem:[%s8535_s24 + $0x2d0] sm:$0xff] %vm819_vm0, %v6492_v53  ;;  %v3937_v43 = vadd.f32 %v3936_v10, %v8805_v57 }
 0x708   : > { %v6496_v7 = vpop.eup %6495  ;;  %4567 = vst [vmem:[%s8535_s24 + $0x1a8] sm:$0xff] %v6494_v27  ;;  %6513 = vtanh.f32 %v3935_v62 }
 0x709   : > { %v6498_v46 = vpop.eup %6497  ;;  %4625 = vst.msk [vmem:[%s8535_s24 + $0x378] sm:$0xff] %vm819_vm0, %v6496_v7  ;;  %6515 = vtanh.f32 %v3937_v43  ;;  %v3940_v32 = vpop.f32.mrb[246].mxu1 }
 0x70a   : > { %v6500_v9 = vpop.eup %6499  ;;  %4568 = vst [vmem:[%s8535_s24 + $0x1b0] sm:$0xff] %v6498_v46  ;;  %v3941_v22 = vadd.f32 %v3940_v32, %v8795_v29  ;;  %v3942_v47 = vpop.f32.mrb[247].mxu1 }
 0x70b   : > { %v6502_v6 = vpop.eup %6501  ;;  %4618 = vst.msk [vmem:[%s8535_s24 + $0x340] sm:$0xff] %vm819_vm0, %v6500_v9  ;;  %v3943_v63 = vadd.f32 %v3942_v47, %v8805_v57 }
 0x70c   : > { %v6504_v13 = vpop.eup %6503  ;;  %4574 = vst [vmem:[%s8535_s24 + $0x1e0] sm:$0xff] %v6502_v6  ;;  %6517 = vtanh.f32 %v3941_v22 }
 0x70d   : > { %v6506_v34 = vpop.eup %6505  ;;  %4639 = vst.msk [vmem:[%s8535_s24 + $0x3e8] sm:$0xff] %vm819_vm0, %v6504_v13  ;;  %6519 = vtanh.f32 %v3943_v63  ;;  %v3946_v59 = vpop.f32.mrb[248].mxu1 }
 0x70e   : > { %v6508_v18 = vpop.eup %6507  ;;  %4575 = vst [vmem:[%s8535_s24 + $0x1e8] sm:$0xff] %v6506_v34  ;;  %v3947_v5 = vadd.f32 %v3946_v59, %v8795_v29  ;;  %v3948_v48 = vpop.f32.mrb[249].mxu1 }
 0x70f   : > { %v6510_v21 = vpop.eup %6509  ;;  %4632 = vst.msk [vmem:[%s8535_s24 + $0x3b0] sm:$0xff] %vm819_vm0, %v6508_v18  ;;  %v3949_v35 = vadd.f32 %v3948_v48, %v8805_v57 }
 0x710   : > { %v6512_v52 = vpop.eup %6511  ;;  %4581 = vst [vmem:[%s8535_s24 + $0x218] sm:$0xff] %v6510_v21  ;;  %6521 = vtanh.f32 %v3947_v5 }
 0x711   : > { %4582 = vst [vmem:[%s8535_s24 + $0x220] sm:$0xff] %v6512_v52  ;;  %6523 = vtanh.f32 %v3949_v35  ;;  %v3952_v12 = vpop.f32.mrb[250].mxu1 }
 0x712   : > { %v6514_v60 = vpop.eup %6513  ;;  %v3953_v0 = vadd.f32 %v3952_v12, %v8795_v29  ;;  %v3954_v39 = vpop.f32.mrb[251].mxu1 }
 0x713   : > { %v6516_v17 = vpop.eup %6515  ;;  %4588 = vst [vmem:[%s8535_s24 + $0x250] sm:$0xff] %v6514_v60  ;;  %v3955_v30 = vadd.f32 %v3954_v39, %v8805_v57 }
 0x714   : > { %4589 = vst [vmem:[%s8535_s24 + $0x258] sm:$0xff] %v6516_v17  ;;  %6525 = vtanh.f32 %v3953_v0 }
 0x715   : > { %6527 = vtanh.f32 %v3955_v30  ;;  %v3958_v1 = vpop.f32.mrb[252].mxu1 }
 0x716   : > { %v6518_v41 = vpop.eup %6517  ;;  %v3959_v3 = vadd.f32 %v3958_v1, %v8795_v29  ;;  %v3960_v8 = vpop.f32.mrb[253].mxu1 }
 0x717   : > { %v6520_v44 = vpop.eup %6519  ;;  %4595 = vst [vmem:[%s8535_s24 + $0x288] sm:$0xff] %v6518_v41  ;;  %v3961_v58 = vadd.f32 %v3960_v8, %v8805_v57 }
 0x718   : > { %4596 = vst [vmem:[%s8535_s24 + $0x290] sm:$0xff] %v6520_v44  ;;  %6529 = vtanh.f32 %v3959_v3 }
 0x719   : > { %6531 = vtanh.f32 %v3961_v58  ;;  %v3964_v2 = vpop.f32.mrb[254].mxu1 }
 0x71a   : > { %v6522_v31 = vpop.eup %6521  ;;  %v3965_v45 = vadd.f32 %v3964_v2, %v8795_v29  ;;  %v3966_v14 = vpop.f32.mrb[255].mxu1 }
 0x71b   : > { %v6524_v15 = vpop.eup %6523  ;;  %4602 = vst [vmem:[%s8535_s24 + $0x2c0] sm:$0xff] %v6522_v31  ;;  %v3967_v16 = vadd.f32 %v3966_v14, %v8805_v57 }
 0x71c   : > { %4603 = vst [vmem:[%s8535_s24 + $0x2c8] sm:$0xff] %v6524_v15  ;;  %6533 = vtanh.f32 %v3965_v45 }
 0x71d   : > { %6535 = vtanh.f32 %v3967_v16  ;;  %v3970_v20 = vpop.f32.mrb[0].mxu1 }
 0x71e   : > { %v6526_v33 = vpop.eup %6525  ;;  %v3971_v19 = vadd.f32 %v3970_v20, %v8795_v29  ;;  %v3972_v36 = vpop.f32.mrb[1].mxu1 }
 0x71f   : > { %v6528_v49 = vpop.eup %6527  ;;  %4609 = vst [vmem:[%s8535_s24 + $0x2f8] sm:$0xff] %v6526_v33  ;;  %v3973_v25 = vadd.f32 %v3972_v36, %v8805_v57 }
 0x720   : > { %4610 = vst [vmem:[%s8535_s24 + $0x300] sm:$0xff] %v6528_v49  ;;  %6537 = vtanh.f32 %v3971_v19 }
 0x721   : > { %6539 = vtanh.f32 %v3973_v25  ;;  %v3976_v38 = vpop.f32.mrb[2].mxu1 }
 0x722   : > { %v6530_v54 = vpop.eup %6529  ;;  %v3977_v56 = vadd.f32 %v3976_v38, %v8795_v29  ;;  %v3978_v55 = vpop.f32.mrb[3].mxu1 }
 0x723   : > { %v6532_v11 = vpop.eup %6531  ;;  %4616 = vst [vmem:[%s8535_s24 + $0x330] sm:$0xff] %v6530_v54  ;;  %v3979_v24 = vadd.f32 %v3978_v55, %v8805_v57 }
 0x724   : > { %4617 = vst [vmem:[%s8535_s24 + $0x338] sm:$0xff] %v6532_v11  ;;  %6541 = vtanh.f32 %v3977_v56 }
 0x725   : > { %6543 = vtanh.f32 %v3979_v24  ;;  %v3982_v4 = vpop.f32.mrb[4].mxu1 }
 0x726   : > { %v6534_v37 = vpop.eup %6533  ;;  %v3983_v26 = vadd.f32 %v3982_v4, %v8795_v29  ;;  %v3984_v40 = vpop.f32.mrb[5].mxu1 }
 0x727   : > { %v6536_v42 = vpop.eup %6535  ;;  %4623 = vst [vmem:[%s8535_s24 + $0x368] sm:$0xff] %v6534_v37  ;;  %v3985_v28 = vadd.f32 %v3984_v40, %v8805_v57 }
 0x728   : > { %4624 = vst [vmem:[%s8535_s24 + $0x370] sm:$0xff] %v6536_v42  ;;  %6545 = vtanh.f32 %v3983_v26 }
 0x729   : > { %6547 = vtanh.f32 %v3985_v28  ;;  %v3988_v23 = vpop.f32.mrb[6].mxu1 }
 0x72a   : > { %v6538_v50 = vpop.eup %6537  ;;  %v3989_v53 = vadd.f32 %v3988_v23, %v8795_v29  ;;  %v3990_v51 = vpop.f32.mrb[7].mxu1 }
 0x72b   : > { %v6540_v27 = vpop.eup %6539  ;;  %4630 = vst [vmem:[%s8535_s24 + $0x3a0] sm:$0xff] %v6538_v50  ;;  %v3991_v62 = vadd.f32 %v3990_v51, %v8805_v57 }
 0x72c   : > { %4631 = vst [vmem:[%s8535_s24 + $0x3a8] sm:$0xff] %v6540_v27  ;;  %6549 = vtanh.f32 %v3989_v53 }
 0x72d   : > { %6551 = vtanh.f32 %v3991_v62  ;;  %v3994_v10 = vpop.f32.mrb[8].mxu1 }
 0x72e   : > { %v6542_v7 = vpop.eup %6541  ;;  %v3995_v43 = vadd.f32 %v3994_v10, %v8795_v29  ;;  %v3996_v46 = vpop.f32.mrb[9].mxu1 }
 0x72f   : > { %v6544_v9 = vpop.eup %6543  ;;  %4637 = vst [vmem:[%s8535_s24 + $0x3d8] sm:$0xff] %v6542_v7  ;;  %v3997_v32 = vadd.f32 %v3996_v46, %v8805_v57 }
 0x730   : > { %4638 = vst [vmem:[%s8535_s24 + $0x3e0] sm:$0xff] %v6544_v9  ;;  %6553 = vtanh.f32 %v3995_v43 }
 0x731   : > { %6555 = vtanh.f32 %v3997_v32  ;;  %v4000_v6 = vpop.f32.mrb[10].mxu1 }
 0x732   : > { %v6546_v22 = vpop.eup %6545  ;;  %v4001_v47 = vadd.f32 %v4000_v6, %v8795_v29  ;;  %v4002_v13 = vpop.f32.mrb[11].mxu1 }
 0x733   : > { %v6548_v63 = vpop.eup %6547  ;;  %4644 = vst [vmem:[%s8535_s24 + $0x410] sm:$0xff] %v6546_v22  ;;  %v4003_v34 = vadd.f32 %v4002_v13, %v8805_v57 }
 0x734   : > { %4645 = vst [vmem:[%s8535_s24 + $0x418] sm:$0xff] %v6548_v63  ;;  %6557 = vtanh.f32 %v4001_v47 }
 0x735   : > { %6559 = vtanh.f32 %v4003_v34  ;;  %v4006_v18 = vpop.f32.mrb[12].mxu1 }
 0x736   : > { %v6550_v59 = vpop.eup %6549  ;;  %v4007_v21 = vadd.f32 %v4006_v18, %v8795_v29  ;;  %v4008_v5 = vpop.f32.mrb[13].mxu1 }
 0x737   : > { %v6552_v48 = vpop.eup %6551  ;;  %4651 = vst [vmem:[%s8535_s24 + $0x448] sm:$0xff] %v6550_v59  ;;  %v4009_v52 = vadd.f32 %v4008_v5, %v8805_v57 }
 0x738   : > { %4652 = vst [vmem:[%s8535_s24 + $0x450] sm:$0xff] %v6552_v48  ;;  %6561 = vtanh.f32 %v4007_v21 }
 0x739   : > { %6563 = vtanh.f32 %v4009_v52  ;;  %v4012_v35 = vpop.f32.mrb[14].mxu1 }
 0x73a   : > { %v6554_v12 = vpop.eup %6553  ;;  %v4013_v60 = vadd.f32 %v4012_v35, %v8795_v29  ;;  %v4014_v0 = vpop.f32.mrb[15].mxu1 }
 0x73b   : > { %v6556_v39 = vpop.eup %6555  ;;  %4658 = vst [vmem:[%s8535_s24 + $0x480] sm:$0xff] %v6554_v12  ;;  %v4015_v17 = vadd.f32 %v4014_v0, %v8805_v57 }
 0x73c   : > { %4659 = vst [vmem:[%s8535_s24 + $0x488] sm:$0xff] %v6556_v39  ;;  %6565 = vtanh.f32 %v4013_v60 }
 0x73d   : > { %6567 = vtanh.f32 %v4015_v17  ;;  %v4018_v30 = vpop.f32.mrb[16].mxu1 }
 0x73e   : > { %v6558_v1 = vpop.eup %6557  ;;  %v4019_v41 = vadd.f32 %v4018_v30, %v8795_v29  ;;  %v4020_v3 = vpop.f32.mrb[17].mxu1 }
 0x73f   : > { %v6560_v8 = vpop.eup %6559  ;;  %4665 = vst [vmem:[%s8535_s24 + $0x4b8] sm:$0xff] %v6558_v1  ;;  %v4021_v44 = vadd.f32 %v4020_v3, %v8805_v57 }
 0x740   : > { %4666 = vst [vmem:[%s8535_s24 + $0x4c0] sm:$0xff] %v6560_v8  ;;  %6569 = vtanh.f32 %v4019_v41 }
 0x741   : > { %6571 = vtanh.f32 %v4021_v44  ;;  %v4024_v58 = vpop.f32.mrb[18].mxu1 }
 0x742   : > { %v6562_v2 = vpop.eup %6561  ;;  %v4025_v31 = vadd.f32 %v4024_v58, %v8795_v29  ;;  %v4026_v45 = vpop.f32.mrb[19].mxu1 }
 0x743   : > { %v6564_v14 = vpop.eup %6563  ;;  %4672 = vst [vmem:[%s8535_s24 + $0x4f0] sm:$0xff] %v6562_v2  ;;  %v4027_v15 = vadd.f32 %v4026_v45, %v8805_v57 }
 0x744   : > { %4673 = vst [vmem:[%s8535_s24 + $0x4f8] sm:$0xff] %v6564_v14  ;;  %6573 = vtanh.f32 %v4025_v31 }
 0x745   : > { %6575 = vtanh.f32 %v4027_v15  ;;  %v4030_v16 = vpop.f32.mrb[20].mxu1 }
 0x746   : > { %v6566_v20 = vpop.eup %6565  ;;  %v4031_v33 = vadd.f32 %v4030_v16, %v8795_v29  ;;  %v4032_v19 = vpop.f32.mrb[21].mxu1 }
 0x747   : > { %v6568_v36 = vpop.eup %6567  ;;  %4679 = vst [vmem:[%s8535_s24 + $0x528] sm:$0xff] %v6566_v20  ;;  %v4033_v49 = vadd.f32 %v4032_v19, %v8805_v57 }
 0x748   : > { %4680 = vst [vmem:[%s8535_s24 + $0x530] sm:$0xff] %v6568_v36  ;;  %6577 = vtanh.f32 %v4031_v33 }
 0x749   : > { %6579 = vtanh.f32 %v4033_v49  ;;  %v4036_v25 = vpop.f32.mrb[22].mxu1 }
 0x74a   : > { %v6570_v38 = vpop.eup %6569  ;;  %v4037_v54 = vadd.f32 %v4036_v25, %v8795_v29  ;;  %v4038_v56 = vpop.f32.mrb[23].mxu1 }
 0x74b   : > { %v6572_v55 = vpop.eup %6571  ;;  %4686 = vst [vmem:[%s8535_s24 + $0x560] sm:$0xff] %v6570_v38  ;;  %v4039_v11 = vadd.f32 %v4038_v56, %v8805_v57 }
 0x74c   : > { %4687 = vst [vmem:[%s8535_s24 + $0x568] sm:$0xff] %v6572_v55  ;;  %6581 = vtanh.f32 %v4037_v54 }
 0x74d   : > { %6583 = vtanh.f32 %v4039_v11  ;;  %v4042_v24 = vpop.f32.mrb[24].mxu1 }
 0x74e   : > { %v6574_v4 = vpop.eup %6573  ;;  %v4043_v37 = vadd.f32 %v4042_v24, %v8795_v29  ;;  %v4044_v26 = vpop.f32.mrb[25].mxu1 }
 0x74f   : > { %v6576_v40 = vpop.eup %6575  ;;  %4693 = vst [vmem:[%s8535_s24 + $0x598] sm:$0xff] %v6574_v4  ;;  %v4045_v42 = vadd.f32 %v4044_v26, %v8805_v57 }
 0x750   : > { %4694 = vst [vmem:[%s8535_s24 + $0x5a0] sm:$0xff] %v6576_v40  ;;  %6585 = vtanh.f32 %v4043_v37 }
 0x751   : > { %6587 = vtanh.f32 %v4045_v42  ;;  %v4048_v28 = vpop.f32.mrb[26].mxu1 }
 0x752   : > { %v6578_v23 = vpop.eup %6577  ;;  %v4049_v50 = vadd.f32 %v4048_v28, %v8795_v29  ;;  %v4050_v53 = vpop.f32.mrb[27].mxu1 }
 0x753   : > { %v6580_v51 = vpop.eup %6579  ;;  %4700 = vst [vmem:[%s8535_s24 + $0x5d0] sm:$0xff] %v6578_v23  ;;  %v4051_v27 = vadd.f32 %v4050_v53, %v8805_v57 }
 0x754   : > { %4701 = vst [vmem:[%s8535_s24 + $0x5d8] sm:$0xff] %v6580_v51  ;;  %6589 = vtanh.f32 %v4049_v50 }
 0x755   : > { %6591 = vtanh.f32 %v4051_v27  ;;  %v4054_v62 = vpop.f32.mrb[28].mxu1 }
 0x756   : > { %v6582_v10 = vpop.eup %6581  ;;  %v4055_v7 = vadd.f32 %v4054_v62, %v8795_v29  ;;  %v4056_v43 = vpop.f32.mrb[29].mxu1 }
 0x757   : > { %v6584_v46 = vpop.eup %6583  ;;  %4707 = vst [vmem:[%s8535_s24 + $0x608] sm:$0xff] %v6582_v10  ;;  %v4057_v9 = vadd.f32 %v4056_v43, %v8805_v57 }
 0x758   : > { %4708 = vst [vmem:[%s8535_s24 + $0x610] sm:$0xff] %v6584_v46  ;;  %6593 = vtanh.f32 %v4055_v7 }
 0x759   : > { %6595 = vtanh.f32 %v4057_v9  ;;  %v4060_v32 = vpop.f32.mrb[30].mxu1 }
 0x75a   : > { %v6586_v6 = vpop.eup %6585  ;;  %v4061_v22 = vadd.f32 %v4060_v32, %v8795_v29  ;;  %v4062_v47 = vpop.f32.mrb[31].mxu1 }
 0x75b   : > { %v6588_v13 = vpop.eup %6587  ;;  %4714 = vst [vmem:[%s8535_s24 + $0x640] sm:$0xff] %v6586_v6  ;;  %v4063_v63 = vadd.f32 %v4062_v47, %v8805_v57 }
 0x75c   : > { %4715 = vst [vmem:[%s8535_s24 + $0x648] sm:$0xff] %v6588_v13  ;;  %6597 = vtanh.f32 %v4061_v22 }
 0x75d   : > { %6599 = vtanh.f32 %v4063_v63  ;;  %v5603_v34 = vpop.f32.mrb[32].mxu1 }
 0x75e   : > { %v6590_v18 = vpop.eup %6589  ;;  %v4227_v59 = vadd.f32 %v5603_v34, %v8800_v61  ;;  %v4221_v21 = vpop.f32.mrb[33].mxu1 }
 0x75f   : > { %v6592_v5 = vpop.eup %6591  ;;  %4721 = vst [vmem:[%s8535_s24 + $0x678] sm:$0xff] %v6590_v18  ;;  %v4222_v48 = vadd.f32 %v4221_v21, %v8800_v61 }
 0x760   : > { %4722 = vst [vmem:[%s8535_s24 + $0x680] sm:$0xff] %v6592_v5  ;;  %6601 = vtanh.f32 %v4227_v59 }
 0x761   : > { %6603 = vtanh.f32 %v4222_v48  ;;  %v5606_v29 = vpop.f32.mrb[34].mxu1 }
 0x762   : > { %v6594_v57 = vpop.eup %6593  ;;  %v4237_v52 = vadd.f32 %v5606_v29, %v8800_v61  ;;  %v4231_v35 = vpop.f32.mrb[35].mxu1 }
 0x763   : > { %v6596_v12 = vpop.eup %6595  ;;  %4728 = vst [vmem:[%s8535_s24 + $0x6b0] sm:$0xff] %v6594_v57  ;;  %v4232_v60 = vadd.f32 %v4231_v35, %v8800_v61 }
 0x764   : > { %4729 = vst [vmem:[%s8535_s24 + $0x6b8] sm:$0xff] %v6596_v12  ;;  %6605 = vtanh.f32 %v4237_v52 }
 0x765   : > { %6607 = vtanh.f32 %v4232_v60  ;;  %v5609_v0 = vpop.f32.mrb[36].mxu1 }
 0x766   : > { %v6598_v39 = vpop.eup %6597  ;;  %v4247_v17 = vadd.f32 %v5609_v0, %v8800_v61  ;;  %v4241_v30 = vpop.f32.mrb[37].mxu1 }
 0x767   : > { %v6600_v1 = vpop.eup %6599  ;;  %4735 = vst [vmem:[%s8535_s24 + $0x6e8] sm:$0xff] %v6598_v39  ;;  %v4242_v41 = vadd.f32 %v4241_v30, %v8800_v61 }
 0x768   : > { %4736 = vst [vmem:[%s8535_s24 + $0x6f0] sm:$0xff] %v6600_v1  ;;  %6609 = vtanh.f32 %v4247_v17 }
 0x769   : > { %6611 = vtanh.f32 %v4242_v41  ;;  %v5612_v3 = vpop.f32.mrb[38].mxu1 }
 0x76a   : > { %v6602_v8 = vpop.eup %6601  ;;  %v4257_v44 = vadd.f32 %v5612_v3, %v8800_v61  ;;  %v4251_v58 = vpop.f32.mrb[39].mxu1 }
 0x76b   : > { %v6604_v2 = vpop.eup %6603  ;;  %4653 = vst.msk [vmem:[%s8535_s24 + $0x458] sm:$0xff] %vm819_vm0, %v6602_v8  ;;  %v4252_v31 = vadd.f32 %v4251_v58, %v8800_v61 }
 0x76c   : > { %4646 = vst.msk [vmem:[%s8535_s24 + $0x420] sm:$0xff] %vm819_vm0, %v6604_v2  ;;  %6613 = vtanh.f32 %v4257_v44 }
 0x76d   : > { %6615 = vtanh.f32 %v4252_v31  ;;  %v5615_v45 = vpop.f32.mrb[40].mxu1 }
 0x76e   : > { %v6606_v14 = vpop.eup %6605  ;;  %v4267_v15 = vadd.f32 %v5615_v45, %v8800_v61  ;;  %v4261_v16 = vpop.f32.mrb[41].mxu1 }
 0x76f   : > { %v6608_v20 = vpop.eup %6607  ;;  %4667 = vst.msk [vmem:[%s8535_s24 + $0x4c8] sm:$0xff] %vm819_vm0, %v6606_v14  ;;  %v4262_v33 = vadd.f32 %v4261_v16, %v8800_v61 }
 0x770   : > { %4660 = vst.msk [vmem:[%s8535_s24 + $0x490] sm:$0xff] %vm819_vm0, %v6608_v20  ;;  %6617 = vtanh.f32 %v4267_v15 }
 0x771   : > { %6619 = vtanh.f32 %v4262_v33  ;;  %v5618_v19 = vpop.f32.mrb[42].mxu1 }
 0x772   : > { %v6610_v36 = vpop.eup %6609  ;;  %v4277_v49 = vadd.f32 %v5618_v19, %v8800_v61  ;;  %v4271_v25 = vpop.f32.mrb[43].mxu1 }
 0x773   : > { %v6612_v38 = vpop.eup %6611  ;;  %4681 = vst.msk [vmem:[%s8535_s24 + $0x538] sm:$0xff] %vm819_vm0, %v6610_v36  ;;  %v4272_v54 = vadd.f32 %v4271_v25, %v8800_v61 }
 0x774   : > { %4674 = vst.msk [vmem:[%s8535_s24 + $0x500] sm:$0xff] %vm819_vm0, %v6612_v38  ;;  %6621 = vtanh.f32 %v4277_v49 }
 0x775   : > { %6623 = vtanh.f32 %v4272_v54  ;;  %v5621_v56 = vpop.f32.mrb[44].mxu1 }
 0x776   : > { %v6614_v55 = vpop.eup %6613  ;;  %v4287_v11 = vadd.f32 %v5621_v56, %v8800_v61  ;;  %v4281_v24 = vpop.f32.mrb[45].mxu1 }
 0x777   : > { %v6616_v4 = vpop.eup %6615  ;;  %4695 = vst.msk [vmem:[%s8535_s24 + $0x5a8] sm:$0xff] %vm819_vm0, %v6614_v55  ;;  %v4282_v37 = vadd.f32 %v4281_v24, %v8800_v61 }
 0x778   : > { %4688 = vst.msk [vmem:[%s8535_s24 + $0x570] sm:$0xff] %vm819_vm0, %v6616_v4  ;;  %6625 = vtanh.f32 %v4287_v11 }
 0x779   : > { %6627 = vtanh.f32 %v4282_v37 }
 0x77a   : > { %v6618_v26 = vpop.eup %6617 }
 0x77b   : > { %v6620_v40 = vpop.eup %6619  ;;  %4709 = vst.msk [vmem:[%s8535_s24 + $0x618] sm:$0xff] %vm819_vm0, %v6618_v26 }
 0x77c   : > { %4702 = vst.msk [vmem:[%s8535_s24 + $0x5e0] sm:$0xff] %vm819_vm0, %v6620_v40 }
 0x77e   : > { %v6622_v42 = vpop.eup %6621 }
 0x77f   : > { %v6624_v28 = vpop.eup %6623  ;;  %4723 = vst.msk [vmem:[%s8535_s24 + $0x688] sm:$0xff] %vm819_vm0, %v6622_v42 }
 0x780   : > { %4716 = vst.msk [vmem:[%s8535_s24 + $0x650] sm:$0xff] %vm819_vm0, %v6624_v28 }
 0x782   : > { %v6626_v23 = vpop.eup %6625 }
 0x783   : > { %v6628_v50 = vpop.eup %6627  ;;  %4737 = vst.msk [vmem:[%s8535_s24 + $0x6f8] sm:$0xff] %vm819_vm0, %v6626_v23 }
 0x784   : > { %4730 = vst.msk [vmem:[%s8535_s24 + $0x6c0] sm:$0xff] %vm819_vm0, %v6628_v50 }
 0x785 PF: > { %s25_s29 = sadd.s32 1, %s6636_s29  }
 0x786   : > { %p22_p4 = scmp.ge.s32.totalorder %s25_s29, 4  }
 0x788   :  { %24 = sbr.rel (!%p22_p4) target bundleno = 1 (0x1), region = 114 }

</bundles_post_ra>
